<compile_context>
chip_gen: v7x
topology: tpu7x:2x2x1
jax: 0.10.0
libtpu: 0.0.40
codegen_flags: <defaults>
</compile_context>

<pallas_src>
import functools

import jax
import jax.numpy as jnp
from jax import lax
from jax.experimental import pallas as pl
from jax.experimental.pallas import tpu as pltpu

_VMEM_LIMIT = 32 * 1024 * 1024  # safe on v5e/v6e/v7x (v7x physical VMEM = 64 MiB)


def _round_up(x, m):
    return (x + m - 1) // m * m


def _pad2d(a, rows, cols, dtype):
    a = a.astype(dtype)
    if a.shape == (rows, cols):
        return a
    return jnp.zeros((rows, cols), dtype).at[: a.shape[0], : a.shape[1]].set(a)


def _pad_last(a, k_pad):
    """Zero-pad only the last (K) axis — required for GEMM correctness."""
    if a.shape[-1] == k_pad:
        return a
    pad = [(0, 0)] * (a.ndim - 1) + [(0, k_pad - a.shape[-1])]
    return jnp.pad(a, pad)


# ---------------------------------------------------------------------------
# Fused tiled GEMM + bias + (optional) ReLU:  y = act(x @ w + b)
# ---------------------------------------------------------------------------
def _gemm_bias_act_nk1_kernel(x_ref, w_ref, b_ref, o_ref, *, relu):
    # Single-K-block fast path: no accumulator scratch, no init/finalize.
    acc = jnp.dot(x_ref[...], w_ref[...], preferred_element_type=jnp.float32)
    acc = acc + b_ref[...]
    if relu:
        acc = jnp.maximum(acc, 0.0)
    o_ref[...] = acc.astype(o_ref.dtype)


def _gemm_bias_act_acc_kernel(x_ref, w_ref, b_ref, o_ref, acc_ref, *, relu, n_k):
    # Fallback for very large K (not used at these shapes).
    k = pl.program_id(1)

    @pl.when(k == 0)
    def _init():
        acc_ref[...] = jnp.zeros_like(acc_ref)

    acc_ref[...] += jnp.dot(x_ref[...], w_ref[...],
                            preferred_element_type=jnp.float32)

    @pl.when(k == n_k - 1)
    def _finalize():
        acc = acc_ref[...] + b_ref[...]
        if relu:
            acc = jnp.maximum(acc, 0.0)
        o_ref[...] = acc.astype(o_ref.dtype)


def matmul_bias_act(x, w, b, relu=False, out_dtype=jnp.float32,
                    mxu_dtype=jnp.bfloat16):
    """Fused y = act(x @ w + b).  x:(M,K), w:(K,N), b:(N,)."""
    M, K = x.shape
    K2, N = w.shape
    assert K == K2 and b.shape == (N,)

    N_pad = _round_up(N, 128)

    # K tiling: single full-K block whenever it fits comfortably (n_k == 1
    # fast path).  Only falls back to K-accumulation for very large K.
    K_pad = _round_up(K, 128)
    if K_pad <= 8192:
        TK = K_pad
    else:
        TK = 2048
        K_pad = _round_up(K, TK)
    n_k = K_pad // TK

    # M tiling: at most 2 "parallel" tiles for small/medium M (v7x dual-TC),
    # bigger workloads fall back to 512-row tiles.
    if M <= 256:
        TM = _round_up(M, 8)
    elif M <= 2048:
        TM = _round_up(pl.cdiv(M, 2), 8)
    else:
        TM = 512
    n_m = pl.cdiv(M, TM)   # no M padding: OOB rows are masked on store

    x_p = _pad_last(x.astype(mxu_dtype), K_pad)                 # K zero-pad only
    w_p = _pad2d(w, K_pad, N_pad, mxu_dtype)
    b_p = _pad2d(b.reshape(1, N), 1, N_pad, jnp.float32)

    cost = pl.CostEstimate(
        flops=2 * M * K * N,
        transcendentals=0,
        bytes_accessed=(x_p.size * x_p.dtype.itemsize
                        + w_p.size * w_p.dtype.itemsize
                        + M * N_pad * jnp.dtype(out_dtype).itemsize))

    if n_k == 1:
        out = pl.pallas_call(
            functools.partial(_gemm_bias_act_nk1_kernel, relu=relu),
            out_shape=jax.ShapeDtypeStruct((M, N_pad), out_dtype),
            grid=(n_m,),
            in_specs=[
                pl.BlockSpec((TM, TK), lambda i: (i, 0)),
                pl.BlockSpec((TK, N_pad), lambda i: (0, 0)),
                pl.BlockSpec((1, N_pad), lambda i: (0, 0)),
            ],
            out_specs=pl.BlockSpec((TM, N_pad), lambda i: (i, 0)),
            compiler_params=pltpu.CompilerParams(
                dimension_semantics=("parallel",),
                vmem_limit_bytes=_VMEM_LIMIT),
            cost_estimate=cost,
        )(x_p, w_p, b_p)
    else:
        out = pl.pallas_call(
            functools.partial(_gemm_bias_act_acc_kernel, relu=relu, n_k=n_k),
            out_shape=jax.ShapeDtypeStruct((M, N_pad), out_dtype),
            grid=(n_m, n_k),
            in_specs=[
                pl.BlockSpec((TM, TK), lambda i, k: (i, k)),
                pl.BlockSpec((TK, N_pad), lambda i, k: (k, 0)),
                pl.BlockSpec((1, N_pad), lambda i, k: (0, 0)),
            ],
            out_specs=pl.BlockSpec((TM, N_pad), lambda i, k: (i, 0)),
            scratch_shapes=[pltpu.VMEM((TM, N_pad), jnp.float32)],
            compiler_params=pltpu.CompilerParams(
                dimension_semantics=("parallel", "arbitrary"),
                vmem_limit_bytes=_VMEM_LIMIT),
            cost_estimate=cost,
        )(x_p, w_p, b_p)
    return out[:M, :N]


# ---------------------------------------------------------------------------
# Conv2d (VALID, stride s) + ReLU as a patch-GEMM; output stays channels-last
# ---------------------------------------------------------------------------
def conv2d_relu(x, w, b, stride, channels_last_in):
    """w is PyTorch layout (Cout, Cin, KH, KW); x is NCHW or NHWC; out is NHWC."""
    Cout, Cin, KH, KW = w.shape
    dn = ('NHWC', 'HWIO', 'NHWC') if channels_last_in else ('NCHW', 'OIHW', 'NHWC')
    # TODO(synk): gather patches inside the GEMM kernel (pl.ANY input + manual
    # make_async_copy) to avoid materializing the patch matrix in HBM once
    # batch is scaled up (most valuable on v5e's ~0.8 TB/s HBM).
    patches = lax.conv_general_dilated_patches(
        x.astype(jnp.bfloat16), (KH, KW), (stride, stride), 'VALID',
        dimension_numbers=dn)                 # (N, Ho, Wo, Cin*KH*KW), order (c,kh,kw)
    n, ho, wo, kdim = patches.shape
    assert kdim == Cin * KH * KW
    wmat = w.reshape(Cout, kdim).T            # (K, Cout), K-order (c, kh, kw)
    y = matmul_bias_act(patches.reshape(n * ho * wo, kdim), wmat, b,
                        relu=True, out_dtype=jnp.bfloat16)
    return y.reshape(n, ho, wo, Cout)         # channels-last, no transpose


# ---------------------------------------------------------------------------
# Fused post-conv1 path (ONE pallas_call):
#   conv2 patch-GEMM + bias + ReLU + max_pool2d(3) + flatten + mlp1 + ReLU + mlp2
# Max-pool commutes with the (constant) bias add and monotone ReLU, so we take
# the max of the conv2 scores over the pool-window taps inside the kernel.
# ---------------------------------------------------------------------------
def _fused_tail_kernel(px_ref, wc_ref, bc_ref, w1_ref, b1_ref, w2_ref, b2_ref,
                       o_ref, *, win, n_pos):
    win_b, tm, k2p = px_ref.shape[1], px_ref.shape[2], px_ref.shape[3]
    c_pad = wc_ref.shape[1]
    h1 = None
    for p in range(n_pos):                    # static loop over pooled positions
        # One MXU dot for all `win` pool taps at once (layout-preserving merge
        # of the leading dims: tm is a multiple of 8, k2p a multiple of 128).
        lhs = px_ref[p].reshape(win_b * tm, k2p)
        s = jnp.dot(lhs, wc_ref[...], preferred_element_type=jnp.float32)
        pooled = s[0:tm]
        for u in range(1, win):               # max over the pool-window taps
            pooled = jnp.maximum(pooled, s[u * tm:(u + 1) * tm])
        pooled = jnp.maximum(pooled + bc_ref[...], 0.0)   # == pool(relu(conv2))
        # dropout1 / dropout2 are identity at inference -> no-ops.
        contrib = jnp.dot(pooled.astype(w1_ref.dtype), w1_ref[p],
                          preferred_element_type=jnp.float32)
        h1 = contrib if h1 is None else h1 + contrib
    h1 = jnp.maximum(h1 + b1_ref[...], 0.0)
    o = jnp.dot(h1.astype(w2_ref.dtype), w2_ref[...],
                preferred_element_type=jnp.float32) + b2_ref[...]
    o_ref[...] = o.astype(o_ref.dtype)


def fused_conv2_pool_mlp(y1, wc, bc, w1, b1, w2, b2, *, stride=5, pool=3):
    """y1: (N,H,W,C1) channels-last conv1 activations.
    wc: PyTorch conv2 weight (C2, C1, KH, KW);  w1: (C2*Hp*Wp, D1) with rows in
    PyTorch's (c, hp, wp) flatten order;  w2: (D1, Nout)."""
    N, H1, W1, C1 = y1.shape
    C2, _, KH, KW = wc.shape
    K2 = C1 * KH * KW
    Ho, Wo = (H1 - KH) // stride + 1, (W1 - KW) // stride + 1
    Hp, Wp = Ho // pool, Wo // pool           # floor mode, like F.max_pool2d
    P, win = Hp * Wp, pool * pool
    D1, Nout = w1.shape[1], w2.shape[1]

    # conv2 patches (feature order (c, kh, kw), matching the weight flatten),
    # regrouped as (pooled position, pool tap, batch, K2).
    patches = lax.conv_general_dilated_patches(
        y1.astype(jnp.bfloat16), (KH, KW), (stride, stride), 'VALID',
        dimension_numbers=('NHWC', 'HWIO', 'NHWC'))       # (N, Ho, Wo, K2)
    t = patches[:, :Hp * pool, :Wp * pool, :].reshape(N, Hp, pool, Wp, pool, K2)
    px = t.transpose(1, 3, 2, 4, 0, 5).reshape(P, win, N, K2)

    TM = _round_up(N, 8) if N <= 256 else 256
    R_pad = _round_up(N, TM)
    K2_pad = _round_up(K2, 128)
    C_pad = _round_up(C2, 128)
    D1_pad = _round_up(D1, 128)
    No_pad = _round_up(Nout, 128)
    # TODO(synk): for large batch / large pooled grids, tile the P axis across
    # the grid instead of loading all positions per step (VMEM budget).

    px_p = jnp.zeros((P, win, R_pad, K2_pad), jnp.bfloat16)
    px_p = px_p.at[:, :, :N, :K2].set(px.astype(jnp.bfloat16))
    wc_p = _pad2d(wc.reshape(C2, K2).T, K2_pad, C_pad, jnp.bfloat16)
    bc_p = _pad2d(bc.reshape(1, C2), 1, C_pad, jnp.float32)
    # mlp1 rows: PyTorch (c, hp, wp) flatten -> per-position (C2, D1) slices.
    w1_r = w1.reshape(C2, Hp, Wp, D1).transpose(1, 2, 0, 3).reshape(P, C2, D1)
    w1_p = jnp.zeros((P, C_pad, D1_pad), jnp.bfloat16)
    w1_p = w1_p.at[:, :C2, :D1].set(w1_r.astype(jnp.bfloat16))
    b1_p = _pad2d(b1.reshape(1, D1), 1, D1_pad, jnp.float32)
    w2_p = _pad2d(w2, D1_pad, No_pad, jnp.bfloat16)
    b2_p = _pad2d(b2.reshape(1, Nout), 1, No_pad, jnp.float32)

    cost = pl.CostEstimate(
        flops=2 * N * (P * win * K2 * C2 + P * C2 * D1 + D1 * Nout),
        transcendentals=0,
        bytes_accessed=(px_p.size * 2 + wc_p.size * 2 + w1_p.size * 2
                        + w2_p.size * 2 + R_pad * No_pad * 4))

    out = pl.pallas_call(
        functools.partial(_fused_tail_kernel, win=win, n_pos=P),
        out_shape=jax.ShapeDtypeStruct((R_pad, No_pad), jnp.float32),
        grid=(R_pad // TM,),
        in_specs=[
            pl.BlockSpec((P, win, TM, K2_pad), lambda i: (0, 0, i, 0)),
            pl.BlockSpec((K2_pad, C_pad), lambda i: (0, 0)),
            pl.BlockSpec((1, C_pad), lambda i: (0, 0)),
            pl.BlockSpec((P, C_pad, D1_pad), lambda i: (0, 0, 0)),
            pl.BlockSpec((1, D1_pad), lambda i: (0, 0)),
            pl.BlockSpec((D1_pad, No_pad), lambda i: (0, 0)),
            pl.BlockSpec((1, No_pad), lambda i: (0, 0)),
        ],
        out_specs=pl.BlockSpec((TM, No_pad), lambda i: (i, 0)),
        compiler_params=pltpu.CompilerParams(
            dimension_semantics=("parallel",),
            vmem_limit_bytes=_VMEM_LIMIT),
        cost_estimate=cost,
    )(px_p, wc_p, bc_p, w1_p, b1_p, w2_p, b2_p)
    return out[:N, :Nout]


# ---------------------------------------------------------------------------
# Model definition (deterministic synthetic init, PyTorch-style uniform bounds)
# ---------------------------------------------------------------------------
def init_params(key, ip_dim):
    C, H, W = ip_dim
    ks = jax.random.split(key, 8)

    def u(k, shape, fan_in):
        bound = 1.0 / jnp.sqrt(jnp.float32(fan_in))
        return jax.random.uniform(k, shape, jnp.float32, -bound, bound)

    # spatial sizes: conv(13, s=5) -> relu -> conv(13, s=5) -> relu -> maxpool(3)
    Ho1, Wo1 = (H - 13) // 5 + 1, (W - 13) // 5 + 1
    Ho2, Wo2 = (Ho1 - 13) // 5 + 1, (Wo1 - 13) // 5 + 1
    Hp, Wp = Ho2 // 3, Wo2 // 3
    mlp1_dim = 64 * Hp * Wp

    params = {
        "conv1_w": u(ks[0], (32, C, 13, 13), C * 13 * 13),
        "conv1_b": u(ks[1], (32,), C * 13 * 13),
        "conv2_w": u(ks[2], (64, 32, 13, 13), 32 * 13 * 13),
        "conv2_b": u(ks[3], (64,), 32 * 13 * 13),
        "mlp1_w": u(ks[4], (mlp1_dim, 128), mlp1_dim),  # (in, out); rows (c,hp,wp)
        "mlp1_b": u(ks[5], (128,), mlp1_dim),
        "mlp2_w": u(ks[6], (128, 2), 128),              # (in, out)
        "mlp2_b": u(ks[7], (2,), 128),
    }
    return params, mlp1_dim


def cnn_basic_forward(params, x):
    # conv1 + ReLU (NCHW input -> patch-GEMM -> NHWC bf16 activations)
    y = conv2d_relu(x, params["conv1_w"], params["conv1_b"], stride=5,
                    channels_last_in=False)
    # Everything after conv1 is ONE pallas_call:
    # conv2 + ReLU + max_pool2d(3) + dropout1(id) + flatten + mlp1 + ReLU
    # + dropout2(id) + mlp2
    return fused_conv2_pool_mlp(y, params["conv2_w"], params["conv2_b"],
                                params["mlp1_w"], params["mlp1_b"],
                                params["mlp2_w"], params["mlp2_b"],
                                stride=5, pool=3)


if __name__ == "__main__":
    # Small, shape-consistent input: (batch=2, C=3, H=W=123)
    #   conv1 -> 23x23, conv2 -> 3x3, maxpool(3) -> 1x1, flatten -> 64 -> 128 -> 2
    ip_dim = (3, 123, 123)
    key = jax.random.PRNGKey(0)
    k_params, k_x = jax.random.split(key)
    params, mlp1_dim = init_params(k_params, ip_dim)
    x = jax.random.normal(k_x, (2,) + ip_dim, dtype=jnp.float32)

    fwd = jax.jit(cnn_basic_forward)
    out = jax.block_until_ready(fwd(params, x))
    assert out.shape == (2, 2), out.shape
    print("KERNEL_OK")
</pallas_src>

<mosaic_0001>
module attributes {stable_mosaic.version = 11 : i64} {
  func.func @_gemm_bias_act_nk1_kernel(%arg0: i32, %arg1: memref<536x512xbf16, #tpu.memory_space<vmem>>, %arg2: memref<512x128xbf16, #tpu.memory_space<vmem>>, %arg3: memref<1x128xf32, #tpu.memory_space<vmem>>, %arg4: memref<536x128xbf16, #tpu.memory_space<vmem>>) attributes {dimension_semantics = [#tpu.dimension_semantics<parallel>], iteration_bounds = array<i64: 2>, scalar_prefetch = 0 : i64, scratch_operands = 0 : i64, tpu.core_type = #tpu.core_type<tc>, window_params = [{transform_indices = @transform_0, window_bounds = array<i64: 536, 512>}, {pipeline_mode = #tpu.pipeline_mode<synchronous>, transform_indices = @transform_1, window_bounds = array<i64: 512, 128>}, {pipeline_mode = #tpu.pipeline_mode<synchronous>, transform_indices = @transform_2, window_bounds = array<i64: 1, 128>}, {transform_indices = @transform_3, window_bounds = array<i64: 536, 128>}]} {
    %c0 = arith.constant 0 : index
    %c0_0 = arith.constant 0 : index
    %0 = vector.load %arg1[%c0, %c0_0] : memref<536x512xbf16, #tpu.memory_space<vmem>>, vector<536x512xbf16>
    %c0_1 = arith.constant 0 : index
    %c0_2 = arith.constant 0 : index
    %1 = vector.load %arg2[%c0_1, %c0_2] : memref<512x128xbf16, #tpu.memory_space<vmem>>, vector<512x128xbf16>
    %cst = arith.constant dense<0.000000e+00> : vector<536x128xf32>
    %2 = tpu.matmul %0, %1, %cst {dimension_numbers = #tpu.dot_dimension_numbers<[1], [0], [0], [1], [0, 0, 1, 1], [], []>} : vector<536x512xbf16>, vector<512x128xbf16>, vector<536x128xf32> -> vector<536x128xf32>
    %c0_3 = arith.constant 0 : index
    %c0_4 = arith.constant 0 : index
    %3 = vector.load %arg3[%c0_3, %c0_4] : memref<1x128xf32, #tpu.memory_space<vmem>>, vector<1x128xf32>
    %4 = vector.broadcast %3 : vector<1x128xf32> to vector<536x128xf32>
    %5 = arith.addf %2, %4 : vector<536x128xf32>
    %cst_5 = arith.constant 0.000000e+00 : f32
    %6 = vector.broadcast %cst_5 : f32 to vector<536x128xf32>
    %7 = arith.maximumf %5, %6 : vector<536x128xf32>
    %8 = arith.truncf %7 : vector<536x128xf32> to vector<536x128xbf16>
    %c0_6 = arith.constant 0 : index
    %c0_7 = arith.constant 0 : index
    %9 = vector.load %arg4[%c0_6, %c0_7] : memref<536x128xbf16, #tpu.memory_space<vmem>>, vector<536x128xbf16>
    tpu.vector_store %arg4[%c0_6, %c0_7], %8 {strides = array<i32>} : memref<536x128xbf16, #tpu.memory_space<vmem>>, vector<536x128xbf16>,
    return
  }
  func.func @transform_0(%arg0: i32) -> (i32, i32) {
    %c0_i32 = arith.constant 0 : i32
    %c0_i32_0 = arith.constant 0 : i32
    return %arg0, %c0_i32 : i32, i32
  }
  func.func @transform_1(%arg0: i32) -> (i32, i32) {
    %c0_i32 = arith.constant 0 : i32
    %c0_i32_0 = arith.constant 0 : i32
    %c0_i32_1 = arith.constant 0 : i32
    return %c0_i32, %c0_i32_0 : i32, i32
  }
  func.func @transform_2(%arg0: i32) -> (i32, i32) {
    %c0_i32 = arith.constant 0 : i32
    %c0_i32_0 = arith.constant 0 : i32
    %c0_i32_1 = arith.constant 0 : i32
    return %c0_i32, %c0_i32_0 : i32, i32
  }
  func.func @transform_3(%arg0: i32) -> (i32, i32) {
    %c0_i32 = arith.constant 0 : i32
    %c0_i32_0 = arith.constant 0 : i32
    return %arg0, %c0_i32 : i32, i32
  }
}

module attributes {stable_mosaic.version = 11 : i64} {
  func.func @_fused_tail_kernel(%arg0: i32, %arg1: memref<1x9x8x5504xbf16, #tpu.memory_space<vmem>>, %arg2: memref<5504x128xbf16, #tpu.memory_space<vmem>>, %arg3: memref<1x128xf32, #tpu.memory_space<vmem>>, %arg4: memref<1x128x128xbf16, #tpu.memory_space<vmem>>, %arg5: memref<1x128xf32, #tpu.memory_space<vmem>>, %arg6: memref<128x128xbf16, #tpu.memory_space<vmem>>, %arg7: memref<1x128xf32, #tpu.memory_space<vmem>>, %arg8: memref<8x128xf32, #tpu.memory_space<vmem>>) attributes {dimension_semantics = [#tpu.dimension_semantics<parallel>], iteration_bounds = array<i64: 1>, scalar_prefetch = 0 : i64, scratch_operands = 0 : i64, tpu.core_type = #tpu.core_type<tc>, window_params = [{transform_indices = @transform_0, window_bounds = array<i64: 1, 9, 8, 5504>}, {pipeline_mode = #tpu.pipeline_mode<synchronous>, transform_indices = @transform_1, window_bounds = array<i64: 5504, 128>}, {pipeline_mode = #tpu.pipeline_mode<synchronous>, transform_indices = @transform_2, window_bounds = array<i64: 1, 128>}, {pipeline_mode = #tpu.pipeline_mode<synchronous>, transform_indices = @transform_3, window_bounds = array<i64: 1, 128, 128>}, {pipeline_mode = #tpu.pipeline_mode<synchronous>, transform_indices = @transform_4, window_bounds = array<i64: 1, 128>}, {pipeline_mode = #tpu.pipeline_mode<synchronous>, transform_indices = @transform_5, window_bounds = array<i64: 128, 128>}, {pipeline_mode = #tpu.pipeline_mode<synchronous>, transform_indices = @transform_6, window_bounds = array<i64: 1, 128>}, {transform_indices = @transform_7, window_bounds = array<i64: 8, 128>}]} {
    %c0 = arith.constant 0 : index
    %c0_0 = arith.constant 0 : index
    %c0_1 = arith.constant 0 : index
    %c0_2 = arith.constant 0 : index
    %0 = vector.load %arg1[%c0, %c0_0, %c0_1, %c0_2] : memref<1x9x8x5504xbf16, #tpu.memory_space<vmem>>, vector<1x9x8x5504xbf16>
    %1 = vector.shape_cast %0 : vector<1x9x8x5504xbf16> to vector<9x8x5504xbf16>
    %2 = vector.shape_cast %1 : vector<9x8x5504xbf16> to vector<72x5504xbf16>
    %c0_3 = arith.constant 0 : index
    %c0_4 = arith.constant 0 : index
    %3 = vector.load %arg2[%c0_3, %c0_4] : memref<5504x128xbf16, #tpu.memory_space<vmem>>, vector<5504x128xbf16>
    %cst = arith.constant dense<0.000000e+00> : vector<72x128xf32>
    %4 = tpu.matmul %2, %3, %cst {dimension_numbers = #tpu.dot_dimension_numbers<[1], [0], [0], [1], [0, 0, 1, 1], [], []>} : vector<72x5504xbf16>, vector<5504x128xbf16>, vector<72x128xf32> -> vector<72x128xf32>
    %5 = vector.extract_strided_slice %4 {offsets = [0, 0], sizes = [8, 128], strides = [1, 1]} : vector<72x128xf32> to vector<8x128xf32>
    %6 = vector.extract_strided_slice %4 {offsets = [8, 0], sizes = [8, 128], strides = [1, 1]} : vector<72x128xf32> to vector<8x128xf32>
    %7 = arith.maximumf %5, %6 : vector<8x128xf32>
    %8 = vector.extract_strided_slice %4 {offsets = [16, 0], sizes = [8, 128], strides = [1, 1]} : vector<72x128xf32> to vector<8x128xf32>
    %9 = arith.maximumf %7, %8 : vector<8x128xf32>
    %10 = vector.extract_strided_slice %4 {offsets = [24, 0], sizes = [8, 128], strides = [1, 1]} : vector<72x128xf32> to vector<8x128xf32>
    %11 = arith.maximumf %9, %10 : vector<8x128xf32>
    %12 = vector.extract_strided_slice %4 {offsets = [32, 0], sizes = [8, 128], strides = [1, 1]} : vector<72x128xf32> to vector<8x128xf32>
    %13 = arith.maximumf %11, %12 : vector<8x128xf32>
    %14 = vector.extract_strided_slice %4 {offsets = [40, 0], sizes = [8, 128], strides = [1, 1]} : vector<72x128xf32> to vector<8x128xf32>
    %15 = arith.maximumf %13, %14 : vector<8x128xf32>
    %16 = vector.extract_strided_slice %4 {offsets = [48, 0], sizes = [8, 128], strides = [1, 1]} : vector<72x128xf32> to vector<8x128xf32>
    %17 = arith.maximumf %15, %16 : vector<8x128xf32>
    %18 = vector.extract_strided_slice %4 {offsets = [56, 0], sizes = [8, 128], strides = [1, 1]} : vector<72x128xf32> to vector<8x128xf32>
    %19 = arith.maximumf %17, %18 : vector<8x128xf32>
    %20 = vector.extract_strided_slice %4 {offsets = [64, 0], sizes = [8, 128], strides = [1, 1]} : vector<72x128xf32> to vector<8x128xf32>
    %21 = arith.maximumf %19, %20 : vector<8x128xf32>
    %c0_5 = arith.constant 0 : index
    %c0_6 = arith.constant 0 : index
    %22 = vector.load %arg3[%c0_5, %c0_6] : memref<1x128xf32, #tpu.memory_space<vmem>>, vector<1x128xf32>
    %23 = vector.broadcast %22 : vector<1x128xf32> to vector<8x128xf32>
    %24 = arith.addf %21, %23 : vector<8x128xf32>
    %cst_7 = arith.constant 0.000000e+00 : f32
    %25 = vector.broadcast %cst_7 : f32 to vector<8x128xf32>
    %26 = arith.maximumf %24, %25 : vector<8x128xf32>
    %27 = arith.truncf %26 : vector<8x128xf32> to vector<8x128xbf16>
    %c0_8 = arith.constant 0 : index
    %c0_9 = arith.constant 0 : index
    %c0_10 = arith.constant 0 : index
    %28 = vector.load %arg4[%c0_8, %c0_9, %c0_10] : memref<1x128x128xbf16, #tpu.memory_space<vmem>>, vector<1x128x128xbf16>
    %29 = vector.shape_cast %28 : vector<1x128x128xbf16> to vector<128x128xbf16>
    %cst_11 = arith.constant dense<0.000000e+00> : vector<8x128xf32>
    %30 = tpu.matmul %27, %29, %cst_11 {dimension_numbers = #tpu.dot_dimension_numbers<[1], [0], [0], [1], [0, 0, 1, 1], [], []>} : vector<8x128xbf16>, vector<128x128xbf16>, vector<8x128xf32> -> vector<8x128xf32>
    %c0_12 = arith.constant 0 : index
    %c0_13 = arith.constant 0 : index
    %31 = vector.load %arg5[%c0_12, %c0_13] : memref<1x128xf32, #tpu.memory_space<vmem>>, vector<1x128xf32>
    %32 = vector.broadcast %31 : vector<1x128xf32> to vector<8x128xf32>
    %33 = arith.addf %30, %32 : vector<8x128xf32>
    %cst_14 = arith.constant 0.000000e+00 : f32
    %34 = vector.broadcast %cst_14 : f32 to vector<8x128xf32>
    %35 = arith.maximumf %33, %34 : vector<8x128xf32>
    %36 = arith.truncf %35 : vector<8x128xf32> to vector<8x128xbf16>
    %c0_15 = arith.constant 0 : index
    %c0_16 = arith.constant 0 : index
    %37 = vector.load %arg6[%c0_15, %c0_16] : memref<128x128xbf16, #tpu.memory_space<vmem>>, vector<128x128xbf16>
    %cst_17 = arith.constant dense<0.000000e+00> : vector<8x128xf32>
    %38 = tpu.matmul %36, %37, %cst_17 {dimension_numbers = #tpu.dot_dimension_numbers<[1], [0], [0], [1], [0, 0, 1, 1], [], []>} : vector<8x128xbf16>, vector<128x128xbf16>, vector<8x128xf32> -> vector<8x128xf32>
    %c0_18 = arith.constant 0 : index
    %c0_19 = arith.constant 0 : index
    %39 = vector.load %arg7[%c0_18, %c0_19] : memref<1x128xf32, #tpu.memory_space<vmem>>, vector<1x128xf32>
    %40 = vector.broadcast %39 : vector<1x128xf32> to vector<8x128xf32>
    %41 = arith.addf %38, %40 : vector<8x128xf32>
    %c0_20 = arith.constant 0 : index
    %c0_21 = arith.constant 0 : index
    %42 = vector.load %arg8[%c0_20, %c0_21] : memref<8x128xf32, #tpu.memory_space<vmem>>, vector<8x128xf32>
    tpu.vector_store %arg8[%c0_20, %c0_21], %41 {strides = array<i32>} : memref<8x128xf32, #tpu.memory_space<vmem>>, vector<8x128xf32>,
    return
  }
  func.func @transform_0(%arg0: i32) -> (i32, i32, i32, i32) {
    %c0_i32 = arith.constant 0 : i32
    %c0_i32_0 = arith.constant 0 : i32
    %c0_i32_1 = arith.constant 0 : i32
    %c0_i32_2 = arith.constant 0 : i32
    return %c0_i32, %c0_i32_0, %arg0, %c0_i32_1 : i32, i32, i32, i32
  }
  func.func @transform_1(%arg0: i32) -> (i32, i32) {
    %c0_i32 = arith.constant 0 : i32
    %c0_i32_0 = arith.constant 0 : i32
    %c0_i32_1 = arith.constant 0 : i32
    return %c0_i32, %c0_i32_0 : i32, i32
  }
  func.func @transform_2(%arg0: i32) -> (i32, i32) {
    %c0_i32 = arith.constant 0 : i32
    %c0_i32_0 = arith.constant 0 : i32
    %c0_i32_1 = arith.constant 0 : i32
    return %c0_i32, %c0_i32_0 : i32, i32
  }
  func.func @transform_3(%arg0: i32) -> (i32, i32, i32) {
    %c0_i32 = arith.constant 0 : i32
    %c0_i32_0 = arith.constant 0 : i32
    %c0_i32_1 = arith.constant 0 : i32
    %c0_i32_2 = arith.constant 0 : i32
    return %c0_i32, %c0_i32_0, %c0_i32_1 : i32, i32, i32
  }
  func.func @transform_4(%arg0: i32) -> (i32, i32) {
    %c0_i32 = arith.constant 0 : i32
    %c0_i32_0 = arith.constant 0 : i32
    %c0_i32_1 = arith.constant 0 : i32
    return %c0_i32, %c0_i32_0 : i32, i32
  }
  func.func @transform_5(%arg0: i32) -> (i32, i32) {
    %c0_i32 = arith.constant 0 : i32
    %c0_i32_0 = arith.constant 0 : i32
    %c0_i32_1 = arith.constant 0 : i32
    return %c0_i32, %c0_i32_0 : i32, i32
  }
  func.func @transform_6(%arg0: i32) -> (i32, i32) {
    %c0_i32 = arith.constant 0 : i32
    %c0_i32_0 = arith.constant 0 : i32
    %c0_i32_1 = arith.constant 0 : i32
    return %c0_i32, %c0_i32_0 : i32, i32
  }
  func.func @transform_7(%arg0: i32) -> (i32, i32) {
    %c0_i32 = arith.constant 0 : i32
    %c0_i32_0 = arith.constant 0 : i32
    return %arg0, %c0_i32 : i32, i32
  }
}

</mosaic_0001>

<bundles_post_ra>
// kernel: cnn_basic_forward.2
= control target key start
LH: loop header
LB: loop body
LE: loop exit
PB: predicated region body
PF: predicated region fallthrough
CT: control target
= control target key end

     0   :  { %s3842_s12 = smov 0   ;;  %s3844_s13 = smov 0   ;;  %s4456_s0 = inlined_call_operand.vmem [shape: bf16[1058,512], index: 0, kind: input, shape index: {}]   ;;  %s4457_s1 = inlined_call_operand.vmem [shape: bf16[512,128], index: 1, kind: input, shape index: {}]   ;;  %s4458_s2 = inlined_call_operand.vmem [shape: f32[1,128], index: 2, kind: input, shape index: {}]   ;;  %s4459_s3 = inlined_call_operand.vmem [shape: bf16[1058,128], index: 3, kind: output, shape index: {}]  }
   0x1   :  { %s3846_s14 = smov 0  }
   0x2 LB: > { %s3855_s15 = sadd.s32 4294967295, %s3787_s14   ;;  %s3857_s16 = sadd.s32 1, %s3787_s14   ;;  %s3787_s14 = sphi %s3846_s14, %s4466_s14   ;;  %s3783_s13 = sphi %s3844_s13, %s4465_s13   ;;  %s3779_s12 = sphi %s3842_s12, %s4464_s12  }
   0x3   : > { %s85_s17 = ssub.s32 %s3787_s14, %s3857_s16  ;;  %s88_s18 = sadd.s32 1, %s3783_s13 }
   0x4   : > { %p86_p0 = scmp.eq.s32.totalorder %s85_s17, 0  ;;  %p98_p1 = scmp.ne.s32.totalorder %s3783_s13, %s3779_s12 }
   0x5   : > { %p99_p2 = scmp.eq.s32.totalorder %s3855_s15, 1  ;;  %p2752_p3 = scmp.ge.s32.totalorder %s3787_s14, 1 }
   0x6   : > { %s3865_s19 = scalar_select %p86_p0, %s3783_s13, %s88_s18  }
   0x7   : > { %p3867_p4 = por %p99_p2, %p98_p1  ;;  %p149_p5 = scmp.lt.s32.totalorder %s3787_s14, 3 }
   0x9   : > { %p150_p6 = pnand %p2752_p3, %p149_p5 }
   0xa   : > { %v3498_v0 = vld [vmem:[%s4457_s1] sm:$0xff] (!%p150_p6)   ;;  %v3821_v1 = vmov (!%p150_p6), 0   ;;  %v3500_v3 = vld [vmem:[%s4457_s1 + $0x8] sm:$0xff] (!%p150_p6)   ;;  %v3502_v5 = vld [vmem:[%s4457_s1 + $0x10] sm:$0xff] (!%p150_p6)   ;;  %s3911_s18 = smul.u32 (!%p150_p6), 67, %s3855_s15  ;;  %s175_s6 = sand.u32 (!%p150_p6), 1, %s3779_s12  }
   0xb   : > { %153 = sbr.rel (%p150_p6) target bundleno = 651 (0x28b), region = 32  ;;  %1272 = vmatprep.subr.bf16.mxu1 (!%p150_p6), %v3821_v1  ;;  %1576 = vmatprep.subr.bf16.mxu0 (!%p150_p6), %v3821_v1  ;;  %v3499_v2 = vld [vmem:[%s4457_s1 + $0x80] sm:$0xff] (!%p150_p6)   ;;  %v3501_v4 = vld [vmem:[%s4457_s1 + $0x88] sm:$0xff] (!%p150_p6)   ;;  %v3503_v6 = vld [vmem:[%s4457_s1 + $0x90] sm:$0xff] (!%p150_p6)  }
   0xc   : > { %1273 = vmatpush1.bf16.msra.mxu1 (!%p150_p6), %v3498_v0  ;;  %1577 = vmatpush1.bf16.msra.mxu0 (!%p150_p6), %v3499_v2  ;;  %v3504_v7 = vld [vmem:[%s4457_s1 + $0x18] sm:$0xff] (!%p150_p6)   ;;  %v3506_v9 = vld [vmem:[%s4457_s1 + $0x20] sm:$0xff] (!%p150_p6)   ;;  %v3508_v11 = vld [vmem:[%s4457_s1 + $0x28] sm:$0xff] (!%p150_p6)   ;;  %p184_p7 = scmp.lt.s32.totalorder (!%p150_p6), %s3911_s18, 132 }
   0xd   : > { %1274 = vmatprep.subr.bf16.mxu1 (!%p150_p6), %v3821_v1  ;;  %1578 = vmatprep.subr.bf16.mxu0 (!%p150_p6), %v3821_v1  ;;  %v3505_v8 = vld [vmem:[%s4457_s1 + $0x98] sm:$0xff] (!%p150_p6)   ;;  %v3507_v10 = vld [vmem:[%s4457_s1 + $0xa0] sm:$0xff] (!%p150_p6)   ;;  %v3509_v12 = vld [vmem:[%s4457_s1 + $0xa8] sm:$0xff] (!%p150_p6)  }
   0xe   : > { %v3510_v13 = vld [vmem:[%s4457_s1 + $0x30] sm:$0xff] (!%p150_p6)   ;;  %v3512_v15 = vld [vmem:[%s4457_s1 + $0x38] sm:$0xff] (!%p150_p6)   ;;  %v3514_v17 = vld [vmem:[%s4457_s1 + $0x40] sm:$0xff] (!%p150_p6)  }
   0xf   : > { %v3511_v14 = vld [vmem:[%s4457_s1 + $0xb0] sm:$0xff] (!%p150_p6)   ;;  %v3513_v16 = vld [vmem:[%s4457_s1 + $0xb8] sm:$0xff] (!%p150_p6)   ;;  %v3515_v18 = vld [vmem:[%s4457_s1 + $0xc0] sm:$0xff] (!%p150_p6)  }
  0x10   : > { %1275 = vmatpush1.bf16.msra.mxu1 (!%p150_p6), %v3500_v3  ;;  %1579 = vmatpush1.bf16.msra.mxu0 (!%p150_p6), %v3501_v4  ;;  %v3516_v20 = vld [vmem:[%s4457_s1 + $0x48] sm:$0xff] (!%p150_p6)   ;;  %v3518_v23 = vld [vmem:[%s4457_s1 + $0x50] sm:$0xff] (!%p150_p6)   ;;  %v3520_v25 = vld [vmem:[%s4457_s1 + $0x58] sm:$0xff] (!%p150_p6)  }
  0x11   : > { %1276 = vmatprep.subr.bf16.mxu1 (!%p150_p6), %v3821_v1  ;;  %1580 = vmatprep.subr.bf16.mxu0 (!%p150_p6), %v3821_v1  ;;  %v3517_v22 = vld [vmem:[%s4457_s1 + $0xc8] sm:$0xff] (!%p150_p6)   ;;  %v3519_v24 = vld [vmem:[%s4457_s1 + $0xd0] sm:$0xff] (!%p150_p6)   ;;  %v3521_v26 = vld [vmem:[%s4457_s1 + $0xd8] sm:$0xff] (!%p150_p6)  }
  0x12   : > { %s185_s29 = scalar_select %p184_p7, %s3911_s18, 132  ;;  %v3522_v27 = vld [vmem:[%s4457_s1 + $0x60] sm:$0xff]   ;;  %v3524_v29 = vld [vmem:[%s4457_s1 + $0x68] sm:$0xff]   ;;  %v3526_v31 = vld [vmem:[%s4457_s1 + $0x70] sm:$0xff]  }
  0x13   : > { %v3523_v28 = vld [vmem:[%s4457_s1 + $0xe0] sm:$0xff]   ;;  %v3525_v30 = vld [vmem:[%s4457_s1 + $0xe8] sm:$0xff]   ;;  %v3527_v32 = vld [vmem:[%s4457_s1 + $0xf0] sm:$0xff]   ;;  %s2291_s9 = ssub.s32 (%p3867_p4), 133, %s3911_s18  ;;  %s3074_s10 = smul.u32 (%p3867_p4), 268, %s3855_s15 }
  0x14   : > { %1277 = vmatpush1.bf16.msra.mxu1 %v3502_v5  ;;  %1581 = vmatpush1.bf16.msra.mxu0 %v3503_v6  ;;  %s3006_s7 = sshll.u32 %s185_s29, 4  ;;  %v3528_v33 = vld [vmem:[%s4457_s1 + $0x78] sm:$0xff]   ;;  %p2292_p8 = scmp.lt.s32.totalorder (%p3867_p4), %s2291_s9, 67 }
  0x15   : > { %1278 = vmatprep.subr.bf16.mxu1 %v3821_v1  ;;  %1582 = vmatprep.subr.bf16.mxu0 %v3821_v1  ;;  %s3946_s14 = scalar_lea.vmem %s4456_s0, %s3006_s7  ;;  %v3529_v34 = vld [vmem:[%s4457_s1 + $0xf8] sm:$0xff]   ;;  %s3408_s7 = smul.u32 268, %s175_s6 }
  0x16   : > { %v3532_v19 = vld [vmem:[%s3946_s14 + $0x4] ss:$16 sps:$4 sm:$0xff]   ;;  %v3535_v21 = vld [vmem:[%s3946_s14 + $0xc] ss:$16 sps:$4 sm:$0xff]   ;;  %v3530_v35 = vld [vmem:[%s3946_s14] ss:$16 sps:$4 sm:$0xff]   ;;  %s4264_s21 = scalar_lea.vmem (%p3867_p4), %s4459_s3, %s3074_s10  }
  0x17   : > { %1304 = vmatprep.mubr.bf16.mxu1 %v3532_v19  ;;  %1608 = vmatprep.mubr.bf16.mxu0 %v3535_v21  ;;  %v3533_v36 = vld [vmem:[%s3946_s14 + $0x8] ss:$16 sps:$4 sm:$0xff]   ;;  %v3536_v37 = vld [vmem:[%s3946_s14 + $0x24] ss:$16 sps:$4 sm:$0xff]   ;;  %v3538_v38 = vld [vmem:[%s3946_s14 + $0x2c] ss:$16 sps:$4 sm:$0xff]  }
  0x18   : > { %1279 = vmatpush1.bf16.msra.mxu1 %v3504_v7  ;;  %1583 = vmatpush1.bf16.msra.mxu0 %v3505_v8  ;;  %v3540_v39 = vld [vmem:[%s3946_s14 + $0x20] ss:$16 sps:$4 sm:$0xff]   ;;  %v3541_v40 = vld [vmem:[%s3946_s14 + $0x28] ss:$16 sps:$4 sm:$0xff]   ;;  %v3542_v41 = vld [vmem:[%s3946_s14 + $0x44] ss:$16 sps:$4 sm:$0xff]  }
  0x19   : > { %1280 = vmatprep.subr.bf16.mxu1 %v3821_v1  ;;  %1584 = vmatprep.subr.bf16.mxu0 %v3821_v1  ;;  %v3544_v42 = vld [vmem:[%s3946_s14 + $0x4c] ss:$16 sps:$4 sm:$0xff]   ;;  %v3546_v43 = vld [vmem:[%s3946_s14 + $0x40] ss:$16 sps:$4 sm:$0xff]   ;;  %v3547_v44 = vld [vmem:[%s3946_s14 + $0x48] ss:$16 sps:$4 sm:$0xff]  }
  0x1a   : > { %v3548_v45 = vld [vmem:[%s3946_s14 + $0x64] ss:$16 sps:$4 sm:$0xff]   ;;  %v3550_v46 = vld [vmem:[%s3946_s14 + $0x6c] ss:$16 sps:$4 sm:$0xff]   ;;  %v3552_v47 = vld [vmem:[%s3946_s14 + $0x60] ss:$16 sps:$4 sm:$0xff]  }
  0x1b   : > { %v3553_v48 = vld [vmem:[%s3946_s14 + $0x68] ss:$16 sps:$4 sm:$0xff]   ;;  %v3554_v49 = vld [vmem:[%s3946_s14 + $0x84] ss:$16 sps:$4 sm:$0xff]   ;;  %v3556_v50 = vld [vmem:[%s3946_s14 + $0x8c] ss:$16 sps:$4 sm:$0xff]  }
  0x1c   : > { %1281 = vmatpush1.bf16.msra.mxu1 %v3506_v9  ;;  %1585 = vmatpush1.bf16.msra.mxu0 %v3507_v10  ;;  %v3558_v51 = vld [vmem:[%s3946_s14 + $0x80] ss:$16 sps:$4 sm:$0xff]   ;;  %v3559_v52 = vld [vmem:[%s3946_s14 + $0x88] ss:$16 sps:$4 sm:$0xff]   ;;  %v3560_v53 = vld [vmem:[%s3946_s14 + $0xa4] ss:$16 sps:$4 sm:$0xff]  }
  0x1d   : > { %1282 = vmatprep.subr.bf16.mxu1 %v3821_v1  ;;  %1586 = vmatprep.subr.bf16.mxu0 %v3821_v1  ;;  %v3562_v54 = vld [vmem:[%s3946_s14 + $0xac] ss:$16 sps:$4 sm:$0xff]   ;;  %v3564_v55 = vld [vmem:[%s3946_s14 + $0xa0] ss:$16 sps:$4 sm:$0xff]   ;;  %v3565_v56 = vld [vmem:[%s3946_s14 + $0xa8] ss:$16 sps:$4 sm:$0xff]  }
  0x1e   : > { %v3566_v57 = vld [vmem:[%s3946_s14 + $0xc4] ss:$16 sps:$4 sm:$0xff]   ;;  %v3568_v58 = vld [vmem:[%s3946_s14 + $0xcc] ss:$16 sps:$4 sm:$0xff]   ;;  %v3570_v59 = vld [vmem:[%s3946_s14 + $0xc0] ss:$16 sps:$4 sm:$0xff]  }
  0x1f   : > { %v3571_v60 = vld [vmem:[%s3946_s14 + $0xc8] ss:$16 sps:$4 sm:$0xff]   ;;  %v3572_v61 = vld [vmem:[%s3946_s14 + $0xe4] ss:$16 sps:$4 sm:$0xff]   ;;  %v3574_v62 = vld [vmem:[%s3946_s14 + $0xec] ss:$16 sps:$4 sm:$0xff]  }
  0x20   : > { %1283 = vmatpush1.bf16.msra.mxu1 %v3508_v11  ;;  %1587 = vmatpush1.bf16.msra.mxu0 %v3509_v12  ;;  %v3576_v63 = vld [vmem:[%s3946_s14 + $0xe0] ss:$16 sps:$4 sm:$0xff]   ;;  %v3577_v0 = vld [vmem:[%s3946_s14 + $0xe8] ss:$16 sps:$4 sm:$0xff]   ;;  %v3580_v2 = vld [vmem:[%s3946_s14 + $0x10c] ss:$16 sps:$4 sm:$0xff]  }
  0x21   : > { %1284 = vmatprep.subr.bf16.mxu1 %v3821_v1  ;;  %1588 = vmatprep.subr.bf16.mxu0 %v3821_v1  ;;  %v3582_v3 = vld [vmem:[%s3946_s14 + $0x100] ss:$16 sps:$4 sm:$0xff]   ;;  %v3583_v4 = vld [vmem:[%s3946_s14 + $0x108] ss:$16 sps:$4 sm:$0xff]   ;;  %v3584_v5 = vld [vmem:[%s3946_s14 + $0x124] ss:$16 sps:$4 sm:$0xff]  }
  0x22   : > { %v3586_v6 = vld [vmem:[%s3946_s14 + $0x12c] ss:$16 sps:$4 sm:$0xff]   ;;  %v3588_v7 = vld [vmem:[%s3946_s14 + $0x120] ss:$16 sps:$4 sm:$0xff]   ;;  %v3589_v8 = vld [vmem:[%s3946_s14 + $0x128] ss:$16 sps:$4 sm:$0xff]  }
  0x23   : > { %v3590_v9 = vld [vmem:[%s3946_s14 + $0x144] ss:$16 sps:$4 sm:$0xff]   ;;  %v3592_v10 = vld [vmem:[%s3946_s14 + $0x14c] ss:$16 sps:$4 sm:$0xff]   ;;  %v3594_v11 = vld [vmem:[%s3946_s14 + $0x140] ss:$16 sps:$4 sm:$0xff]  }
  0x24   : > { %1285 = vmatpush1.bf16.msra.mxu1 %v3510_v13  ;;  %1589 = vmatpush1.bf16.msra.mxu0 %v3511_v14  ;;  %v3595_v12 = vld [vmem:[%s3946_s14 + $0x148] ss:$16 sps:$4 sm:$0xff]   ;;  %v3596_v13 = vld [vmem:[%s3946_s14 + $0x164] ss:$16 sps:$4 sm:$0xff]   ;;  %v3598_v14 = vld [vmem:[%s3946_s14 + $0x16c] ss:$16 sps:$4 sm:$0xff]  }
  0x25   : > { %1286 = vmatprep.subr.bf16.mxu1 %v3821_v1  ;;  %1590 = vmatprep.subr.bf16.mxu0 %v3821_v1  ;;  %v3606_v19 = vld [vmem:[%s3946_s14 + $0x180] ss:$16 sps:$4 sm:$0xff]   ;;  %v3608_v21 = vld [vmem:[%s3946_s14 + $0x1a4] ss:$16 sps:$4 sm:$0xff]   ;;  %s4135_s12 = scalar_lea.vmem [#allocation2], %s3408_s7  }
  0x28   : > { %1287 = vmatpush1.bf16.msra.mxu1 %v3512_v15  ;;  %1591 = vmatpush1.bf16.msra.mxu0 %v3513_v16  ;;  %v3600_v15 = vld [vmem:[%s3946_s14 + $0x160] ss:$16 sps:$4 sm:$0xff]   ;;  %v3601_v16 = vld [vmem:[%s3946_s14 + $0x168] ss:$16 sps:$4 sm:$0xff]  }
  0x29   : > { %1288 = vmatprep.subr.bf16.mxu1 %v3821_v1  ;;  %1592 = vmatprep.subr.bf16.mxu0 %v3821_v1 }
  0x2c   : > { %1289 = vmatpush1.bf16.msra.mxu1 %v3514_v17  ;;  %1593 = vmatpush1.bf16.msra.mxu0 %v3515_v18  ;;  %v3602_v17 = vld [vmem:[%s3946_s14 + $0x184] ss:$16 sps:$4 sm:$0xff]   ;;  %v3604_v18 = vld [vmem:[%s3946_s14 + $0x18c] ss:$16 sps:$4 sm:$0xff]  }
  0x2d   : > { %1290 = vmatprep.subr.bf16.mxu1 %v3821_v1  ;;  %1594 = vmatprep.subr.bf16.mxu0 %v3821_v1 }
  0x30   : > { %1291 = vmatpush1.bf16.msra.mxu1 %v3516_v20  ;;  %1595 = vmatpush1.bf16.msra.mxu0 %v3517_v22  ;;  %v3607_v20 = vld [vmem:[%s3946_s14 + $0x188] ss:$16 sps:$4 sm:$0xff]   ;;  %v3610_v22 = vld [vmem:[%s3946_s14 + $0x1ac] ss:$16 sps:$4 sm:$0xff]  }
  0x31   : > { %1292 = vmatprep.subr.bf16.mxu1 %v3821_v1  ;;  %1596 = vmatprep.subr.bf16.mxu0 %v3821_v1 }
  0x34   : > { %1293 = vmatpush1.bf16.msra.mxu1 %v3518_v23  ;;  %1597 = vmatpush1.bf16.msra.mxu0 %v3519_v24  ;;  %v3612_v23 = vld [vmem:[%s3946_s14 + $0x1a0] ss:$16 sps:$4 sm:$0xff]   ;;  %v3613_v24 = vld [vmem:[%s3946_s14 + $0x1a8] ss:$16 sps:$4 sm:$0xff]  }
  0x35   : > { %1294 = vmatprep.subr.bf16.mxu1 %v3821_v1  ;;  %1598 = vmatprep.subr.bf16.mxu0 %v3821_v1 }
  0x38   : > { %1295 = vmatpush1.bf16.msra.mxu1 %v3520_v25  ;;  %1599 = vmatpush1.bf16.msra.mxu0 %v3521_v26  ;;  %v3614_v25 = vld [vmem:[%s3946_s14 + $0x1c4] ss:$16 sps:$4 sm:$0xff]   ;;  %v3616_v26 = vld [vmem:[%s3946_s14 + $0x1cc] ss:$16 sps:$4 sm:$0xff]  }
  0x39   : > { %1296 = vmatprep.subr.bf16.mxu1 %v3821_v1  ;;  %1600 = vmatprep.subr.bf16.mxu0 %v3821_v1 }
  0x3c   : > { %1297 = vmatpush1.bf16.msra.mxu1 %v3522_v27  ;;  %1601 = vmatpush1.bf16.msra.mxu0 %v3523_v28  ;;  %v3618_v27 = vld [vmem:[%s3946_s14 + $0x1c0] ss:$16 sps:$4 sm:$0xff]   ;;  %v3619_v28 = vld [vmem:[%s3946_s14 + $0x1c8] ss:$16 sps:$4 sm:$0xff]  }
  0x3d   : > { %1298 = vmatprep.subr.bf16.mxu1 %v3821_v1  ;;  %1602 = vmatprep.subr.bf16.mxu0 %v3821_v1 }
  0x40   : > { %1299 = vmatpush1.bf16.msra.mxu1 %v3524_v29  ;;  %1603 = vmatpush1.bf16.msra.mxu0 %v3525_v30  ;;  %v3620_v29 = vld [vmem:[%s3946_s14 + $0x1e4] ss:$16 sps:$4 sm:$0xff]   ;;  %v3622_v30 = vld [vmem:[%s3946_s14 + $0x1ec] ss:$16 sps:$4 sm:$0xff]  }
  0x41   : > { %1300 = vmatprep.subr.bf16.mxu1 %v3821_v1  ;;  %1604 = vmatprep.subr.bf16.mxu0 %v3821_v1 }
  0x44   : > { %1301 = vmatpush1.bf16.msra.mxu1 %v3526_v31  ;;  %1605 = vmatpush1.bf16.msra.mxu0 %v3527_v32  ;;  %v3624_v31 = vld [vmem:[%s3946_s14 + $0x1e0] ss:$16 sps:$4 sm:$0xff]   ;;  %v3625_v32 = vld [vmem:[%s3946_s14 + $0x1e8] ss:$16 sps:$4 sm:$0xff]  }
  0x45   : > { %1302 = vmatprep.subr.bf16.mxu1 %v3821_v1  ;;  %1606 = vmatprep.subr.bf16.mxu0 %v3821_v1  ;;  %v3578_v1 = vld [vmem:[%s3946_s14 + $0x104] ss:$16 sps:$4 sm:$0xff]  }
  0x48   : > { %1303 = vmatpush1.bf16.msra.mxu1 %v3528_v33  ;;  %1607 = vmatpush1.bf16.msra.mxu0 %v3529_v34  ;;  %v3626_v33 = vld [vmem:[%s3946_s14 + $0x204] ss:$16 sps:$4 sm:$0xff]   ;;  %v3628_v34 = vld [vmem:[%s3946_s14 + $0x20c] ss:$16 sps:$4 sm:$0xff]  }
  0x4b   : > { %1305 = vmatmul.mubr.bf16.vlgmr.msra.gmra.mrb[0].mxu1 %v3530_v35  ;;  %1609 = vmatmul.mubr.bf16.vlgmr.msra.gmra.mrb[0].mxu0 %v3533_v36  ;;  %v3630_v35 = vld [vmem:[%s3946_s14 + $0x200] ss:$16 sps:$4 sm:$0xff]   ;;  %v3631_v36 = vld [vmem:[%s3946_s14 + $0x208] ss:$16 sps:$4 sm:$0xff]  }
  0x4c   : > { %1312 = vmatprep.mubr.bf16.mxu1 %v3536_v37  ;;  %1616 = vmatprep.mubr.bf16.mxu0 %v3538_v38  ;;  %v3632_v37 = vld [vmem:[%s3946_s14 + $0x224] ss:$16 sps:$4 sm:$0xff]   ;;  %v3634_v38 = vld [vmem:[%s3946_s14 + $0x22c] ss:$16 sps:$4 sm:$0xff]  }
  0x53   : > { %1313 = vmatmul.mubr.bf16.gmra.mrb[4].mxu1 %v3540_v39  ;;  %1617 = vmatmul.mubr.bf16.gmra.mrb[4].mxu0 %v3541_v40  ;;  %v3636_v39 = vld [vmem:[%s3946_s14 + $0x220] ss:$16 sps:$4 sm:$0xff]   ;;  %v3637_v40 = vld [vmem:[%s3946_s14 + $0x228] ss:$16 sps:$4 sm:$0xff]  }
  0x54   : > { %1320 = vmatprep.mubr.bf16.mxu1 %v3542_v41  ;;  %1624 = vmatprep.mubr.bf16.mxu0 %v3544_v42  ;;  %v3638_v41 = vld [vmem:[%s3946_s14 + $0x244] ss:$16 sps:$4 sm:$0xff]   ;;  %v3640_v42 = vld [vmem:[%s3946_s14 + $0x24c] ss:$16 sps:$4 sm:$0xff]  }
  0x5b   : > { %1321 = vmatmul.mubr.bf16.gmra.mrb[8].mxu1 %v3546_v43  ;;  %1625 = vmatmul.mubr.bf16.gmra.mrb[8].mxu0 %v3547_v44  ;;  %v3642_v43 = vld [vmem:[%s3946_s14 + $0x240] ss:$16 sps:$4 sm:$0xff]   ;;  %v3643_v44 = vld [vmem:[%s3946_s14 + $0x248] ss:$16 sps:$4 sm:$0xff]  }
  0x5c   : > { %1328 = vmatprep.mubr.bf16.mxu1 %v3548_v45  ;;  %1632 = vmatprep.mubr.bf16.mxu0 %v3550_v46  ;;  %v3644_v45 = vld [vmem:[%s3946_s14 + $0x264] ss:$16 sps:$4 sm:$0xff]   ;;  %v3646_v46 = vld [vmem:[%s3946_s14 + $0x26c] ss:$16 sps:$4 sm:$0xff]  }
  0x63   : > { %1329 = vmatmul.mubr.bf16.gmra.mrb[12].mxu1 %v3552_v47  ;;  %1633 = vmatmul.mubr.bf16.gmra.mrb[12].mxu0 %v3553_v48  ;;  %v3648_v47 = vld [vmem:[%s3946_s14 + $0x260] ss:$16 sps:$4 sm:$0xff]   ;;  %v3649_v48 = vld [vmem:[%s3946_s14 + $0x268] ss:$16 sps:$4 sm:$0xff]  }
  0x64   : > { %1336 = vmatprep.mubr.bf16.mxu1 %v3554_v49  ;;  %1640 = vmatprep.mubr.bf16.mxu0 %v3556_v50  ;;  %v3650_v49 = vld [vmem:[%s3946_s14 + $0x284] ss:$16 sps:$4 sm:$0xff]   ;;  %v3652_v50 = vld [vmem:[%s3946_s14 + $0x28c] ss:$16 sps:$4 sm:$0xff]  }
  0x6b   : > { %1337 = vmatmul.mubr.bf16.gmra.mrb[16].mxu1 %v3558_v51  ;;  %1641 = vmatmul.mubr.bf16.gmra.mrb[16].mxu0 %v3559_v52  ;;  %v3654_v51 = vld [vmem:[%s3946_s14 + $0x280] ss:$16 sps:$4 sm:$0xff]   ;;  %v3655_v52 = vld [vmem:[%s3946_s14 + $0x288] ss:$16 sps:$4 sm:$0xff]  }
  0x6c   : > { %1344 = vmatprep.mubr.bf16.mxu1 %v3560_v53  ;;  %1648 = vmatprep.mubr.bf16.mxu0 %v3562_v54  ;;  %v3656_v53 = vld [vmem:[%s3946_s14 + $0x2a4] ss:$16 sps:$4 sm:$0xff]   ;;  %v3658_v54 = vld [vmem:[%s3946_s14 + $0x2ac] ss:$16 sps:$4 sm:$0xff]  }
  0x73   : > { %1345 = vmatmul.mubr.bf16.gmra.mrb[20].mxu1 %v3564_v55  ;;  %1649 = vmatmul.mubr.bf16.gmra.mrb[20].mxu0 %v3565_v56  ;;  %v3660_v55 = vld [vmem:[%s3946_s14 + $0x2a0] ss:$16 sps:$4 sm:$0xff]   ;;  %v3661_v56 = vld [vmem:[%s3946_s14 + $0x2a8] ss:$16 sps:$4 sm:$0xff]  }
  0x74   : > { %1352 = vmatprep.mubr.bf16.mxu1 %v3566_v57  ;;  %1656 = vmatprep.mubr.bf16.mxu0 %v3568_v58  ;;  %v3662_v57 = vld [vmem:[%s3946_s14 + $0x2c4] ss:$16 sps:$4 sm:$0xff]   ;;  %v3664_v58 = vld [vmem:[%s3946_s14 + $0x2cc] ss:$16 sps:$4 sm:$0xff]  }
  0x7b   : > { %1353 = vmatmul.mubr.bf16.gmra.mrb[24].mxu1 %v3570_v59  ;;  %1657 = vmatmul.mubr.bf16.gmra.mrb[24].mxu0 %v3571_v60  ;;  %v3666_v59 = vld [vmem:[%s3946_s14 + $0x2c0] ss:$16 sps:$4 sm:$0xff]   ;;  %v3667_v60 = vld [vmem:[%s3946_s14 + $0x2c8] ss:$16 sps:$4 sm:$0xff]  }
  0x7c   : > { %1360 = vmatprep.mubr.bf16.mxu1 %v3572_v61  ;;  %1664 = vmatprep.mubr.bf16.mxu0 %v3574_v62  ;;  %v3668_v61 = vld [vmem:[%s3946_s14 + $0x2e4] ss:$16 sps:$4 sm:$0xff]   ;;  %v3670_v62 = vld [vmem:[%s3946_s14 + $0x2ec] ss:$16 sps:$4 sm:$0xff]  }
  0x83   : > { %1361 = vmatmul.mubr.bf16.gmra.mrb[28].mxu1 %v3576_v63  ;;  %1665 = vmatmul.mubr.bf16.gmra.mrb[28].mxu0 %v3577_v0  ;;  %v3672_v63 = vld [vmem:[%s3946_s14 + $0x2e0] ss:$16 sps:$4 sm:$0xff]   ;;  %v3673_v0 = vld [vmem:[%s3946_s14 + $0x2e8] ss:$16 sps:$4 sm:$0xff]  }
  0x84   : > { %1368 = vmatprep.mubr.bf16.mxu1 %v3578_v1  ;;  %1672 = vmatprep.mubr.bf16.mxu0 %v3580_v2  ;;  %v3674_v1 = vld [vmem:[%s3946_s14 + $0x304] ss:$16 sps:$4 sm:$0xff]   ;;  %v3676_v2 = vld [vmem:[%s3946_s14 + $0x30c] ss:$16 sps:$4 sm:$0xff]  }
  0x8b   : > { %1369 = vmatmul.mubr.bf16.gmra.mrb[32].mxu1 %v3582_v3  ;;  %1673 = vmatmul.mubr.bf16.gmra.mrb[32].mxu0 %v3583_v4  ;;  %v3678_v3 = vld [vmem:[%s3946_s14 + $0x300] ss:$16 sps:$4 sm:$0xff]   ;;  %v3679_v4 = vld [vmem:[%s3946_s14 + $0x308] ss:$16 sps:$4 sm:$0xff]  }
  0x8c   : > { %1376 = vmatprep.mubr.bf16.mxu1 %v3584_v5  ;;  %1680 = vmatprep.mubr.bf16.mxu0 %v3586_v6  ;;  %v3680_v5 = vld [vmem:[%s3946_s14 + $0x324] ss:$16 sps:$4 sm:$0xff]   ;;  %v3682_v6 = vld [vmem:[%s3946_s14 + $0x32c] ss:$16 sps:$4 sm:$0xff]  }
  0x93   : > { %1377 = vmatmul.mubr.bf16.gmra.mrb[36].mxu1 %v3588_v7  ;;  %1681 = vmatmul.mubr.bf16.gmra.mrb[36].mxu0 %v3589_v8  ;;  %v3684_v7 = vld [vmem:[%s3946_s14 + $0x320] ss:$16 sps:$4 sm:$0xff]   ;;  %v3685_v8 = vld [vmem:[%s3946_s14 + $0x328] ss:$16 sps:$4 sm:$0xff]  }
  0x94   : > { %1384 = vmatprep.mubr.bf16.mxu1 %v3590_v9  ;;  %1688 = vmatprep.mubr.bf16.mxu0 %v3592_v10  ;;  %v3686_v9 = vld [vmem:[%s3946_s14 + $0x344] ss:$16 sps:$4 sm:$0xff]   ;;  %v3688_v10 = vld [vmem:[%s3946_s14 + $0x34c] ss:$16 sps:$4 sm:$0xff]  }
  0x9b   : > { %1385 = vmatmul.mubr.bf16.gmra.mrb[40].mxu1 %v3594_v11  ;;  %1689 = vmatmul.mubr.bf16.gmra.mrb[40].mxu0 %v3595_v12  ;;  %v3690_v11 = vld [vmem:[%s3946_s14 + $0x340] ss:$16 sps:$4 sm:$0xff]   ;;  %v3691_v12 = vld [vmem:[%s3946_s14 + $0x348] ss:$16 sps:$4 sm:$0xff]  }
  0x9c   : > { %1392 = vmatprep.mubr.bf16.mxu1 %v3596_v13  ;;  %1696 = vmatprep.mubr.bf16.mxu0 %v3598_v14  ;;  %v3692_v13 = vld [vmem:[%s3946_s14 + $0x364] ss:$16 sps:$4 sm:$0xff]   ;;  %v3694_v14 = vld [vmem:[%s3946_s14 + $0x36c] ss:$16 sps:$4 sm:$0xff]  }
  0xa3   : > { %1393 = vmatmul.mubr.bf16.gmra.mrb[44].mxu1 %v3600_v15  ;;  %1697 = vmatmul.mubr.bf16.gmra.mrb[44].mxu0 %v3601_v16  ;;  %v4122_v15 = vld [vmem:[%s4458_s2] ss:$0 sm:$0xff] }
  0xa4   : > { %1400 = vmatprep.mubr.bf16.mxu1 %v3602_v17  ;;  %1704 = vmatprep.mubr.bf16.mxu0 %v3604_v18 }
  0xab   : > { %1401 = vmatmul.mubr.bf16.gmra.mrb[48].mxu1 %v3606_v19  ;;  %1705 = vmatmul.mubr.bf16.gmra.mrb[48].mxu0 %v3607_v20  ;;  %v3696_v20 = vld [vmem:[%s3946_s14 + $0x360] ss:$16 sps:$4 sm:$0xff]  }
  0xac   : > { %1408 = vmatprep.mubr.bf16.mxu1 %v3608_v21  ;;  %1712 = vmatprep.mubr.bf16.mxu0 %v3610_v22 }
  0xb3   : > { %1409 = vmatmul.mubr.bf16.gmra.mrb[52].mxu1 %v3612_v23  ;;  %1713 = vmatmul.mubr.bf16.gmra.mrb[52].mxu0 %v3613_v24  ;;  %v3697_v23 = vld [vmem:[%s3946_s14 + $0x368] ss:$16 sps:$4 sm:$0xff]   ;;  %v3698_v24 = vld [vmem:[%s3946_s14 + $0x384] ss:$16 sps:$4 sm:$0xff]  }
  0xb4   : > { %1416 = vmatprep.mubr.bf16.mxu1 %v3614_v25  ;;  %1720 = vmatprep.mubr.bf16.mxu0 %v3616_v26 }
  0xbb   : > { %1417 = vmatmul.mubr.bf16.gmra.mrb[56].mxu1 %v3618_v27  ;;  %1721 = vmatmul.mubr.bf16.gmra.mrb[56].mxu0 %v3619_v28 }
  0xbc   : > { %1424 = vmatprep.mubr.bf16.mxu1 %v3620_v29  ;;  %1728 = vmatprep.mubr.bf16.mxu0 %v3622_v30  ;;  %v3700_v29 = vld [vmem:[%s3946_s14 + $0x38c] ss:$16 sps:$4 sm:$0xff]  }
  0xc3   : > { %1425 = vmatmul.mubr.bf16.gmra.mrb[60].mxu1 %v3624_v31  ;;  %1729 = vmatmul.mubr.bf16.gmra.mrb[60].mxu0 %v3625_v32 }
  0xc4   : > { %1432 = vmatprep.mubr.bf16.mxu1 %v3626_v33  ;;  %1736 = vmatprep.mubr.bf16.mxu0 %v3628_v34 }
  0xcb   : > { %1433 = vmatmul.mubr.bf16.gmra.mrb[64].mxu1 %v3630_v35  ;;  %1737 = vmatmul.mubr.bf16.gmra.mrb[64].mxu0 %v3631_v36 }
  0xcc   : > { %1440 = vmatprep.mubr.bf16.mxu1 %v3632_v37  ;;  %1744 = vmatprep.mubr.bf16.mxu0 %v3634_v38 }
  0xd3   : > { %1441 = vmatmul.mubr.bf16.gmra.mrb[68].mxu1 %v3636_v39  ;;  %1745 = vmatmul.mubr.bf16.gmra.mrb[68].mxu0 %v3637_v40  ;;  %v3702_v39 = vld [vmem:[%s3946_s14 + $0x380] ss:$16 sps:$4 sm:$0xff]  }
  0xd4   : > { %1448 = vmatprep.mubr.bf16.mxu1 %v3638_v41  ;;  %1752 = vmatprep.mubr.bf16.mxu0 %v3640_v42  ;;  %v3703_v42 = vld [vmem:[%s3946_s14 + $0x388] ss:$16 sps:$4 sm:$0xff]  }
  0xdb   : > { %1449 = vmatmul.mubr.bf16.gmra.mrb[72].mxu1 %v3642_v43  ;;  %1753 = vmatmul.mubr.bf16.gmra.mrb[72].mxu0 %v3643_v44  ;;  %v3704_v43 = vld [vmem:[%s3946_s14 + $0x3a4] ss:$16 sps:$4 sm:$0xff]  }
  0xdc   : > { %1456 = vmatprep.mubr.bf16.mxu1 %v3644_v45  ;;  %1760 = vmatprep.mubr.bf16.mxu0 %v3646_v46 }
  0xe3   : > { %1457 = vmatmul.mubr.bf16.gmra.mrb[76].mxu1 %v3648_v47  ;;  %1761 = vmatmul.mubr.bf16.gmra.mrb[76].mxu0 %v3649_v48  ;;  %v3706_v48 = vld [vmem:[%s3946_s14 + $0x3ac] ss:$16 sps:$4 sm:$0xff]  }
  0xe4   : > { %1464 = vmatprep.mubr.bf16.mxu1 %v3650_v49  ;;  %1768 = vmatprep.mubr.bf16.mxu0 %v3652_v50 }
  0xeb   : > { %1465 = vmatmul.mubr.bf16.gmra.mrb[80].mxu1 %v3654_v51  ;;  %1769 = vmatmul.mubr.bf16.gmra.mrb[80].mxu0 %v3655_v52 }
  0xec   : > { %1472 = vmatprep.mubr.bf16.mxu1 %v3656_v53  ;;  %1776 = vmatprep.mubr.bf16.mxu0 %v3658_v54 }
  0xf3   : > { %1473 = vmatmul.mubr.bf16.gmra.mrb[84].mxu1 %v3660_v55  ;;  %1777 = vmatmul.mubr.bf16.gmra.mrb[84].mxu0 %v3661_v56 }
  0xf4   : > { %1480 = vmatprep.mubr.bf16.mxu1 %v3662_v57  ;;  %1784 = vmatprep.mubr.bf16.mxu0 %v3664_v58  ;;  %v3708_v58 = vld [vmem:[%s3946_s14 + $0x3a0] ss:$16 sps:$4 sm:$0xff]  }
  0xfb   : > { %1481 = vmatmul.mubr.bf16.gmra.mrb[88].mxu1 %v3666_v59  ;;  %1785 = vmatmul.mubr.bf16.gmra.mrb[88].mxu0 %v3667_v60 }
  0xfc   : > { %1488 = vmatprep.mubr.bf16.mxu1 %v3668_v61  ;;  %1792 = vmatprep.mubr.bf16.mxu0 %v3670_v62  ;;  %v3709_v61 = vld [vmem:[%s3946_s14 + $0x3a8] ss:$16 sps:$4 sm:$0xff]   ;;  %v3710_v62 = vld [vmem:[%s3946_s14 + $0x3c4] ss:$16 sps:$4 sm:$0xff]  }
 0x103   : > { %1489 = vmatmul.mubr.bf16.gmra.mrb[92].mxu1 %v3672_v63  ;;  %1793 = vmatmul.mubr.bf16.gmra.mrb[92].mxu0 %v3673_v0 }
 0x104   : > { %1496 = vmatprep.mubr.bf16.mxu1 %v3674_v1  ;;  %1800 = vmatprep.mubr.bf16.mxu0 %v3676_v2 }
 0x10b   : > { %1497 = vmatmul.mubr.bf16.gmra.mrb[96].mxu1 %v3678_v3  ;;  %1801 = vmatmul.mubr.bf16.gmra.mrb[96].mxu0 %v3679_v4  ;;  %v3712_v3 = vld [vmem:[%s3946_s14 + $0x3cc] ss:$16 sps:$4 sm:$0xff]  }
 0x10c   : > { %1504 = vmatprep.mubr.bf16.mxu1 %v3680_v5  ;;  %1808 = vmatprep.mubr.bf16.mxu0 %v3682_v6 }
 0x113   : > { %1505 = vmatmul.mubr.bf16.gmra.mrb[100].mxu1 %v3684_v7  ;;  %1809 = vmatmul.mubr.bf16.gmra.mrb[100].mxu0 %v3685_v8 }
 0x114   : > { %1512 = vmatprep.mubr.bf16.mxu1 %v3686_v9  ;;  %1816 = vmatprep.mubr.bf16.mxu0 %v3688_v10 }
 0x11b   : > { %1513 = vmatmul.mubr.bf16.gmra.mrb[104].mxu1 %v3690_v11  ;;  %1817 = vmatmul.mubr.bf16.gmra.mrb[104].mxu0 %v3691_v12 }
 0x11c   : > { %1520 = vmatprep.mubr.bf16.mxu1 %v3692_v13  ;;  %1824 = vmatprep.mubr.bf16.mxu0 %v3694_v14  ;;  %v3714_v13 = vld [vmem:[%s3946_s14 + $0x3c0] ss:$16 sps:$4 sm:$0xff]  }
 0x11e   : > { %v1306_v16 = vpop.f32.mrb[0].mxu1  ;;  %v1610_v18 = vpop.f32.mrb[0].mxu0 }
 0x11f   : > { %v1307_v17 = vadd.f32 %v4122_v15, %v1306_v16  ;;  %v1308_v19 = vpop.f32.mrb[1].mxu1  ;;  %v1612_v21 = vpop.f32.mrb[1].mxu0 }
 0x120   : > { %v1309_v22 = vpop.f32.mrb[2].mxu1  ;;  %v1613_v27 = vpop.f32.mrb[2].mxu0 }
 0x121   : > { %v1611_v25 = vadd.f32 %v1610_v18, %v1307_v17  ;;  %v1310_v26 = vadd.f32 %v4122_v15, %v1309_v22  ;;  %v1311_v28 = vpop.f32.mrb[3].mxu1  ;;  %v1615_v30 = vpop.f32.mrb[3].mxu0  ;;  %v3715_v17 = vld [vmem:[%s3946_s14 + $0x3c8] ss:$16 sps:$4 sm:$0xff]   ;;  %v3716_v18 = vld [vmem:[%s3946_s14 + $0x3e4] ss:$16 sps:$4 sm:$0xff]  }
 0x123   : > { %v1614_v31 = vadd.f32 %v1613_v27, %v1310_v26  ;;  %1521 = vmatmul.mubr.bf16.gmra.mrb[108].mxu1 %v3696_v20  ;;  %1825 = vmatmul.mubr.bf16.gmra.mrb[108].mxu0 %v3697_v23  ;;  %v1880_v32 = vmax.f32 %v1611_v25, 0.0  ;;  %v3718_v23 = vld [vmem:[%s3946_s14 + $0x3ec] ss:$16 sps:$4 sm:$0xff]  }
 0x124   : > { %1528 = vmatprep.mubr.bf16.mxu1 %v3698_v24  ;;  %1832 = vmatprep.mubr.bf16.mxu0 %v3700_v29 }
 0x125   : > { %v1881_v33 = vmax.f32 %v1614_v31, 0.0 }
 0x126   : > { %v1314_v34 = vpop.f32.mrb[4].mxu1  ;;  %v1618_v37 = vpop.f32.mrb[4].mxu0 }
 0x127   : > { %v3080_v35 = vpack.c.bf16 %v1881_v33, %v1880_v32  ;;  %v1315_v36 = vadd.f32 %v4122_v15, %v1314_v34  ;;  %v1316_v38 = vpop.f32.mrb[5].mxu1  ;;  %v1620_v40 = vpop.f32.mrb[5].mxu0  ;;  %v3720_v33 = vld [vmem:[%s3946_s14 + $0x3e0] ss:$16 sps:$4 sm:$0xff]  }
 0x128   : > { %v1317_v41 = vpop.f32.mrb[6].mxu1  ;;  %v1621_v46 = vpop.f32.mrb[6].mxu0 }
 0x129   : > { %3081 = vst [vmem:[%s4135_s12] sm:$0xff] %v3080_v35   ;;  %v1619_v44 = vadd.f32 %v1618_v37, %v1315_v36  ;;  %v1318_v45 = vadd.f32 %v4122_v15, %v1317_v41  ;;  %v1319_v47 = vpop.f32.mrb[7].mxu1  ;;  %v1623_v49 = vpop.f32.mrb[7].mxu0  ;;  %v3721_v36 = vld [vmem:[%s3946_s14 + $0x3e8] ss:$16 sps:$4 sm:$0xff]   ;;  %v3722_v37 = vld [vmem:[%s3946_s14 + $0x404] ss:$16 sps:$4 sm:$0xff]  }
 0x12a   : > { %v333_v47 = vld [vmem:[%s3946_s14 + $0x420] sm:$0xff]  ;;  %v334_v49 = vld [vmem:[%s3946_s14 + $0x428] sm:$0xff] }
 0x12b   : > { %v1622_v50 = vadd.f32 %v1621_v46, %v1318_v45  ;;  %1529 = vmatmul.mubr.bf16.gmra.mrb[112].mxu1 %v3702_v39  ;;  %1833 = vmatmul.mubr.bf16.gmra.mrb[112].mxu0 %v3703_v42  ;;  %v1882_v51 = vmax.f32 %v1619_v44, 0.0  ;;  %v3724_v42 = vld [vmem:[%s3946_s14 + $0x40c] ss:$16 sps:$4 sm:$0xff]  }
 0x12c   : > { %1536 = vmatprep.mubr.bf16.mxu1 %v3704_v43  ;;  %1840 = vmatprep.mubr.bf16.mxu0 %v3706_v48 }
 0x12d   : > { %v1883_v52 = vmax.f32 %v1622_v50, 0.0 }
 0x12e   : > { %v1322_v53 = vpop.f32.mrb[8].mxu1  ;;  %v1626_v56 = vpop.f32.mrb[8].mxu0 }
 0x12f   : > { %v3085_v54 = vpack.c.bf16 %v1883_v52, %v1882_v51  ;;  %v1323_v55 = vadd.f32 %v4122_v15, %v1322_v53  ;;  %v1324_v57 = vpop.f32.mrb[9].mxu1  ;;  %v1628_v59 = vpop.f32.mrb[9].mxu0 }
 0x130   : > { %v1325_v60 = vpop.f32.mrb[10].mxu1  ;;  %v1629_v1 = vpop.f32.mrb[10].mxu0  ;;  %v3727_v57 = vld [vmem:[%s3946_s14 + $0x408] ss:$16 sps:$4 sm:$0xff]  }
 0x131   : > { %3242 = vst [vmem:[%s4135_s12 + $0x8] sm:$0xff] %v3085_v54   ;;  %v1627_v63 = vadd.f32 %v1626_v56, %v1323_v55  ;;  %v1326_v0 = vadd.f32 %v4122_v15, %v1325_v60  ;;  %v1327_v2 = vpop.f32.mrb[11].mxu1  ;;  %v1631_v4 = vpop.f32.mrb[11].mxu0  ;;  %v3726_v54 = vld [vmem:[%s3946_s14 + $0x400] ss:$16 sps:$4 sm:$0xff]  }
 0x133   : > { %v1630_v5 = vadd.f32 %v1629_v1, %v1326_v0  ;;  %1537 = vmatmul.mubr.bf16.gmra.mrb[116].mxu1 %v3708_v58  ;;  %1841 = vmatmul.mubr.bf16.gmra.mrb[116].mxu0 %v3709_v61  ;;  %v1884_v6 = vmax.f32 %v1627_v63, 0.0  ;;  %v2889_v58 = vcombine.high %v333_v47, %v333_v47  ;;  %v2891_v63 = vcombine.high %v334_v49, %v334_v49 }
 0x134   : > { %1544 = vmatprep.mubr.bf16.mxu1 %v3710_v62  ;;  %1848 = vmatprep.mubr.bf16.mxu0 %v3712_v3 }
 0x135   : > { %v1885_v7 = vmax.f32 %v1630_v5, 0.0 }
 0x136   : > { %v1330_v8 = vpop.f32.mrb[12].mxu1  ;;  %v1634_v11 = vpop.f32.mrb[12].mxu0 }
 0x137   : > { %v3090_v9 = vpack.c.bf16 %v1885_v7, %v1884_v6  ;;  %v1331_v10 = vadd.f32 %v4122_v15, %v1330_v8  ;;  %v1332_v12 = vpop.f32.mrb[13].mxu1  ;;  %v1636_v14 = vpop.f32.mrb[13].mxu0 }
 0x138   : > { %v1333_v16 = vpop.f32.mrb[14].mxu1  ;;  %v1637_v21 = vpop.f32.mrb[14].mxu0  ;;  %v2890_v12 = vcombine.low %v334_v49, %v334_v49 }
 0x139   : > { %3243 = vst [vmem:[%s4135_s12 + $0x10] sm:$0xff] %v3090_v9   ;;  %v1635_v19 = vadd.f32 %v1634_v11, %v1331_v10  ;;  %v1334_v20 = vadd.f32 %v4122_v15, %v1333_v16  ;;  %v1335_v22 = vpop.f32.mrb[15].mxu1  ;;  %v1639_v24 = vpop.f32.mrb[15].mxu0  ;;  %v2888_v9 = vcombine.low %v333_v47, %v333_v47 }
 0x13b   : > { %v1638_v25 = vadd.f32 %v1637_v21, %v1334_v20  ;;  %1545 = vmatmul.mubr.bf16.gmra.mrb[120].mxu1 %v3714_v13  ;;  %1849 = vmatmul.mubr.bf16.gmra.mrb[120].mxu0 %v3715_v17  ;;  %v1886_v26 = vmax.f32 %v1635_v19, 0.0 }
 0x13c   : > { %1552 = vmatprep.mubr.bf16.mxu1 %v3716_v18  ;;  %1856 = vmatprep.mubr.bf16.mxu0 %v3718_v23 }
 0x13d   : > { %v1887_v27 = vmax.f32 %v1638_v25, 0.0 }
 0x13e   : > { %v1338_v28 = vpop.f32.mrb[16].mxu1  ;;  %v1642_v31 = vpop.f32.mrb[16].mxu0 }
 0x13f   : > { %v3095_v29 = vpack.c.bf16 %v1887_v27, %v1886_v26  ;;  %v1339_v30 = vadd.f32 %v4122_v15, %v1338_v28  ;;  %v1340_v32 = vpop.f32.mrb[17].mxu1  ;;  %v1644_v34 = vpop.f32.mrb[17].mxu0 }
 0x140   : > { %v1341_v35 = vpop.f32.mrb[18].mxu1  ;;  %v1645_v40 = vpop.f32.mrb[18].mxu0 }
 0x141   : > { %3244 = vst [vmem:[%s4135_s12 + $0x18] sm:$0xff] %v3095_v29   ;;  %v1643_v38 = vadd.f32 %v1642_v31, %v1339_v30  ;;  %v1342_v39 = vadd.f32 %v4122_v15, %v1341_v35  ;;  %v1343_v41 = vpop.f32.mrb[19].mxu1  ;;  %v1647_v43 = vpop.f32.mrb[19].mxu0 }
 0x143   : > { %v1646_v44 = vadd.f32 %v1645_v40, %v1342_v39  ;;  %1553 = vmatmul.mubr.bf16.gmra.mrb[124].mxu1 %v3720_v33  ;;  %1857 = vmatmul.mubr.bf16.gmra.mrb[124].mxu0 %v3721_v36  ;;  %v1888_v45 = vmax.f32 %v1643_v38, 0.0 }
 0x144   : > { %1560 = vmatprep.mubr.bf16.mxu1 %v3722_v37  ;;  %1864 = vmatprep.mubr.bf16.mxu0 %v3724_v42 }
 0x145   : > { %v1889_v46 = vmax.f32 %v1646_v44, 0.0 }
 0x146   : > { %v1346_v48 = vpop.f32.mrb[20].mxu1  ;;  %v1650_v52 = vpop.f32.mrb[20].mxu0 }
 0x147   : > { %v3100_v50 = vpack.c.bf16 %v1889_v46, %v1888_v45  ;;  %v1347_v51 = vadd.f32 %v4122_v15, %v1346_v48  ;;  %v1348_v53 = vpop.f32.mrb[21].mxu1  ;;  %v1652_v55 = vpop.f32.mrb[21].mxu0 }
 0x148   : > { %v1349_v56 = vpop.f32.mrb[22].mxu1  ;;  %v1653_v61 = vpop.f32.mrb[22].mxu0 }
 0x149   : > { %3245 = vst [vmem:[%s4135_s12 + $0x20] sm:$0xff] %v3100_v50   ;;  %v1651_v59 = vadd.f32 %v1650_v52, %v1347_v51  ;;  %v1350_v60 = vadd.f32 %v4122_v15, %v1349_v56  ;;  %v1351_v62 = vpop.f32.mrb[23].mxu1  ;;  %v1655_v0 = vpop.f32.mrb[23].mxu0 }
 0x14b   : > { %v1654_v1 = vadd.f32 %v1653_v61, %v1350_v60  ;;  %1561 = vmatmul.mubr.bf16.gmra.mrb[128].mxu1 %v3726_v54  ;;  %1865 = vmatmul.mubr.bf16.gmra.mrb[128].mxu0 %v3727_v57  ;;  %v1890_v2 = vmax.f32 %v1651_v59, 0.0 }
 0x14c   : > { %1568 = vmatprep.mubr.bf16.mxu1 %v2889_v58  ;;  %1872 = vmatprep.mubr.bf16.mxu0 %v2891_v63 }
 0x14d   : > { %v1891_v3 = vmax.f32 %v1654_v1, 0.0 }
 0x14e   : > { %v1354_v4 = vpop.f32.mrb[24].mxu1  ;;  %v1658_v7 = vpop.f32.mrb[24].mxu0 }
 0x14f   : > { %v3105_v5 = vpack.c.bf16 %v1891_v3, %v1890_v2  ;;  %v1355_v6 = vadd.f32 %v4122_v15, %v1354_v4  ;;  %v1356_v8 = vpop.f32.mrb[25].mxu1  ;;  %v1660_v10 = vpop.f32.mrb[25].mxu0 }
 0x150   : > { %v1357_v11 = vpop.f32.mrb[26].mxu1  ;;  %v1661_v16 = vpop.f32.mrb[26].mxu0 }
 0x151   : > { %3246 = vst [vmem:[%s4135_s12 + $0x28] sm:$0xff] %v3105_v5   ;;  %v1659_v13 = vadd.f32 %v1658_v7, %v1355_v6  ;;  %v1358_v14 = vadd.f32 %v4122_v15, %v1357_v11  ;;  %v1359_v17 = vpop.f32.mrb[27].mxu1  ;;  %v1663_v18 = vpop.f32.mrb[27].mxu0 }
 0x153   : > { %v1662_v19 = vadd.f32 %v1661_v16, %v1358_v14  ;;  %1569 = vmatmul.mubr.bf16.gmra.mrb[132].mxu1 %v2888_v9  ;;  %1873 = vmatmul.mubr.bf16.gmra.mrb[132].mxu0 %v2890_v12  ;;  %v1892_v20 = vmax.f32 %v1659_v13, 0.0 }
 0x155   : > { %v1893_v21 = vmax.f32 %v1662_v19, 0.0 }
 0x156   : > { %v1362_v22 = vpop.f32.mrb[28].mxu1  ;;  %v1666_v25 = vpop.f32.mrb[28].mxu0 }
 0x157   : > { %v3110_v23 = vpack.c.bf16 %v1893_v21, %v1892_v20  ;;  %v1363_v24 = vadd.f32 %v4122_v15, %v1362_v22  ;;  %v1364_v26 = vpop.f32.mrb[29].mxu1  ;;  %v1668_v27 = vpop.f32.mrb[29].mxu0 }
 0x158   : > { %v1365_v28 = vpop.f32.mrb[30].mxu1  ;;  %v1669_v31 = vpop.f32.mrb[30].mxu0 }
 0x159   : > { %3247 = vst [vmem:[%s4135_s12 + $0x30] sm:$0xff] %v3110_v23   ;;  %v1667_v29 = vadd.f32 %v1666_v25, %v1363_v24  ;;  %v1366_v30 = vadd.f32 %v4122_v15, %v1365_v28  ;;  %v1367_v32 = vpop.f32.mrb[31].mxu1  ;;  %v1671_v33 = vpop.f32.mrb[31].mxu0 }
 0x15b   : > { %v1670_v34 = vadd.f32 %v1669_v31, %v1366_v30  ;;  %v1894_v35 = vmax.f32 %v1667_v29, 0.0 }
 0x15d   : > { %v1895_v36 = vmax.f32 %v1670_v34, 0.0 }
 0x15e   : > { %v1370_v37 = vpop.f32.mrb[32].mxu1  ;;  %v1674_v40 = vpop.f32.mrb[32].mxu0 }
 0x15f   : > { %v3115_v38 = vpack.c.bf16 %v1895_v36, %v1894_v35  ;;  %v1371_v39 = vadd.f32 %v4122_v15, %v1370_v37  ;;  %v1372_v41 = vpop.f32.mrb[33].mxu1  ;;  %v1676_v42 = vpop.f32.mrb[33].mxu0 }
 0x160   : > { %v1373_v43 = vpop.f32.mrb[34].mxu1  ;;  %v1677_v46 = vpop.f32.mrb[34].mxu0 }
 0x161   : > { %3248 = vst [vmem:[%s4135_s12 + $0x38] sm:$0xff] %v3115_v38   ;;  %v1675_v44 = vadd.f32 %v1674_v40, %v1371_v39  ;;  %v1374_v45 = vadd.f32 %v4122_v15, %v1373_v43  ;;  %v1375_v47 = vpop.f32.mrb[35].mxu1  ;;  %v1679_v48 = vpop.f32.mrb[35].mxu0 }
 0x163   : > { %v1678_v49 = vadd.f32 %v1677_v46, %v1374_v45  ;;  %v1896_v50 = vmax.f32 %v1675_v44, 0.0 }
 0x165   : > { %v1897_v51 = vmax.f32 %v1678_v49, 0.0 }
 0x166   : > { %v1378_v52 = vpop.f32.mrb[36].mxu1  ;;  %v1682_v55 = vpop.f32.mrb[36].mxu0 }
 0x167   : > { %v3120_v53 = vpack.c.bf16 %v1897_v51, %v1896_v50  ;;  %v1379_v54 = vadd.f32 %v4122_v15, %v1378_v52  ;;  %v1380_v56 = vpop.f32.mrb[37].mxu1  ;;  %v1684_v57 = vpop.f32.mrb[37].mxu0 }
 0x168   : > { %v1381_v58 = vpop.f32.mrb[38].mxu1  ;;  %v1685_v61 = vpop.f32.mrb[38].mxu0 }
 0x169   : > { %3249 = vst [vmem:[%s4135_s12 + $0x40] sm:$0xff] %v3120_v53   ;;  %v1683_v59 = vadd.f32 %v1682_v55, %v1379_v54  ;;  %v1382_v60 = vadd.f32 %v4122_v15, %v1381_v58  ;;  %v1383_v62 = vpop.f32.mrb[39].mxu1  ;;  %v1687_v63 = vpop.f32.mrb[39].mxu0 }
 0x16b   : > { %v1686_v0 = vadd.f32 %v1685_v61, %v1382_v60  ;;  %v1898_v1 = vmax.f32 %v1683_v59, 0.0 }
 0x16d   : > { %v1899_v2 = vmax.f32 %v1686_v0, 0.0 }
 0x16e   : > { %v1386_v3 = vpop.f32.mrb[40].mxu1  ;;  %v1690_v6 = vpop.f32.mrb[40].mxu0 }
 0x16f   : > { %v3125_v4 = vpack.c.bf16 %v1899_v2, %v1898_v1  ;;  %v1387_v5 = vadd.f32 %v4122_v15, %v1386_v3  ;;  %v1388_v7 = vpop.f32.mrb[41].mxu1  ;;  %v1692_v8 = vpop.f32.mrb[41].mxu0 }
 0x170   : > { %v1389_v9 = vpop.f32.mrb[42].mxu1  ;;  %v1693_v12 = vpop.f32.mrb[42].mxu0 }
 0x171   : > { %3250 = vst [vmem:[%s4135_s12 + $0x48] sm:$0xff] %v3125_v4   ;;  %v1691_v10 = vadd.f32 %v1690_v6, %v1387_v5  ;;  %v1390_v11 = vadd.f32 %v4122_v15, %v1389_v9  ;;  %v1391_v13 = vpop.f32.mrb[43].mxu1  ;;  %v1695_v14 = vpop.f32.mrb[43].mxu0 }
 0x173   : > { %v1694_v16 = vadd.f32 %v1693_v12, %v1390_v11  ;;  %v1900_v17 = vmax.f32 %v1691_v10, 0.0 }
 0x175   : > { %v1901_v18 = vmax.f32 %v1694_v16, 0.0 }
 0x176   : > { %v1394_v19 = vpop.f32.mrb[44].mxu1  ;;  %v1698_v22 = vpop.f32.mrb[44].mxu0 }
 0x177   : > { %v3130_v20 = vpack.c.bf16 %v1901_v18, %v1900_v17  ;;  %v1395_v21 = vadd.f32 %v4122_v15, %v1394_v19  ;;  %v1396_v23 = vpop.f32.mrb[45].mxu1  ;;  %v1700_v24 = vpop.f32.mrb[45].mxu0 }
 0x178   : > { %v1397_v25 = vpop.f32.mrb[46].mxu1  ;;  %v1701_v28 = vpop.f32.mrb[46].mxu0 }
 0x179   : > { %3251 = vst [vmem:[%s4135_s12 + $0x50] sm:$0xff] %v3130_v20   ;;  %v1699_v26 = vadd.f32 %v1698_v22, %v1395_v21  ;;  %v1398_v27 = vadd.f32 %v4122_v15, %v1397_v25  ;;  %v1399_v29 = vpop.f32.mrb[47].mxu1  ;;  %v1703_v30 = vpop.f32.mrb[47].mxu0 }
 0x17b   : > { %v1702_v31 = vadd.f32 %v1701_v28, %v1398_v27  ;;  %v1902_v32 = vmax.f32 %v1699_v26, 0.0 }
 0x17d   : > { %v1903_v33 = vmax.f32 %v1702_v31, 0.0 }
 0x17e   : > { %v1402_v34 = vpop.f32.mrb[48].mxu1  ;;  %v1706_v37 = vpop.f32.mrb[48].mxu0 }
 0x17f   : > { %v3135_v35 = vpack.c.bf16 %v1903_v33, %v1902_v32  ;;  %v1403_v36 = vadd.f32 %v4122_v15, %v1402_v34  ;;  %v1404_v38 = vpop.f32.mrb[49].mxu1  ;;  %v1708_v39 = vpop.f32.mrb[49].mxu0 }
 0x180   : > { %v1405_v40 = vpop.f32.mrb[50].mxu1  ;;  %v1709_v43 = vpop.f32.mrb[50].mxu0 }
 0x181   : > { %3252 = vst [vmem:[%s4135_s12 + $0x58] sm:$0xff] %v3135_v35   ;;  %v1707_v41 = vadd.f32 %v1706_v37, %v1403_v36  ;;  %v1406_v42 = vadd.f32 %v4122_v15, %v1405_v40  ;;  %v1407_v44 = vpop.f32.mrb[51].mxu1  ;;  %v1711_v45 = vpop.f32.mrb[51].mxu0 }
 0x183   : > { %v1710_v46 = vadd.f32 %v1709_v43, %v1406_v42  ;;  %v1904_v47 = vmax.f32 %v1707_v41, 0.0 }
 0x185   : > { %v1905_v48 = vmax.f32 %v1710_v46, 0.0 }
 0x186   : > { %v1410_v49 = vpop.f32.mrb[52].mxu1  ;;  %v1714_v52 = vpop.f32.mrb[52].mxu0 }
 0x187   : > { %v3140_v50 = vpack.c.bf16 %v1905_v48, %v1904_v47  ;;  %v1411_v51 = vadd.f32 %v4122_v15, %v1410_v49  ;;  %v1412_v53 = vpop.f32.mrb[53].mxu1  ;;  %v1716_v54 = vpop.f32.mrb[53].mxu0 }
 0x188   : > { %v1413_v55 = vpop.f32.mrb[54].mxu1  ;;  %v1717_v58 = vpop.f32.mrb[54].mxu0 }
 0x189   : > { %3253 = vst [vmem:[%s4135_s12 + $0x60] sm:$0xff] %v3140_v50   ;;  %v1715_v56 = vadd.f32 %v1714_v52, %v1411_v51  ;;  %v1414_v57 = vadd.f32 %v4122_v15, %v1413_v55  ;;  %v1415_v59 = vpop.f32.mrb[55].mxu1  ;;  %v1719_v60 = vpop.f32.mrb[55].mxu0 }
 0x18b   : > { %v1718_v61 = vadd.f32 %v1717_v58, %v1414_v57  ;;  %v1906_v62 = vmax.f32 %v1715_v56, 0.0 }
 0x18d   : > { %v1907_v63 = vmax.f32 %v1718_v61, 0.0 }
 0x18e   : > { %v1418_v0 = vpop.f32.mrb[56].mxu1  ;;  %v1722_v3 = vpop.f32.mrb[56].mxu0 }
 0x18f   : > { %v3145_v1 = vpack.c.bf16 %v1907_v63, %v1906_v62  ;;  %v1419_v2 = vadd.f32 %v4122_v15, %v1418_v0  ;;  %v1420_v4 = vpop.f32.mrb[57].mxu1  ;;  %v1724_v5 = vpop.f32.mrb[57].mxu0 }
 0x190   : > { %v1421_v6 = vpop.f32.mrb[58].mxu1  ;;  %v1725_v9 = vpop.f32.mrb[58].mxu0 }
 0x191   : > { %3254 = vst [vmem:[%s4135_s12 + $0x68] sm:$0xff] %v3145_v1   ;;  %v1723_v7 = vadd.f32 %v1722_v3, %v1419_v2  ;;  %v1422_v8 = vadd.f32 %v4122_v15, %v1421_v6  ;;  %v1423_v10 = vpop.f32.mrb[59].mxu1  ;;  %v1727_v11 = vpop.f32.mrb[59].mxu0 }
 0x193   : > { %v1726_v12 = vadd.f32 %v1725_v9, %v1422_v8  ;;  %v1908_v13 = vmax.f32 %v1723_v7, 0.0 }
 0x195   : > { %v1909_v14 = vmax.f32 %v1726_v12, 0.0 }
 0x196   : > { %v1426_v16 = vpop.f32.mrb[60].mxu1  ;;  %v1730_v19 = vpop.f32.mrb[60].mxu0 }
 0x197   : > { %v3150_v17 = vpack.c.bf16 %v1909_v14, %v1908_v13  ;;  %v1427_v18 = vadd.f32 %v4122_v15, %v1426_v16  ;;  %v1428_v20 = vpop.f32.mrb[61].mxu1  ;;  %v1732_v21 = vpop.f32.mrb[61].mxu0 }
 0x198   : > { %v1429_v22 = vpop.f32.mrb[62].mxu1  ;;  %v1733_v25 = vpop.f32.mrb[62].mxu0 }
 0x199   : > { %3255 = vst [vmem:[%s4135_s12 + $0x70] sm:$0xff] %v3150_v17   ;;  %v1731_v23 = vadd.f32 %v1730_v19, %v1427_v18  ;;  %v1430_v24 = vadd.f32 %v4122_v15, %v1429_v22  ;;  %v1431_v26 = vpop.f32.mrb[63].mxu1  ;;  %v1735_v27 = vpop.f32.mrb[63].mxu0 }
 0x19b   : > { %v1734_v28 = vadd.f32 %v1733_v25, %v1430_v24  ;;  %v1910_v29 = vmax.f32 %v1731_v23, 0.0 }
 0x19d   : > { %v1911_v30 = vmax.f32 %v1734_v28, 0.0 }
 0x19e   : > { %v1434_v31 = vpop.f32.mrb[64].mxu1  ;;  %v1738_v34 = vpop.f32.mrb[64].mxu0 }
 0x19f   : > { %v3155_v32 = vpack.c.bf16 %v1911_v30, %v1910_v29  ;;  %v1435_v33 = vadd.f32 %v4122_v15, %v1434_v31  ;;  %v1436_v35 = vpop.f32.mrb[65].mxu1  ;;  %v1740_v36 = vpop.f32.mrb[65].mxu0 }
 0x1a0   : > { %v1437_v37 = vpop.f32.mrb[66].mxu1  ;;  %v1741_v40 = vpop.f32.mrb[66].mxu0 }
 0x1a1   : > { %3256 = vst [vmem:[%s4135_s12 + $0x78] sm:$0xff] %v3155_v32   ;;  %v1739_v38 = vadd.f32 %v1738_v34, %v1435_v33  ;;  %v1438_v39 = vadd.f32 %v4122_v15, %v1437_v37  ;;  %v1439_v41 = vpop.f32.mrb[67].mxu1  ;;  %v1743_v42 = vpop.f32.mrb[67].mxu0 }
 0x1a3   : > { %v1742_v43 = vadd.f32 %v1741_v40, %v1438_v39  ;;  %v1912_v44 = vmax.f32 %v1739_v38, 0.0 }
 0x1a5   : > { %v1913_v45 = vmax.f32 %v1742_v43, 0.0 }
 0x1a6   : > { %v1442_v46 = vpop.f32.mrb[68].mxu1  ;;  %v1746_v49 = vpop.f32.mrb[68].mxu0 }
 0x1a7   : > { %v3160_v47 = vpack.c.bf16 %v1913_v45, %v1912_v44  ;;  %v1443_v48 = vadd.f32 %v4122_v15, %v1442_v46  ;;  %v1444_v50 = vpop.f32.mrb[69].mxu1  ;;  %v1748_v51 = vpop.f32.mrb[69].mxu0 }
 0x1a8   : > { %v1445_v52 = vpop.f32.mrb[70].mxu1  ;;  %v1749_v55 = vpop.f32.mrb[70].mxu0 }
 0x1a9   : > { %3257 = vst [vmem:[%s4135_s12 + $0x80] sm:$0xff] %v3160_v47   ;;  %v1747_v53 = vadd.f32 %v1746_v49, %v1443_v48  ;;  %v1446_v54 = vadd.f32 %v4122_v15, %v1445_v52  ;;  %v1447_v56 = vpop.f32.mrb[71].mxu1  ;;  %v1751_v57 = vpop.f32.mrb[71].mxu0 }
 0x1ab   : > { %v1750_v58 = vadd.f32 %v1749_v55, %v1446_v54  ;;  %v1914_v59 = vmax.f32 %v1747_v53, 0.0 }
 0x1ad   : > { %v1915_v60 = vmax.f32 %v1750_v58, 0.0 }
 0x1ae   : > { %v1450_v61 = vpop.f32.mrb[72].mxu1  ;;  %v1754_v0 = vpop.f32.mrb[72].mxu0 }
 0x1af   : > { %v3165_v62 = vpack.c.bf16 %v1915_v60, %v1914_v59  ;;  %v1451_v63 = vadd.f32 %v4122_v15, %v1450_v61  ;;  %v1452_v1 = vpop.f32.mrb[73].mxu1  ;;  %v1756_v2 = vpop.f32.mrb[73].mxu0 }
 0x1b0   : > { %v1453_v3 = vpop.f32.mrb[74].mxu1  ;;  %v1757_v6 = vpop.f32.mrb[74].mxu0 }
 0x1b1   : > { %3258 = vst [vmem:[%s4135_s12 + $0x88] sm:$0xff] %v3165_v62   ;;  %v1755_v4 = vadd.f32 %v1754_v0, %v1451_v63  ;;  %v1454_v5 = vadd.f32 %v4122_v15, %v1453_v3  ;;  %v1455_v7 = vpop.f32.mrb[75].mxu1  ;;  %v1759_v8 = vpop.f32.mrb[75].mxu0 }
 0x1b3   : > { %v1758_v9 = vadd.f32 %v1757_v6, %v1454_v5  ;;  %v1916_v10 = vmax.f32 %v1755_v4, 0.0 }
 0x1b5   : > { %v1917_v11 = vmax.f32 %v1758_v9, 0.0 }
 0x1b6   : > { %v1458_v12 = vpop.f32.mrb[76].mxu1  ;;  %v1762_v16 = vpop.f32.mrb[76].mxu0 }
 0x1b7   : > { %v3170_v13 = vpack.c.bf16 %v1917_v11, %v1916_v10  ;;  %v1459_v14 = vadd.f32 %v4122_v15, %v1458_v12  ;;  %v1460_v17 = vpop.f32.mrb[77].mxu1  ;;  %v1764_v18 = vpop.f32.mrb[77].mxu0 }
 0x1b8   : > { %v1461_v19 = vpop.f32.mrb[78].mxu1  ;;  %v1765_v22 = vpop.f32.mrb[78].mxu0 }
 0x1b9   : > { %3259 = vst [vmem:[%s4135_s12 + $0x90] sm:$0xff] %v3170_v13   ;;  %v1763_v20 = vadd.f32 %v1762_v16, %v1459_v14  ;;  %v1462_v21 = vadd.f32 %v4122_v15, %v1461_v19  ;;  %v1463_v23 = vpop.f32.mrb[79].mxu1  ;;  %v1767_v24 = vpop.f32.mrb[79].mxu0 }
 0x1bb   : > { %v1766_v25 = vadd.f32 %v1765_v22, %v1462_v21  ;;  %v1918_v26 = vmax.f32 %v1763_v20, 0.0 }
 0x1bd   : > { %v1919_v27 = vmax.f32 %v1766_v25, 0.0 }
 0x1be   : > { %v1466_v28 = vpop.f32.mrb[80].mxu1  ;;  %v1770_v31 = vpop.f32.mrb[80].mxu0 }
 0x1bf   : > { %v3175_v29 = vpack.c.bf16 %v1919_v27, %v1918_v26  ;;  %v1467_v30 = vadd.f32 %v4122_v15, %v1466_v28  ;;  %v1468_v32 = vpop.f32.mrb[81].mxu1  ;;  %v1772_v33 = vpop.f32.mrb[81].mxu0 }
 0x1c0   : > { %v1469_v34 = vpop.f32.mrb[82].mxu1  ;;  %v1773_v37 = vpop.f32.mrb[82].mxu0 }
 0x1c1   : > { %3260 = vst [vmem:[%s4135_s12 + $0x98] sm:$0xff] %v3175_v29   ;;  %v1771_v35 = vadd.f32 %v1770_v31, %v1467_v30  ;;  %v1470_v36 = vadd.f32 %v4122_v15, %v1469_v34  ;;  %v1471_v38 = vpop.f32.mrb[83].mxu1  ;;  %v1775_v39 = vpop.f32.mrb[83].mxu0 }
 0x1c3   : > { %v1774_v40 = vadd.f32 %v1773_v37, %v1470_v36  ;;  %v1920_v41 = vmax.f32 %v1771_v35, 0.0 }
 0x1c5   : > { %v1921_v42 = vmax.f32 %v1774_v40, 0.0 }
 0x1c6   : > { %v1474_v43 = vpop.f32.mrb[84].mxu1  ;;  %v1778_v46 = vpop.f32.mrb[84].mxu0 }
 0x1c7   : > { %v3180_v44 = vpack.c.bf16 %v1921_v42, %v1920_v41  ;;  %v1475_v45 = vadd.f32 %v4122_v15, %v1474_v43  ;;  %v1476_v47 = vpop.f32.mrb[85].mxu1  ;;  %v1780_v48 = vpop.f32.mrb[85].mxu0 }
 0x1c8   : > { %v1477_v49 = vpop.f32.mrb[86].mxu1  ;;  %v1781_v52 = vpop.f32.mrb[86].mxu0 }
 0x1c9   : > { %3261 = vst [vmem:[%s4135_s12 + $0xa0] sm:$0xff] %v3180_v44   ;;  %v1779_v50 = vadd.f32 %v1778_v46, %v1475_v45  ;;  %v1478_v51 = vadd.f32 %v4122_v15, %v1477_v49  ;;  %v1479_v53 = vpop.f32.mrb[87].mxu1  ;;  %v1783_v54 = vpop.f32.mrb[87].mxu0 }
 0x1cb   : > { %v1782_v55 = vadd.f32 %v1781_v52, %v1478_v51  ;;  %v1922_v56 = vmax.f32 %v1779_v50, 0.0 }
 0x1cd   : > { %v1923_v57 = vmax.f32 %v1782_v55, 0.0 }
 0x1ce   : > { %v1482_v58 = vpop.f32.mrb[88].mxu1  ;;  %v1786_v61 = vpop.f32.mrb[88].mxu0 }
 0x1cf   : > { %v3185_v59 = vpack.c.bf16 %v1923_v57, %v1922_v56  ;;  %v1483_v60 = vadd.f32 %v4122_v15, %v1482_v58  ;;  %v1484_v62 = vpop.f32.mrb[89].mxu1  ;;  %v1788_v63 = vpop.f32.mrb[89].mxu0 }
 0x1d0   : > { %v1485_v0 = vpop.f32.mrb[90].mxu1  ;;  %v1789_v3 = vpop.f32.mrb[90].mxu0 }
 0x1d1   : > { %3262 = vst [vmem:[%s4135_s12 + $0xa8] sm:$0xff] %v3185_v59   ;;  %v1787_v1 = vadd.f32 %v1786_v61, %v1483_v60  ;;  %v1486_v2 = vadd.f32 %v4122_v15, %v1485_v0  ;;  %v1487_v4 = vpop.f32.mrb[91].mxu1  ;;  %v1791_v5 = vpop.f32.mrb[91].mxu0 }
 0x1d3   : > { %v1790_v6 = vadd.f32 %v1789_v3, %v1486_v2  ;;  %v1924_v7 = vmax.f32 %v1787_v1, 0.0 }
 0x1d5   : > { %v1925_v8 = vmax.f32 %v1790_v6, 0.0 }
 0x1d6   : > { %v1490_v9 = vpop.f32.mrb[92].mxu1  ;;  %v1794_v12 = vpop.f32.mrb[92].mxu0 }
 0x1d7   : > { %v3190_v10 = vpack.c.bf16 %v1925_v8, %v1924_v7  ;;  %v1491_v11 = vadd.f32 %v4122_v15, %v1490_v9  ;;  %v1492_v13 = vpop.f32.mrb[93].mxu1  ;;  %v1796_v14 = vpop.f32.mrb[93].mxu0 }
 0x1d8   : > { %v1493_v16 = vpop.f32.mrb[94].mxu1  ;;  %v1797_v19 = vpop.f32.mrb[94].mxu0 }
 0x1d9   : > { %3263 = vst [vmem:[%s4135_s12 + $0xb0] sm:$0xff] %v3190_v10   ;;  %v1795_v17 = vadd.f32 %v1794_v12, %v1491_v11  ;;  %v1494_v18 = vadd.f32 %v4122_v15, %v1493_v16  ;;  %v1495_v20 = vpop.f32.mrb[95].mxu1  ;;  %v1799_v21 = vpop.f32.mrb[95].mxu0 }
 0x1db   : > { %v1798_v22 = vadd.f32 %v1797_v19, %v1494_v18  ;;  %v1926_v23 = vmax.f32 %v1795_v17, 0.0 }
 0x1dd   : > { %v1927_v24 = vmax.f32 %v1798_v22, 0.0 }
 0x1de   : > { %v1498_v25 = vpop.f32.mrb[96].mxu1  ;;  %v1802_v28 = vpop.f32.mrb[96].mxu0 }
 0x1df   : > { %v3195_v26 = vpack.c.bf16 %v1927_v24, %v1926_v23  ;;  %v1499_v27 = vadd.f32 %v4122_v15, %v1498_v25  ;;  %v1500_v29 = vpop.f32.mrb[97].mxu1  ;;  %v1804_v30 = vpop.f32.mrb[97].mxu0 }
 0x1e0   : > { %v1501_v31 = vpop.f32.mrb[98].mxu1  ;;  %v1805_v34 = vpop.f32.mrb[98].mxu0  ;;  %v4239_v30 = vld [vmem:[%s4458_s2] ss:$0 sm:$0xff] }
 0x1e1   : > { %3264 = vst [vmem:[%s4135_s12 + $0xb8] sm:$0xff] %v3195_v26   ;;  %v1803_v32 = vadd.f32 %v1802_v28, %v1499_v27  ;;  %v1502_v33 = vadd.f32 %v4122_v15, %v1501_v31  ;;  %v1503_v35 = vpop.f32.mrb[99].mxu1  ;;  %v1807_v36 = vpop.f32.mrb[99].mxu0 }
 0x1e3   : > { %v1806_v37 = vadd.f32 %v1805_v34, %v1502_v33  ;;  %v1928_v38 = vmax.f32 %v1803_v32, 0.0 }
 0x1e5   : > { %v1929_v39 = vmax.f32 %v1806_v37, 0.0 }
 0x1e6   : > { %v1506_v40 = vpop.f32.mrb[100].mxu1  ;;  %v1810_v43 = vpop.f32.mrb[100].mxu0 }
 0x1e7   : > { %v3200_v41 = vpack.c.bf16 %v1929_v39, %v1928_v38  ;;  %v1507_v42 = vadd.f32 %v4122_v15, %v1506_v40  ;;  %v1508_v44 = vpop.f32.mrb[101].mxu1  ;;  %v1812_v45 = vpop.f32.mrb[101].mxu0 }
 0x1e8   : > { %v1509_v46 = vpop.f32.mrb[102].mxu1  ;;  %v1813_v49 = vpop.f32.mrb[102].mxu0 }
 0x1e9   : > { %3265 = vst [vmem:[%s4135_s12 + $0xc0] sm:$0xff] %v3200_v41   ;;  %v1811_v47 = vadd.f32 %v1810_v43, %v1507_v42  ;;  %v1510_v48 = vadd.f32 %v4122_v15, %v1509_v46  ;;  %v1511_v50 = vpop.f32.mrb[103].mxu1  ;;  %v1815_v51 = vpop.f32.mrb[103].mxu0 }
 0x1eb   : > { %v1814_v52 = vadd.f32 %v1813_v49, %v1510_v48  ;;  %v1930_v53 = vmax.f32 %v1811_v47, 0.0 }
 0x1ed   : > { %v1931_v54 = vmax.f32 %v1814_v52, 0.0 }
 0x1ee   : > { %v1514_v55 = vpop.f32.mrb[104].mxu1  ;;  %v1818_v58 = vpop.f32.mrb[104].mxu0 }
 0x1ef   : > { %v3205_v56 = vpack.c.bf16 %v1931_v54, %v1930_v53  ;;  %v1515_v57 = vadd.f32 %v4122_v15, %v1514_v55  ;;  %v1516_v59 = vpop.f32.mrb[105].mxu1  ;;  %v1820_v60 = vpop.f32.mrb[105].mxu0 }
 0x1f0   : > { %v1517_v61 = vpop.f32.mrb[106].mxu1  ;;  %v1821_v0 = vpop.f32.mrb[106].mxu0 }
 0x1f1   : > { %3266 = vst [vmem:[%s4135_s12 + $0xc8] sm:$0xff] %v3205_v56   ;;  %v1819_v62 = vadd.f32 %v1818_v58, %v1515_v57  ;;  %v1518_v63 = vadd.f32 %v4122_v15, %v1517_v61  ;;  %v1519_v1 = vpop.f32.mrb[107].mxu1  ;;  %v1823_v2 = vpop.f32.mrb[107].mxu0 }
 0x1f3   : > { %v1822_v3 = vadd.f32 %v1821_v0, %v1518_v63  ;;  %v1932_v4 = vmax.f32 %v1819_v62, 0.0 }
 0x1f5   : > { %v1933_v5 = vmax.f32 %v1822_v3, 0.0 }
 0x1f6   : > { %v1522_v6 = vpop.f32.mrb[108].mxu1  ;;  %v1826_v9 = vpop.f32.mrb[108].mxu0 }
 0x1f7   : > { %v3210_v7 = vpack.c.bf16 %v1933_v5, %v1932_v4  ;;  %v1523_v8 = vadd.f32 %v4122_v15, %v1522_v6  ;;  %v1524_v10 = vpop.f32.mrb[109].mxu1  ;;  %v1828_v11 = vpop.f32.mrb[109].mxu0 }
 0x1f8   : > { %v1525_v12 = vpop.f32.mrb[110].mxu1  ;;  %v1829_v16 = vpop.f32.mrb[110].mxu0 }
 0x1f9   : > { %3267 = vst [vmem:[%s4135_s12 + $0xd0] sm:$0xff] %v3210_v7   ;;  %v1827_v13 = vadd.f32 %v1826_v9, %v1523_v8  ;;  %v1526_v14 = vadd.f32 %v4122_v15, %v1525_v12  ;;  %v1527_v17 = vpop.f32.mrb[111].mxu1  ;;  %v1831_v18 = vpop.f32.mrb[111].mxu0 }
 0x1fb   : > { %v1830_v19 = vadd.f32 %v1829_v16, %v1526_v14  ;;  %v1934_v20 = vmax.f32 %v1827_v13, 0.0 }
 0x1fd   : > { %v1935_v21 = vmax.f32 %v1830_v19, 0.0 }
 0x1fe   : > { %v1530_v22 = vpop.f32.mrb[112].mxu1  ;;  %v1834_v25 = vpop.f32.mrb[112].mxu0 }
 0x1ff   : > { %v3215_v23 = vpack.c.bf16 %v1935_v21, %v1934_v20  ;;  %v1531_v24 = vadd.f32 %v4122_v15, %v1530_v22  ;;  %v1532_v26 = vpop.f32.mrb[113].mxu1  ;;  %v1836_v27 = vpop.f32.mrb[113].mxu0 }
 0x200   : > { %v1533_v28 = vpop.f32.mrb[114].mxu1  ;;  %v1837_v32 = vpop.f32.mrb[114].mxu0 }
 0x201   : > { %3268 = vst [vmem:[%s4135_s12 + $0xd8] sm:$0xff] %v3215_v23   ;;  %v1835_v29 = vadd.f32 %v1834_v25, %v1531_v24  ;;  %v1534_v31 = vadd.f32 %v4239_v30, %v1533_v28  ;;  %v1535_v33 = vpop.f32.mrb[115].mxu1  ;;  %v1839_v34 = vpop.f32.mrb[115].mxu0 }
 0x203   : > { %v1838_v35 = vadd.f32 %v1837_v32, %v1534_v31  ;;  %v1936_v36 = vmax.f32 %v1835_v29, 0.0 }
 0x205   : > { %v1937_v15 = vmax.f32 %v1838_v35, 0.0 }
 0x206   : > { %v1538_v37 = vpop.f32.mrb[116].mxu1  ;;  %v1842_v40 = vpop.f32.mrb[116].mxu0 }
 0x207   : > { %v3220_v38 = vpack.c.bf16 %v1937_v15, %v1936_v36  ;;  %v1539_v39 = vadd.f32 %v4239_v30, %v1538_v37  ;;  %v1540_v41 = vpop.f32.mrb[117].mxu1  ;;  %v1844_v42 = vpop.f32.mrb[117].mxu0 }
 0x208   : > { %v1541_v43 = vpop.f32.mrb[118].mxu1  ;;  %v1845_v46 = vpop.f32.mrb[118].mxu0 }
 0x209   : > { %3269 = vst [vmem:[%s4135_s12 + $0xe0] sm:$0xff] %v3220_v38   ;;  %v1843_v44 = vadd.f32 %v1842_v40, %v1539_v39  ;;  %v1542_v45 = vadd.f32 %v4239_v30, %v1541_v43  ;;  %v1543_v47 = vpop.f32.mrb[119].mxu1  ;;  %v1847_v48 = vpop.f32.mrb[119].mxu0 }
 0x20b   : > { %v1846_v49 = vadd.f32 %v1845_v46, %v1542_v45  ;;  %v1938_v50 = vmax.f32 %v1843_v44, 0.0 }
 0x20d   : > { %v1939_v51 = vmax.f32 %v1846_v49, 0.0 }
 0x20e   : > { %v1546_v52 = vpop.f32.mrb[120].mxu1  ;;  %v1850_v55 = vpop.f32.mrb[120].mxu0 }
 0x20f   : > { %v3225_v53 = vpack.c.bf16 %v1939_v51, %v1938_v50  ;;  %v1547_v54 = vadd.f32 %v4239_v30, %v1546_v52  ;;  %v1548_v56 = vpop.f32.mrb[121].mxu1  ;;  %v1852_v57 = vpop.f32.mrb[121].mxu0 }
 0x210   : > { %v1549_v58 = vpop.f32.mrb[122].mxu1  ;;  %v1853_v61 = vpop.f32.mrb[122].mxu0 }
 0x211   : > { %3270 = vst [vmem:[%s4135_s12 + $0xe8] sm:$0xff] %v3225_v53   ;;  %v1851_v59 = vadd.f32 %v1850_v55, %v1547_v54  ;;  %v1550_v60 = vadd.f32 %v4239_v30, %v1549_v58  ;;  %v1551_v62 = vpop.f32.mrb[123].mxu1  ;;  %v1855_v63 = vpop.f32.mrb[123].mxu0 }
 0x213   : > { %v1854_v0 = vadd.f32 %v1853_v61, %v1550_v60  ;;  %v1940_v1 = vmax.f32 %v1851_v59, 0.0 }
 0x215   : > { %v1941_v2 = vmax.f32 %v1854_v0, 0.0 }
 0x216   : > { %v1554_v3 = vpop.f32.mrb[124].mxu1  ;;  %v1858_v6 = vpop.f32.mrb[124].mxu0 }
 0x217   : > { %v3230_v4 = vpack.c.bf16 %v1941_v2, %v1940_v1  ;;  %v1555_v5 = vadd.f32 %v4239_v30, %v1554_v3  ;;  %v1556_v7 = vpop.f32.mrb[125].mxu1  ;;  %v1860_v8 = vpop.f32.mrb[125].mxu0 }
 0x218   : > { %v1557_v9 = vpop.f32.mrb[126].mxu1  ;;  %v1861_v12 = vpop.f32.mrb[126].mxu0 }
 0x219   : > { %3271 = vst [vmem:[%s4135_s12 + $0xf0] sm:$0xff] %v3230_v4   ;;  %v1859_v10 = vadd.f32 %v1858_v6, %v1555_v5  ;;  %v1558_v11 = vadd.f32 %v4239_v30, %v1557_v9  ;;  %v1559_v13 = vpop.f32.mrb[127].mxu1  ;;  %v1863_v14 = vpop.f32.mrb[127].mxu0 }
 0x21b   : > { %v1862_v16 = vadd.f32 %v1861_v12, %v1558_v11  ;;  %v1942_v17 = vmax.f32 %v1859_v10, 0.0 }
 0x21d   : > { %v1943_v18 = vmax.f32 %v1862_v16, 0.0 }
 0x21e   : > { %v1562_v19 = vpop.f32.mrb[128].mxu1  ;;  %v1866_v22 = vpop.f32.mrb[128].mxu0 }
 0x21f   : > { %v3235_v20 = vpack.c.bf16 %v1943_v18, %v1942_v17  ;;  %v1563_v21 = vadd.f32 %v4239_v30, %v1562_v19  ;;  %v1564_v23 = vpop.f32.mrb[129].mxu1  ;;  %v1868_v24 = vpop.f32.mrb[129].mxu0 }
 0x220   : > { %v1565_v25 = vpop.f32.mrb[130].mxu1  ;;  %v1869_v28 = vpop.f32.mrb[130].mxu0 }
 0x221   : > { %3272 = vst [vmem:[%s4135_s12 + $0xf8] sm:$0xff] %v3235_v20   ;;  %v1867_v26 = vadd.f32 %v1866_v22, %v1563_v21  ;;  %v1566_v27 = vadd.f32 %v4239_v30, %v1565_v25  ;;  %v1567_v29 = vpop.f32.mrb[131].mxu1  ;;  %v1871_v31 = vpop.f32.mrb[131].mxu0 }
 0x223   : > { %v1870_v32 = vadd.f32 %v1869_v28, %v1566_v27  ;;  %v1944_v33 = vmax.f32 %v1867_v26, 0.0 }
 0x225   : > { %v1945_v34 = vmax.f32 %v1870_v32, 0.0 }
 0x226   : > { %v1570_v35 = vpop.f32.mrb[132].mxu1  ;;  %v1874_v37 = vpop.f32.mrb[132].mxu0 }
 0x227   : > { %v3240_v36 = vpack.c.bf16 %v1945_v34, %v1944_v33  ;;  %v1571_v15 = vadd.f32 %v4239_v30, %v1570_v35  ;;  %v1572_v38 = vpop.f32.mrb[133].mxu1  ;;  %v1876_v39 = vpop.f32.mrb[133].mxu0 }
 0x228   : > { %v1573_v40 = vpop.f32.mrb[134].mxu1  ;;  %v1877_v42 = vpop.f32.mrb[134].mxu0 }
 0x229   : > { %3273 = vst [vmem:[%s4135_s12 + $0x100] sm:$0xff] %v3240_v36   ;;  %v1875_v41 = vadd.f32 %v1874_v37, %v1571_v15  ;;  %v1574_v43 = vpop.f32.mrb[135].mxu1  ;;  %v1878_v44 = vpop.f32.mrb[135].mxu0  ;;  %2289 = sbr.rel (!%p3867_p4) target bundleno = 651 (0x28b), region = 36 }
 0x22b   : > { %v1946_v45 = vmax.f32 %v1875_v41, 0.0 }
 0x22d   : > { %v3073_v46 = vpack.c.bf16 %v1946_v45, %v1946_v45 }
 0x22f   : > { %2282 = vst [vmem:[%s4135_s12 + $0x108] sm:$0xf] %v3073_v46 }
 0x230   : > { %s4468_s9 = smov (!%p2292_p8, %s2291_s9), 67 }
 0x231   : > { %s2991_s22 = sshll.u32 %s4468_s9, 6 }
 0x232   : > { %p2994_p9 = scmp.eq.s32.totalorder %s2991_s22, 0 }
 0x233   : > { %s4270_s23 = sshrl.u32 (!%p2994_p9), %s4468_s9, 6 }
 0x234   : > { %2300 = sbr.rel (%p2994_p9) target bundleno = 651 (0x28b), region = 40  ;;  %p2995_p10 = scmp.le.s32.totalorder (!%p2994_p9), %s4270_s23, 0 }
 0x23b   : > { %2705 = sbr.rel (%p2995_p10) target bundleno = 630 (0x276), region = 112  ;;  %s4461_s15 = smov (!%p2995_p10), %s4264_s21 }
 0x23c   : > { %s4462_s20 = smov (!%p2995_p10), %s4135_s12  ;;  %s4279_s18 = smov (!%p2995_p10), 0  }
 0x23d   : > { %s4281_s24 = smov (!%p2995_p10), 0  }
 0x242 LB: >> { %v2316_v30 = vld [vmem:[%s3795_s20] sm:$0xf]  ;;  %v2318_v47 = vld [vmem:[%s3795_s20 + $0x4] sm:$0xf]  ;;  %v2320_v48 = vld [vmem:[%s3795_s20 + $0x8] sm:$0xf]  ;;  %s3803_s24 = sphi %s4281_s24, %s2310_s24   ;;  %s3799_s18 = sphi %s4279_s18, %s4463_s18   ;;  %s3795_s20 = sphi %s4462_s20, %s2449_s20   ;;  %s3791_s15 = sphi %s4461_s15, %s2450_s15  }
 0x243   : >> { %2317 = vst [vmem:[%s3791_s15] sm:$0xf] %v2316_v30  ;;  %2319 = vst [vmem:[%s3791_s15 + $0x4] sm:$0xf] %v2318_v47  ;;  %v2322_v49 = vld [vmem:[%s3795_s20 + $0xc] sm:$0xf]  ;;  %s2444_s25 = sadd.s32 1, %s3799_s18 }
 0x244   : >> { %2321 = vst [vmem:[%s3791_s15 + $0x8] sm:$0xf] %v2320_v48  ;;  %v2324_v50 = vld [vmem:[%s3795_s20 + $0x10] sm:$0xf]  ;;  %v2326_v51 = vld [vmem:[%s3795_s20 + $0x14] sm:$0xf]  ;;  %p2445_p11 = scmp.ge.s32.totalorder %s2444_s25, %s4270_s23 }
 0x245   : >> { %2323 = vst [vmem:[%s3791_s15 + $0xc] sm:$0xf] %v2322_v49  ;;  %2325 = vst [vmem:[%s3791_s15 + $0x10] sm:$0xf] %v2324_v50  ;;  %v2328_v52 = vld [vmem:[%s3795_s20 + $0x18] sm:$0xf] }
 0x246   : >> { %2327 = vst [vmem:[%s3791_s15 + $0x14] sm:$0xf] %v2326_v51  ;;  %v2330_v53 = vld [vmem:[%s3795_s20 + $0x1c] sm:$0xf]  ;;  %v2332_v54 = vld [vmem:[%s3795_s20 + $0x20] sm:$0xf] }
 0x247   : >> { %2329 = vst [vmem:[%s3791_s15 + $0x18] sm:$0xf] %v2328_v52  ;;  %2331 = vst [vmem:[%s3791_s15 + $0x1c] sm:$0xf] %v2330_v53  ;;  %v2334_v55 = vld [vmem:[%s3795_s20 + $0x24] sm:$0xf] }
 0x248   : >> { %2333 = vst [vmem:[%s3791_s15 + $0x20] sm:$0xf] %v2332_v54  ;;  %v2336_v56 = vld [vmem:[%s3795_s20 + $0x28] sm:$0xf]  ;;  %v2338_v57 = vld [vmem:[%s3795_s20 + $0x2c] sm:$0xf] }
 0x249   : >> { %2335 = vst [vmem:[%s3791_s15 + $0x24] sm:$0xf] %v2334_v55  ;;  %2337 = vst [vmem:[%s3791_s15 + $0x28] sm:$0xf] %v2336_v56  ;;  %v2340_v58 = vld [vmem:[%s3795_s20 + $0x30] sm:$0xf] }
 0x24a   : >> { %2339 = vst [vmem:[%s3791_s15 + $0x2c] sm:$0xf] %v2338_v57  ;;  %v2342_v59 = vld [vmem:[%s3795_s20 + $0x34] sm:$0xf]  ;;  %v2344_v60 = vld [vmem:[%s3795_s20 + $0x38] sm:$0xf] }
 0x24b   : >> { %2341 = vst [vmem:[%s3791_s15 + $0x30] sm:$0xf] %v2340_v58  ;;  %2343 = vst [vmem:[%s3791_s15 + $0x34] sm:$0xf] %v2342_v59  ;;  %v2346_v61 = vld [vmem:[%s3795_s20 + $0x3c] sm:$0xf] }
 0x24c   : >> { %2345 = vst [vmem:[%s3791_s15 + $0x38] sm:$0xf] %v2344_v60  ;;  %v2348_v62 = vld [vmem:[%s3795_s20 + $0x40] sm:$0xf]  ;;  %v2350_v63 = vld [vmem:[%s3795_s20 + $0x44] sm:$0xf] }
 0x24d   : >> { %2347 = vst [vmem:[%s3791_s15 + $0x3c] sm:$0xf] %v2346_v61  ;;  %2349 = vst [vmem:[%s3791_s15 + $0x40] sm:$0xf] %v2348_v62  ;;  %v2352_v0 = vld [vmem:[%s3795_s20 + $0x48] sm:$0xf] }
 0x24e   : >> { %2351 = vst [vmem:[%s3791_s15 + $0x44] sm:$0xf] %v2350_v63  ;;  %v2354_v1 = vld [vmem:[%s3795_s20 + $0x4c] sm:$0xf]  ;;  %v2356_v2 = vld [vmem:[%s3795_s20 + $0x50] sm:$0xf] }
 0x24f   : >> { %2353 = vst [vmem:[%s3791_s15 + $0x48] sm:$0xf] %v2352_v0  ;;  %2355 = vst [vmem:[%s3791_s15 + $0x4c] sm:$0xf] %v2354_v1  ;;  %v2358_v3 = vld [vmem:[%s3795_s20 + $0x54] sm:$0xf] }
 0x250   : >> { %2357 = vst [vmem:[%s3791_s15 + $0x50] sm:$0xf] %v2356_v2  ;;  %v2360_v4 = vld [vmem:[%s3795_s20 + $0x58] sm:$0xf]  ;;  %v2362_v5 = vld [vmem:[%s3795_s20 + $0x5c] sm:$0xf] }
 0x251   : >> { %2359 = vst [vmem:[%s3791_s15 + $0x54] sm:$0xf] %v2358_v3  ;;  %2361 = vst [vmem:[%s3791_s15 + $0x58] sm:$0xf] %v2360_v4  ;;  %v2364_v6 = vld [vmem:[%s3795_s20 + $0x60] sm:$0xf] }
 0x252   : >> { %2363 = vst [vmem:[%s3791_s15 + $0x5c] sm:$0xf] %v2362_v5  ;;  %v2366_v7 = vld [vmem:[%s3795_s20 + $0x64] sm:$0xf]  ;;  %v2368_v8 = vld [vmem:[%s3795_s20 + $0x68] sm:$0xf] }
 0x253   : >> { %2365 = vst [vmem:[%s3791_s15 + $0x60] sm:$0xf] %v2364_v6  ;;  %2367 = vst [vmem:[%s3791_s15 + $0x64] sm:$0xf] %v2366_v7  ;;  %v2370_v9 = vld [vmem:[%s3795_s20 + $0x6c] sm:$0xf] }
 0x254   : >> { %2369 = vst [vmem:[%s3791_s15 + $0x68] sm:$0xf] %v2368_v8  ;;  %v2372_v10 = vld [vmem:[%s3795_s20 + $0x70] sm:$0xf]  ;;  %v2374_v11 = vld [vmem:[%s3795_s20 + $0x74] sm:$0xf] }
 0x255   : >> { %2371 = vst [vmem:[%s3791_s15 + $0x6c] sm:$0xf] %v2370_v9  ;;  %2373 = vst [vmem:[%s3791_s15 + $0x70] sm:$0xf] %v2372_v10  ;;  %v2376_v12 = vld [vmem:[%s3795_s20 + $0x78] sm:$0xf] }
 0x256   : >> { %2375 = vst [vmem:[%s3791_s15 + $0x74] sm:$0xf] %v2374_v11  ;;  %v2378_v13 = vld [vmem:[%s3795_s20 + $0x7c] sm:$0xf]  ;;  %v2380_v14 = vld [vmem:[%s3795_s20 + $0x80] sm:$0xf] }
 0x257   : >> { %2377 = vst [vmem:[%s3791_s15 + $0x78] sm:$0xf] %v2376_v12  ;;  %2379 = vst [vmem:[%s3791_s15 + $0x7c] sm:$0xf] %v2378_v13  ;;  %v2382_v16 = vld [vmem:[%s3795_s20 + $0x84] sm:$0xf] }
 0x258   : >> { %2381 = vst [vmem:[%s3791_s15 + $0x80] sm:$0xf] %v2380_v14  ;;  %v2384_v17 = vld [vmem:[%s3795_s20 + $0x88] sm:$0xf]  ;;  %v2386_v18 = vld [vmem:[%s3795_s20 + $0x8c] sm:$0xf] }
 0x259   : >> { %2383 = vst [vmem:[%s3791_s15 + $0x84] sm:$0xf] %v2382_v16  ;;  %2385 = vst [vmem:[%s3791_s15 + $0x88] sm:$0xf] %v2384_v17  ;;  %v2388_v19 = vld [vmem:[%s3795_s20 + $0x90] sm:$0xf] }
 0x25a   : >> { %2387 = vst [vmem:[%s3791_s15 + $0x8c] sm:$0xf] %v2386_v18  ;;  %v2390_v20 = vld [vmem:[%s3795_s20 + $0x94] sm:$0xf]  ;;  %v2392_v21 = vld [vmem:[%s3795_s20 + $0x98] sm:$0xf] }
 0x25b   : >> { %2389 = vst [vmem:[%s3791_s15 + $0x90] sm:$0xf] %v2388_v19  ;;  %2391 = vst [vmem:[%s3791_s15 + $0x94] sm:$0xf] %v2390_v20  ;;  %v2394_v22 = vld [vmem:[%s3795_s20 + $0x9c] sm:$0xf] }
 0x25c   : >> { %2393 = vst [vmem:[%s3791_s15 + $0x98] sm:$0xf] %v2392_v21  ;;  %v2396_v23 = vld [vmem:[%s3795_s20 + $0xa0] sm:$0xf]  ;;  %v2398_v24 = vld [vmem:[%s3795_s20 + $0xa4] sm:$0xf] }
 0x25d   : >> { %2395 = vst [vmem:[%s3791_s15 + $0x9c] sm:$0xf] %v2394_v22  ;;  %2397 = vst [vmem:[%s3791_s15 + $0xa0] sm:$0xf] %v2396_v23  ;;  %v2400_v25 = vld [vmem:[%s3795_s20 + $0xa8] sm:$0xf] }
 0x25e   : >> { %2399 = vst [vmem:[%s3791_s15 + $0xa4] sm:$0xf] %v2398_v24  ;;  %v2402_v26 = vld [vmem:[%s3795_s20 + $0xac] sm:$0xf]  ;;  %v2404_v27 = vld [vmem:[%s3795_s20 + $0xb0] sm:$0xf] }
 0x25f   : >> { %2401 = vst [vmem:[%s3791_s15 + $0xa8] sm:$0xf] %v2400_v25  ;;  %2403 = vst [vmem:[%s3791_s15 + $0xac] sm:$0xf] %v2402_v26  ;;  %v2406_v28 = vld [vmem:[%s3795_s20 + $0xb4] sm:$0xf] }
 0x260   : >> { %2405 = vst [vmem:[%s3791_s15 + $0xb0] sm:$0xf] %v2404_v27  ;;  %v2408_v29 = vld [vmem:[%s3795_s20 + $0xb8] sm:$0xf]  ;;  %v2410_v31 = vld [vmem:[%s3795_s20 + $0xbc] sm:$0xf] }
 0x261   : >> { %2407 = vst [vmem:[%s3791_s15 + $0xb4] sm:$0xf] %v2406_v28  ;;  %2409 = vst [vmem:[%s3791_s15 + $0xb8] sm:$0xf] %v2408_v29  ;;  %v2412_v32 = vld [vmem:[%s3795_s20 + $0xc0] sm:$0xf] }
 0x262   : >> { %2411 = vst [vmem:[%s3791_s15 + $0xbc] sm:$0xf] %v2410_v31  ;;  %v2414_v33 = vld [vmem:[%s3795_s20 + $0xc4] sm:$0xf]  ;;  %v2416_v34 = vld [vmem:[%s3795_s20 + $0xc8] sm:$0xf] }
 0x263   : >> { %2413 = vst [vmem:[%s3791_s15 + $0xc0] sm:$0xf] %v2412_v32  ;;  %2415 = vst [vmem:[%s3791_s15 + $0xc4] sm:$0xf] %v2414_v33  ;;  %v2418_v35 = vld [vmem:[%s3795_s20 + $0xcc] sm:$0xf] }
 0x264   : >> { %2417 = vst [vmem:[%s3791_s15 + $0xc8] sm:$0xf] %v2416_v34  ;;  %v2420_v36 = vld [vmem:[%s3795_s20 + $0xd0] sm:$0xf]  ;;  %v2422_v15 = vld [vmem:[%s3795_s20 + $0xd4] sm:$0xf] }
 0x265   : >> { %2419 = vst [vmem:[%s3791_s15 + $0xcc] sm:$0xf] %v2418_v35  ;;  %2421 = vst [vmem:[%s3791_s15 + $0xd0] sm:$0xf] %v2420_v36  ;;  %v2424_v37 = vld [vmem:[%s3795_s20 + $0xd8] sm:$0xf] }
 0x266   : >> { %2423 = vst [vmem:[%s3791_s15 + $0xd4] sm:$0xf] %v2422_v15  ;;  %v2426_v38 = vld [vmem:[%s3795_s20 + $0xdc] sm:$0xf]  ;;  %v2428_v39 = vld [vmem:[%s3795_s20 + $0xe0] sm:$0xf] }
 0x267   : >> { %2425 = vst [vmem:[%s3791_s15 + $0xd8] sm:$0xf] %v2424_v37  ;;  %2427 = vst [vmem:[%s3791_s15 + $0xdc] sm:$0xf] %v2426_v38  ;;  %v2430_v40 = vld [vmem:[%s3795_s20 + $0xe4] sm:$0xf] }
 0x268   : >> { %2429 = vst [vmem:[%s3791_s15 + $0xe0] sm:$0xf] %v2428_v39  ;;  %v2432_v41 = vld [vmem:[%s3795_s20 + $0xe8] sm:$0xf]  ;;  %v2434_v42 = vld [vmem:[%s3795_s20 + $0xec] sm:$0xf] }
 0x269   : >> { %2431 = vst [vmem:[%s3791_s15 + $0xe4] sm:$0xf] %v2430_v40  ;;  %2433 = vst [vmem:[%s3791_s15 + $0xe8] sm:$0xf] %v2432_v41  ;;  %v2436_v43 = vld [vmem:[%s3795_s20 + $0xf0] sm:$0xf] }
 0x26a   : >> { %2435 = vst [vmem:[%s3791_s15 + $0xec] sm:$0xf] %v2434_v42  ;;  %v2438_v44 = vld [vmem:[%s3795_s20 + $0xf4] sm:$0xf]  ;;  %v2440_v45 = vld [vmem:[%s3795_s20 + $0xf8] sm:$0xf] }
 0x26b   : >> { %2437 = vst [vmem:[%s3791_s15 + $0xf0] sm:$0xf] %v2436_v43  ;;  %2439 = vst [vmem:[%s3791_s15 + $0xf4] sm:$0xf] %v2438_v44  ;;  %v2442_v46 = vld [vmem:[%s3795_s20 + $0xfc] sm:$0xf] }
 0x26c   : >> { %2441 = vst [vmem:[%s3791_s15 + $0xf8] sm:$0xf] %v2440_v45  ;;  %2443 = vst [vmem:[%s3791_s15 + $0xfc] sm:$0xf] %v2442_v46  ;;  %s4470_s25 = smov (%p2445_p11, %s2444_s25), 0  ;;  %s2310_s24 = sadd.s32 1, %s3803_s24  }
 0x26d   : >> { %s2996_s26 = sshll.u32 %s4470_s25, 8  ;;  %p2309_p12 = scmp.ge.s32.totalorder %s2310_s24, %s4270_s23 }
 0x26e   : >> { %s2449_s20 = scalar_lea.vmem %s4135_s12, %s2996_s26 [#allocation2]   ;;  %s2450_s15 = scalar_lea.vmem %s4264_s21, %s2996_s26  }
 0x26f   : >> { %s4463_s18 = smov %s4470_s25  ;;  %2312 = sbr.rel (!%p2309_p12) target bundleno = 578 (0x242), region = 118 }
 0x276 PF: > { %s4438_s27 = sand.u32 63, %s4468_s9   ;;  %s3075_s28 = sshll.u32 %s4270_s23, 8 }
 0x277   : > { %s2455_s29 = scalar_lea.vmem %s4135_s12, %s3075_s28 [#allocation2]   ;;  %s2457_s30 = scalar_lea.vmem %s4264_s21, %s3075_s28  }
 0x278   : > { %p3001_p13 = scmp.le.s32.totalorder %s4438_s27, 0 }
 0x279   : > { %s3805_s4 = smov (!%p3001_p13), %s2457_s30   ;;  %s3809_s5 = smov (!%p3001_p13), %s2455_s29  }
 0x27a   : > { %2719 = sbr.rel (%p3001_p13) target bundleno = 651 (0x28b), region = 123  ;;  %s3813_s6 = smov (!%p3001_p13), 0  }
 0x27b   : > { %s3817_s7 = smov (!%p3001_p13), 0  }
 0x281 LB: >> { %v2467_v30 = vld [vmem:[%s3811_s5] sm:$0xf]  ;;  %s2469_s14 = sadd.s32 1, %s3815_s6  ;;  %s2461_s7 = sadd.s32 1, %s3819_s7   ;;  %s3819_s7 = sphi %s3817_s7, %s2461_s7   ;;  %s3815_s6 = sphi %s3813_s6, %s3814_s6   ;;  %s3811_s5 = sphi %s3809_s5, %s2474_s5   ;;  %s3807_s4 = sphi %s3805_s4, %s2475_s4  }
 0x282   : >> { %2468 = vst [vmem:[%s3807_s4] sm:$0xf] %v2467_v30  ;;  %p2470_p0 = scmp.ge.s32.totalorder %s2469_s14, %s4438_s27  ;;  %p2460_p1 = scmp.ge.s32.totalorder %s2461_s7, %s4438_s27 }
 0x284   : >> { %s4472_s14 = smov (%p2470_p0, %s2469_s14), 0  ;;  %2463 = sbr.rel (!%p2460_p1) target bundleno = 641 (0x281), region = 129 }
 0x285   : >> { %s3002_s12 = sshll.u32 %s4472_s14, 2  ;;  %s3814_s6 = smov %s4472_s14  }
 0x286   : >> { %s2474_s5 = scalar_lea.vmem %s2455_s29, %s3002_s12 [#allocation2]   ;;  %s2475_s4 = scalar_lea.vmem %s2457_s30, %s3002_s12  }
 0x28b PF: > { %p10_p2 = scmp.ge.s32.totalorder %s3857_s16, 4   ;;  %s4464_s12 = smov %s3783_s13 }
 0x28c   : > { %s4465_s13 = smov %s3865_s19  ;;  %s4466_s14 = smov %s3857_s16 }
 0x28d   :  { %12 = sbr.rel (!%p10_p2) target bundleno = 2 (0x2), region = 140 }

// kernel: cnn_basic_forward.3
= control target key start
LH: loop header
LB: loop body
LE: loop exit
PB: predicated region body
PF: predicated region fallthrough
CT: control target
= control target key end

     0   :  { %vm8136_vm0 = vmmov 0   ;;  %s10159_s1 = inlined_call_operand.vmem [shape: bf16[5504,128], index: 1, kind: input, shape index: {}]   ;;  %s10160_s0 = inlined_call_operand.vmem [shape: bf16[1,9,8,5504], index: 0, kind: input, shape index: {}]   ;;  %s10161_s3 = inlined_call_operand.vmem [shape: bf16[1,128,128], index: 3, kind: input, shape index: {}]   ;;  %s10162_s5 = inlined_call_operand.vmem [shape: bf16[128,128], index: 5, kind: input, shape index: {}]   ;;  %s10163_s2 = inlined_call_operand.vmem [shape: f32[1,128], index: 2, kind: input, shape index: {}]   ;;  %s10164_s4 = inlined_call_operand.vmem [shape: f32[1,128], index: 4, kind: input, shape index: {}]   ;;  %s10165_s6 = inlined_call_operand.vmem [shape: f32[1,128], index: 6, kind: input, shape index: {}]   ;;  %s10166_s7 = inlined_call_operand.vmem [shape: f32[8,128], index: 7, kind: output, shape index: {}]  }
   0x1   :  { %v7476_v0 = vld [vmem:[%s10159_s1 + $0x40] sm:$0xff]   ;;  %v7480_v4 = vld [vmem:[%s10159_s1 + $0x48] sm:$0xff]   ;;  %v7484_v8 = vld [vmem:[%s10159_s1 + $0x50] sm:$0xff]  }
   0x2   :  { %v7477_v1 = vld [vmem:[%s10159_s1 + $0xc0] sm:$0xff]   ;;  %6401 = vmatprep.subr.bf16.mxu0 %v7476_v0  ;;  %v7481_v5 = vld [vmem:[%s10159_s1 + $0xc8] sm:$0xff]   ;;  %v7485_v9 = vld [vmem:[%s10159_s1 + $0xd0] sm:$0xff]  }
   0x3   :  { %v7478_v2 = vld [vmem:[%s10159_s1] sm:$0xff]   ;;  %6447 = vmatprep.subr.bf16.mxu1 %v7477_v1  ;;  %v7482_v6 = vld [vmem:[%s10159_s1 + $0x8] sm:$0xff]   ;;  %v7486_v10 = vld [vmem:[%s10159_s1 + $0x10] sm:$0xff]  }
   0x4   :  { %v7479_v3 = vld [vmem:[%s10159_s1 + $0x80] sm:$0xff]   ;;  %6402 = vmatpush3.bf16.msra.mxu0 %v7478_v2  ;;  %v7483_v7 = vld [vmem:[%s10159_s1 + $0x88] sm:$0xff]   ;;  %v7487_v11 = vld [vmem:[%s10159_s1 + $0x90] sm:$0xff]  }
   0x5   :  { %6448 = vmatpush3.bf16.msra.mxu1 %v7479_v3  ;;  %6403 = vmatprep.subr.bf16.mxu0 %v7480_v4  ;;  %v7488_v12 = vld [vmem:[%s10159_s1 + $0x58] sm:$0xff]   ;;  %v7492_v16 = vld [vmem:[%s10159_s1 + $0x60] sm:$0xff]   ;;  %v7496_v20 = vld [vmem:[%s10159_s1 + $0x68] sm:$0xff]  }
   0x6   :  { %6449 = vmatprep.subr.bf16.mxu1 %v7481_v5  ;;  %v7489_v13 = vld [vmem:[%s10159_s1 + $0xd8] sm:$0xff]   ;;  %v7493_v17 = vld [vmem:[%s10159_s1 + $0xe0] sm:$0xff]   ;;  %v7497_v21 = vld [vmem:[%s10159_s1 + $0xe8] sm:$0xff]  }
   0x7   :  { %v7490_v14 = vld [vmem:[%s10159_s1 + $0x18] sm:$0xff]   ;;  %v7494_v18 = vld [vmem:[%s10159_s1 + $0x20] sm:$0xff]   ;;  %v7498_v22 = vld [vmem:[%s10159_s1 + $0x28] sm:$0xff]  }
   0x8   :  { %6404 = vmatpush3.bf16.msra.mxu0 %v7482_v6  ;;  %v7491_v15 = vld [vmem:[%s10159_s1 + $0x98] sm:$0xff]   ;;  %v7495_v19 = vld [vmem:[%s10159_s1 + $0xa0] sm:$0xff]   ;;  %v7499_v23 = vld [vmem:[%s10159_s1 + $0xa8] sm:$0xff]  }
   0x9   :  { %6450 = vmatpush3.bf16.msra.mxu1 %v7483_v7  ;;  %6405 = vmatprep.subr.bf16.mxu0 %v7484_v8  ;;  %v7500_v24 = vld [vmem:[%s10159_s1 + $0x70] sm:$0xff]   ;;  %v7504_v28 = vld [vmem:[%s10159_s1 + $0x78] sm:$0xff]   ;;  %v7508_v32 = vld [vmem:[%s10160_s0] ss:$172 sps:$4 sm:$0xff]  }
   0xa   :  { %6451 = vmatprep.subr.bf16.mxu1 %v7485_v9  ;;  %v7501_v25 = vld [vmem:[%s10159_s1 + $0xf0] sm:$0xff]   ;;  %v7505_v29 = vld [vmem:[%s10159_s1 + $0xf8] sm:$0xff]   ;;  %v7514_v36 = vld [vmem:[%s10159_s1 + $0x140] sm:$0xff]  }
   0xb   :  { %v7502_v26 = vld [vmem:[%s10159_s1 + $0x30] sm:$0xff]   ;;  %v7506_v30 = vld [vmem:[%s10159_s1 + $0x38] sm:$0xff]   ;;  %v7515_v37 = vld [vmem:[%s10159_s1 + $0x100] sm:$0xff]  }
   0xc   :  { %6406 = vmatpush3.bf16.msra.mxu0 %v7486_v10  ;;  %v7503_v27 = vld [vmem:[%s10159_s1 + $0xb0] sm:$0xff]   ;;  %v7507_v31 = vld [vmem:[%s10159_s1 + $0xb8] sm:$0xff]   ;;  %v7516_v38 = vld [vmem:[%s10159_s1 + $0x148] sm:$0xff]  }
   0xd   :  { %6452 = vmatpush3.bf16.msra.mxu1 %v7487_v11  ;;  %6407 = vmatprep.subr.bf16.mxu0 %v7488_v12  ;;  %v7510_v33 = vld [vmem:[%s10160_s0 + $0x4] ss:$172 sps:$4 sm:$0xff]   ;;  %v7511_v34 = vld [vmem:[%s10160_s0 + $0x8] ss:$172 sps:$4 sm:$0xff]   ;;  %v7513_v35 = vld [vmem:[%s10160_s0 + $0xc] ss:$172 sps:$4 sm:$0xff]  }
   0xe   :  { %6453 = vmatprep.subr.bf16.mxu1 %v7489_v13  ;;  %4024 = vmatprep.mubr.bf16.mxu0 %v7510_v33  ;;  %v7517_v39 = vld [vmem:[%s10159_s1 + $0x1c0] sm:$0xff]   ;;  %v7518_v40 = vld [vmem:[%s10159_s1 + $0x108] sm:$0xff]   ;;  %v7526_v46 = vld [vmem:[%s10159_s1 + $0x150] sm:$0xff]  }
   0xf   :  { %4096 = vmatprep.mubr.bf16.mxu1 %v7513_v35  ;;  %v7519_v41 = vld [vmem:[%s10159_s1 + $0x180] sm:$0xff]   ;;  %v7520_v42 = vld [vmem:[%s10160_s0 + $0x15c] ss:$172 sps:$4 sm:$0xff]   ;;  %v7528_v48 = vld [vmem:[%s10159_s1 + $0x110] sm:$0xff]  }
  0x10   :  { %6408 = vmatpush3.bf16.msra.mxu0 %v7490_v14  ;;  %v7522_v43 = vld [vmem:[%s10160_s0 + $0x164] ss:$172 sps:$4 sm:$0xff]   ;;  %v7525_v45 = vld [vmem:[%s10160_s0 + $0x160] ss:$172 sps:$4 sm:$0xff]   ;;  %v7532_v51 = vld [vmem:[%s10160_s0 + $0x2bc] ss:$172 sps:$4 sm:$0xff]  }
  0x11   :  { %6454 = vmatpush3.bf16.msra.mxu1 %v7491_v15  ;;  %6409 = vmatprep.subr.bf16.mxu0 %v7492_v16  ;;  %v7524_v44 = vld [vmem:[%s10160_s0 + $0x158] ss:$172 sps:$4 sm:$0xff]   ;;  %v7527_v47 = vld [vmem:[%s10159_s1 + $0x1c8] sm:$0xff]   ;;  %v7530_v50 = vld [vmem:[%s10160_s0 + $0x2b4] ss:$172 sps:$4 sm:$0xff]  }
  0x12   :  { %6455 = vmatprep.subr.bf16.mxu1 %v7493_v17  ;;  %v7529_v49 = vld [vmem:[%s10159_s1 + $0x188] sm:$0xff]   ;;  %v7534_v52 = vld [vmem:[%s10159_s1 + $0x158] sm:$0xff]   ;;  %v7535_v53 = vld [vmem:[%s10159_s1 + $0x1d0] sm:$0xff]  }
  0x13   :  { %v7536_v54 = vld [vmem:[%s10160_s0 + $0x2b0] ss:$172 sps:$4 sm:$0xff]   ;;  %v7537_v55 = vld [vmem:[%s10160_s0 + $0x2b8] ss:$172 sps:$4 sm:$0xff]   ;;  %v7546_v63 = vld [vmem:[%s10160_s0 + $0x414] ss:$172 sps:$4 sm:$0xff]  }
  0x14   :  { %6410 = vmatpush3.bf16.msra.mxu0 %v7494_v18  ;;  %v7538_v56 = vld [vmem:[%s10159_s1 + $0x118] sm:$0xff]   ;;  %v7539_v57 = vld [vmem:[%s10159_s1 + $0x190] sm:$0xff]   ;;  %v7540_v58 = vld [vmem:[%s10159_s1 + $0x160] sm:$0xff]  }
  0x15   :  { %6456 = vmatpush3.bf16.msra.mxu1 %v7495_v19  ;;  %6411 = vmatprep.subr.bf16.mxu0 %v7496_v20  ;;  %v7541_v59 = vld [vmem:[%s10159_s1 + $0x1d8] sm:$0xff]   ;;  %v7542_v60 = vld [vmem:[%s10159_s1 + $0x120] sm:$0xff]   ;;  %v7548_v0 = vld [vmem:[%s10160_s0 + $0x408] ss:$172 sps:$4 sm:$0xff]  }
  0x16   :  { %6457 = vmatprep.subr.bf16.mxu1 %v7497_v21  ;;  %v7543_v61 = vld [vmem:[%s10159_s1 + $0x198] sm:$0xff]   ;;  %v7550_v2 = vld [vmem:[%s10159_s1 + $0x168] sm:$0xff]   ;;  %v7551_v3 = vld [vmem:[%s10159_s1 + $0x1e0] sm:$0xff]  }
  0x17   :  { %v7544_v62 = vld [vmem:[%s10160_s0 + $0x40c] ss:$172 sps:$4 sm:$0xff]   ;;  %v7549_v1 = vld [vmem:[%s10160_s0 + $0x410] ss:$172 sps:$4 sm:$0xff]   ;;  %v7553_v5 = vld [vmem:[%s10159_s1 + $0x1a0] sm:$0xff]  }
  0x18   :  { %6412 = vmatpush3.bf16.msra.mxu0 %v7498_v22  ;;  %v7552_v4 = vld [vmem:[%s10159_s1 + $0x128] sm:$0xff]   ;;  %v7554_v6 = vld [vmem:[%s10159_s1 + $0x170] sm:$0xff]   ;;  %v203_v8 = vld [vmem:[%s10160_s0 + $0x560] sm:$0xff] }
  0x19   :  { %6458 = vmatpush3.bf16.msra.mxu1 %v7499_v23  ;;  %6413 = vmatprep.subr.bf16.mxu0 %v7500_v24  ;;  %v7555_v7 = vld [vmem:[%s10159_s1 + $0x1e8] sm:$0xff]   ;;  %v5996_v9 = vcombine.high %v203_v8, %v203_v8  ;;  %v5995_v11 = vcombine.low %v203_v8, %v203_v8  ;;  %v7558_v13 = vld [vmem:[%s10159_s1 + $0x130] sm:$0xff]   ;;  %v7563_v17 = vld [vmem:[%s10159_s1 + $0x178] sm:$0xff]  }
  0x1a   :  { %6459 = vmatprep.subr.bf16.mxu1 %v7501_v25  ;;  %v204_v10 = vld [vmem:[%s10160_s0 + $0x568] sm:$0xff]  ;;  %v7562_v16 = vld [vmem:[%s10159_s1 + $0x1f0] sm:$0xff]   ;;  %v7565_v19 = vld [vmem:[%s10159_s1 + $0x138] sm:$0xff]  }
  0x1b   :  { %v5998_v12 = vcombine.high %v204_v10, %v204_v10  ;;  %v5997_v14 = vcombine.low %v204_v10, %v204_v10  ;;  %v7559_v15 = vld [vmem:[%s10159_s1 + $0x1a8] sm:$0xff]   ;;  %v7564_v18 = vld [vmem:[%s10159_s1 + $0x1b0] sm:$0xff]   ;;  %v7566_v20 = vld [vmem:[%s10159_s1 + $0x1f8] sm:$0xff]  }
  0x1c   :  { %6414 = vmatpush3.bf16.msra.mxu0 %v7502_v26  ;;  %v7567_v21 = vld [vmem:[%s10160_s0 + $0x10] ss:$172 sps:$4 sm:$0xff]   ;;  %v7569_v22 = vld [vmem:[%s10160_s0 + $0x14] ss:$172 sps:$4 sm:$0xff]   ;;  %v7572_v25 = vld [vmem:[%s10160_s0 + $0x18] ss:$172 sps:$4 sm:$0xff]  }
  0x1d   :  { %6460 = vmatpush3.bf16.msra.mxu1 %v7503_v27  ;;  %6415 = vmatprep.subr.bf16.mxu0 %v7504_v28  ;;  %v7570_v23 = vld [vmem:[%s10159_s1 + $0x1b8] sm:$0xff]   ;;  %v7571_v24 = vld [vmem:[%s10159_s1 + $0x240] sm:$0xff]   ;;  %v7576_v28 = vld [vmem:[%s10159_s1 + $0x248] sm:$0xff]  }
  0x1e   :  { %6461 = vmatprep.subr.bf16.mxu1 %v7505_v29  ;;  %v7574_v26 = vld [vmem:[%s10160_s0 + $0x1c] ss:$172 sps:$4 sm:$0xff]   ;;  %v7575_v27 = vld [vmem:[%s10159_s1 + $0x200] sm:$0xff]   ;;  %v7624_v8 = vld [vmem:[%s10159_s1 + $0x2b0] sm:$0xff]  }
  0x1f   :  { %v7577_v29 = vld [vmem:[%s10159_s1 + $0x2c0] sm:$0xff]   ;;  %v7582_v33 = vld [vmem:[%s10160_s0 + $0x168] ss:$172 sps:$4 sm:$0xff]   ;;  %v7585_v35 = vld [vmem:[%s10160_s0 + $0x170] ss:$172 sps:$4 sm:$0xff]  }
  0x20   :  { %6416 = vmatpush3.bf16.msra.mxu0 %v7506_v30  ;;  %v7578_v30 = vld [vmem:[%s10159_s1 + $0x208] sm:$0xff]   ;;  %v7626_v10 = vld [vmem:[%s10159_s1 + $0x2f8] sm:$0xff]  }
  0x21   :  { %6462 = vmatpush3.bf16.msra.mxu1 %v7507_v31  ;;  %6493 = vmatprep.subr.bf16.mxu0 %v7514_v36  ;;  %v7579_v31 = vld [vmem:[%s10159_s1 + $0x280] sm:$0xff]   ;;  %v7586_v36 = vld [vmem:[%s10159_s1 + $0x250] sm:$0xff]  }
  0x22   :  { %6539 = vmatprep.subr.bf16.mxu1 %v7517_v39  ;;  %v7589_v39 = vld [vmem:[%s10159_s1 + $0x288] sm:$0xff]  }
  0x23   :  { %4025 = vmatmul.mubr.bf16.vlgmr.msra.gmra.mrb[0].mxu0 %v7508_v32  ;;  %v7580_v32 = vld [vmem:[%s10160_s0 + $0x16c] ss:$172 sps:$4 sm:$0xff]  }
  0x24   :  { %4097 = vmatmul.mubr.bf16.vlgmr.msra.gmra.mrb[0].mxu1 %v7511_v34  ;;  %6494 = vmatpush3.bf16.msra.mxu0 %v7515_v37  ;;  %v7583_v34 = vld [vmem:[%s10160_s0 + $0x174] ss:$172 sps:$4 sm:$0xff]   ;;  %v7587_v37 = vld [vmem:[%s10159_s1 + $0x2c8] sm:$0xff]  }
  0x25   :  { %6495 = vmatprep.subr.bf16.mxu0 %v7516_v38  ;;  %6540 = vmatpush3.bf16.msra.mxu1 %v7519_v41  ;;  %v7588_v38 = vld [vmem:[%s10159_s1 + $0x210] sm:$0xff]   ;;  %v7592_v41 = vld [vmem:[%s10159_s1 + $0x258] sm:$0xff]  }
  0x26   :  { %4032 = vmatprep.mubr.bf16.mxu0 %v7520_v42  ;;  %4104 = vmatprep.mubr.bf16.mxu1 %v7522_v43  ;;  %v7593_v42 = vld [vmem:[%s10159_s1 + $0x2d0] sm:$0xff]   ;;  %v7594_v43 = vld [vmem:[%s10160_s0 + $0x2c0] ss:$172 sps:$4 sm:$0xff]  }
  0x27   :  { %6541 = vmatprep.subr.bf16.mxu1 %v7527_v47  ;;  %v7599_v47 = vld [vmem:[%s10160_s0 + $0x2c8] ss:$172 sps:$4 sm:$0xff]  }
  0x28   :  { %6496 = vmatpush3.bf16.msra.mxu0 %v7518_v40  ;;  %v7590_v40 = vld [vmem:[%s10160_s0 + $0x2c4] ss:$172 sps:$4 sm:$0xff]  }
  0x29   :  { %6497 = vmatprep.subr.bf16.mxu0 %v7526_v46  ;;  %6542 = vmatpush3.bf16.msra.mxu1 %v7529_v49  ;;  %v7597_v46 = vld [vmem:[%s10160_s0 + $0x2cc] ss:$172 sps:$4 sm:$0xff]  }
  0x2a   :  { %6543 = vmatprep.subr.bf16.mxu1 %v7535_v53  ;;  %v7601_v49 = vld [vmem:[%s10159_s1 + $0x2d8] sm:$0xff]  }
  0x2b   :  { %4033 = vmatmul.mubr.bf16.gmra.mrb[4].mxu0 %v7524_v44  ;;  %v7595_v44 = vld [vmem:[%s10159_s1 + $0x218] sm:$0xff]  }
  0x2c   :  { %4105 = vmatmul.mubr.bf16.gmra.mrb[4].mxu1 %v7525_v45  ;;  %6498 = vmatpush3.bf16.msra.mxu0 %v7528_v48  ;;  %v7596_v45 = vld [vmem:[%s10159_s1 + $0x290] sm:$0xff]   ;;  %v7600_v48 = vld [vmem:[%s10159_s1 + $0x260] sm:$0xff]  }
  0x2d   :  { %4040 = vmatprep.mubr.bf16.mxu0 %v7530_v50  ;;  %4112 = vmatprep.mubr.bf16.mxu1 %v7532_v51  ;;  %v7602_v50 = vld [vmem:[%s10159_s1 + $0x220] sm:$0xff]   ;;  %v7603_v51 = vld [vmem:[%s10159_s1 + $0x298] sm:$0xff]  }
  0x2e   :  { %6499 = vmatprep.subr.bf16.mxu0 %v7534_v52  ;;  %6544 = vmatpush3.bf16.msra.mxu1 %v7539_v57  ;;  %v7604_v52 = vld [vmem:[%s10160_s0 + $0x41c] ss:$172 sps:$4 sm:$0xff]   ;;  %v7606_v53 = vld [vmem:[%s10160_s0 + $0x418] ss:$172 sps:$4 sm:$0xff]   ;;  %v7611_v57 = vld [vmem:[%s10160_s0 + $0x420] ss:$172 sps:$4 sm:$0xff]  }
  0x2f   :  { %6545 = vmatprep.subr.bf16.mxu1 %v7541_v59  ;;  %v7613_v59 = vld [vmem:[%s10159_s1 + $0x2a0] sm:$0xff]  }
  0x30   :  { %6500 = vmatpush3.bf16.msra.mxu0 %v7538_v56  ;;  %v7610_v56 = vld [vmem:[%s10159_s1 + $0x2e0] sm:$0xff]  }
  0x31   :  { %6501 = vmatprep.subr.bf16.mxu0 %v7540_v58  ;;  %v7612_v58 = vld [vmem:[%s10159_s1 + $0x228] sm:$0xff]  }
  0x32   :  { %6546 = vmatpush3.bf16.msra.mxu1 %v7543_v61  ;;  %v7615_v61 = vld [vmem:[%s10159_s1 + $0x2e8] sm:$0xff]  }
  0x33   :  { %4041 = vmatmul.mubr.bf16.gmra.mrb[8].mxu0 %v7536_v54  ;;  %6547 = vmatprep.subr.bf16.mxu1 %v7551_v3  ;;  %v7607_v54 = vld [vmem:[%s10160_s0 + $0x424] ss:$172 sps:$4 sm:$0xff]   ;;  %v206_v3 = vld [vmem:[%s10160_s0 + $0x578] sm:$0xff] }
  0x34   :  { %4113 = vmatmul.mubr.bf16.gmra.mrb[8].mxu1 %v7537_v55  ;;  %6502 = vmatpush3.bf16.msra.mxu0 %v7542_v60  ;;  %v7609_v55 = vld [vmem:[%s10159_s1 + $0x268] sm:$0xff]   ;;  %v7614_v60 = vld [vmem:[%s10159_s1 + $0x270] sm:$0xff]  }
  0x35   :  { %4048 = vmatprep.mubr.bf16.mxu0 %v7544_v62  ;;  %4120 = vmatprep.mubr.bf16.mxu1 %v7546_v63  ;;  %v205_v62 = vld [vmem:[%s10160_s0 + $0x570] sm:$0xff] }
  0x36   :  { %6503 = vmatprep.subr.bf16.mxu0 %v7550_v2  ;;  %6548 = vmatpush3.bf16.msra.mxu1 %v7553_v5  ;;  %v6000_v63 = vcombine.high %v205_v62, %v205_v62  ;;  %v7618_v2 = vld [vmem:[%s10159_s1 + $0x2a8] sm:$0xff]   ;;  %v6001_v5 = vcombine.low %v206_v3, %v206_v3 }
  0x37   :  { %6549 = vmatprep.subr.bf16.mxu1 %v7555_v7  ;;  %v7623_v7 = vld [vmem:[%s10159_s1 + $0x278] sm:$0xff]  }
  0x38   :  { %6504 = vmatpush3.bf16.msra.mxu0 %v7552_v4  ;;  %v6002_v4 = vcombine.high %v206_v3, %v206_v3  ;;  %v7690_v3 = vld [vmem:[%s10159_s1 + $0x3b8] sm:$0xff]  }
  0x39   :  { %6505 = vmatprep.subr.bf16.mxu0 %v7554_v6  ;;  %v7622_v6 = vld [vmem:[%s10159_s1 + $0x2f0] sm:$0xff]  }
  0x3a   :  { %6550 = vmatpush3.bf16.msra.mxu1 %v7559_v15  ;;  %v7632_v15 = vld [vmem:[%s10160_s0 + $0x28] ss:$172 sps:$4 sm:$0xff]  }
  0x3b   :  { %4049 = vmatmul.mubr.bf16.gmra.mrb[12].mxu0 %v7548_v0  ;;  %6551 = vmatprep.subr.bf16.mxu1 %v7562_v16  ;;  %v7617_v0 = vld [vmem:[%s10159_s1 + $0x230] sm:$0xff]   ;;  %v7634_v16 = vld [vmem:[%s10160_s0 + $0x2c] ss:$172 sps:$4 sm:$0xff]  }
  0x3c   :  { %4121 = vmatmul.mubr.bf16.gmra.mrb[12].mxu1 %v7549_v1  ;;  %4056 = vmatprep.mubr.bf16.mxu0 %v5996_v9  ;;  %v5999_v1 = vcombine.low %v205_v62, %v205_v62  ;;  %v7625_v9 = vld [vmem:[%s10159_s1 + $0x238] sm:$0xff]   ;;  %v7684_v62 = vld [vmem:[%s10159_s1 + $0x3b0] sm:$0xff]  }
  0x3d   :  { %4128 = vmatprep.mubr.bf16.mxu1 %v5998_v12  ;;  %6506 = vmatpush3.bf16.msra.mxu0 %v7558_v13  ;;  %v7629_v12 = vld [vmem:[%s10160_s0 + $0x24] ss:$172 sps:$4 sm:$0xff]   ;;  %v7630_v13 = vld [vmem:[%s10159_s1 + $0x2b8] sm:$0xff]  }
  0x3e   :  { %6507 = vmatprep.subr.bf16.mxu0 %v7563_v17  ;;  %6552 = vmatpush3.bf16.msra.mxu1 %v7564_v18  ;;  %v7635_v17 = vld [vmem:[%s10159_s1 + $0x300] sm:$0xff]   ;;  %v7636_v18 = vld [vmem:[%s10159_s1 + $0x348] sm:$0xff]  }
  0x3f   :  { %6553 = vmatprep.subr.bf16.mxu1 %v7566_v20  ;;  %v7638_v20 = vld [vmem:[%s10159_s1 + $0x308] sm:$0xff]  }
  0x41   :  { %6508 = vmatpush3.bf16.msra.mxu0 %v7565_v19  ;;  %v7637_v19 = vld [vmem:[%s10159_s1 + $0x3c0] sm:$0xff]  }
  0x42   :  { %6554 = vmatpush3.bf16.msra.mxu1 %v7570_v23  ;;  %6585 = vmatprep.subr.bf16.mxu0 %v7571_v24  ;;  %v7642_v23 = vld [vmem:[%s10160_s0 + $0x178] ss:$172 sps:$4 sm:$0xff]  }
  0x43   :  { %4057 = vmatmul.mubr.bf16.gmra.mrb[16].mxu0 %v5995_v11  ;;  %6631 = vmatprep.subr.bf16.mxu1 %v7577_v29  ;;  %v7627_v11 = vld [vmem:[%s10160_s0 + $0x20] ss:$172 sps:$4 sm:$0xff]   ;;  %v7643_v24 = vld [vmem:[%s10160_s0 + $0x184] ss:$172 sps:$4 sm:$0xff]  }
  0x44   :  { %4129 = vmatmul.mubr.bf16.gmra.mrb[16].mxu1 %v5997_v14  ;;  %4168 = vmatprep.mubr.bf16.mxu0 %v7569_v22  ;;  %v7631_v14 = vld [vmem:[%s10159_s1 + $0x340] sm:$0xff]   ;;  %v7640_v22 = vld [vmem:[%s10160_s0 + $0x17c] ss:$172 sps:$4 sm:$0xff]  }
  0x45   :  { %4240 = vmatprep.mubr.bf16.mxu1 %v7574_v26  ;;  %v7646_v26 = vld [vmem:[%s10159_s1 + $0x350] sm:$0xff]   ;;  %v7649_v29 = vld [vmem:[%s10159_s1 + $0x388] sm:$0xff]  }
  0x4b   :  { %4169 = vmatmul.mubr.bf16.vlgmr.msra.gmra.mrb[20].mxu0 %v7567_v21  ;;  %v7639_v21 = vld [vmem:[%s10159_s1 + $0x380] sm:$0xff]  }
  0x4c   :  { %6586 = vmatpush3.bf16.msra.mxu0 %v7575_v27  ;;  %4241 = vmatmul.mubr.bf16.vlgmr.msra.gmra.mrb[20].mxu1 %v7572_v25  ;;  %v7645_v25 = vld [vmem:[%s10160_s0 + $0x180] ss:$172 sps:$4 sm:$0xff]  }
  0x4d   :  { %6587 = vmatprep.subr.bf16.mxu0 %v7576_v28  ;;  %6632 = vmatpush3.bf16.msra.mxu1 %v7579_v31  ;;  %v7647_v27 = vld [vmem:[%s10159_s1 + $0x3c8] sm:$0xff]   ;;  %v7648_v28 = vld [vmem:[%s10159_s1 + $0x310] sm:$0xff]   ;;  %v7652_v31 = vld [vmem:[%s10159_s1 + $0x358] sm:$0xff]  }
  0x4e   :  { %4176 = vmatprep.mubr.bf16.mxu0 %v7580_v32  ;;  %4248 = vmatprep.mubr.bf16.mxu1 %v7583_v34  ;;  %v7653_v32 = vld [vmem:[%s10159_s1 + $0x3d0] sm:$0xff]   ;;  %v7655_v34 = vld [vmem:[%s10159_s1 + $0x318] sm:$0xff]  }
  0x4f   :  { %6633 = vmatprep.subr.bf16.mxu1 %v7587_v37  ;;  %v7659_v37 = vld [vmem:[%s10160_s0 + $0x2d8] ss:$172 sps:$4 sm:$0xff]  }
  0x50   :  { %6588 = vmatpush3.bf16.msra.mxu0 %v7578_v30  ;;  %v7650_v30 = vld [vmem:[%s10160_s0 + $0x2d4] ss:$172 sps:$4 sm:$0xff]  }
  0x51   :  { %6589 = vmatprep.subr.bf16.mxu0 %v7586_v36  ;;  %6634 = vmatpush3.bf16.msra.mxu1 %v7589_v39  ;;  %v7657_v36 = vld [vmem:[%s10160_s0 + $0x2dc] ss:$172 sps:$4 sm:$0xff]  }
  0x52   :  { %6635 = vmatprep.subr.bf16.mxu1 %v7593_v42  ;;  %v7661_v39 = vld [vmem:[%s10159_s1 + $0x3d8] sm:$0xff]  }
  0x53   :  { %4177 = vmatmul.mubr.bf16.gmra.mrb[24].mxu0 %v7582_v33  ;;  %v7654_v33 = vld [vmem:[%s10160_s0 + $0x2d0] ss:$172 sps:$4 sm:$0xff]   ;;  %v7664_v42 = vld [vmem:[%s10160_s0 + $0x42c] ss:$172 sps:$4 sm:$0xff]  }
  0x54   :  { %4249 = vmatmul.mubr.bf16.gmra.mrb[24].mxu1 %v7585_v35  ;;  %6590 = vmatpush3.bf16.msra.mxu0 %v7588_v38  ;;  %v7656_v35 = vld [vmem:[%s10159_s1 + $0x390] sm:$0xff]   ;;  %v7660_v38 = vld [vmem:[%s10159_s1 + $0x360] sm:$0xff]  }
  0x55   :  { %4184 = vmatprep.mubr.bf16.mxu0 %v7590_v40  ;;  %6591 = vmatprep.subr.bf16.mxu0 %v7592_v41  ;;  %v7662_v40 = vld [vmem:[%s10159_s1 + $0x320] sm:$0xff]   ;;  %v7663_v41 = vld [vmem:[%s10159_s1 + $0x398] sm:$0xff]  }
  0x56   :  { %6636 = vmatpush3.bf16.msra.mxu1 %v7596_v45  ;;  %4256 = vmatprep.mubr.bf16.mxu1 %v7597_v46  ;;  %v7669_v45 = vld [vmem:[%s10159_s1 + $0x368] sm:$0xff]   ;;  %v7670_v46 = vld [vmem:[%s10159_s1 + $0x3e0] sm:$0xff]  }
  0x57   :  { %6637 = vmatprep.subr.bf16.mxu1 %v7601_v49  ;;  %v7673_v49 = vld [vmem:[%s10159_s1 + $0x3a0] sm:$0xff]  }
  0x58   :  { %6592 = vmatpush3.bf16.msra.mxu0 %v7595_v44  ;;  %v7667_v44 = vld [vmem:[%s10160_s0 + $0x434] ss:$172 sps:$4 sm:$0xff]  }
  0x59   :  { %6593 = vmatprep.subr.bf16.mxu0 %v7600_v48  ;;  %v7672_v48 = vld [vmem:[%s10159_s1 + $0x328] sm:$0xff]  }
  0x5a   :  { %6638 = vmatpush3.bf16.msra.mxu1 %v7603_v51  ;;  %v7675_v51 = vld [vmem:[%s10159_s1 + $0x3e8] sm:$0xff]  }
  0x5b   :  { %4185 = vmatmul.mubr.bf16.gmra.mrb[28].mxu0 %v7594_v43  ;;  %6639 = vmatprep.subr.bf16.mxu1 %v7610_v56  ;;  %v7666_v43 = vld [vmem:[%s10160_s0 + $0x428] ss:$172 sps:$4 sm:$0xff]  }
  0x5c   :  { %4257 = vmatmul.mubr.bf16.gmra.mrb[28].mxu1 %v7599_v47  ;;  %6594 = vmatpush3.bf16.msra.mxu0 %v7602_v50  ;;  %v7671_v47 = vld [vmem:[%s10160_s0 + $0x430] ss:$172 sps:$4 sm:$0xff]   ;;  %v7678_v56 = vld [vmem:[%s10159_s1 + $0x3a8] sm:$0xff]  }
  0x5d   :  { %4192 = vmatprep.mubr.bf16.mxu0 %v7604_v52  ;;  %4264 = vmatprep.mubr.bf16.mxu1 %v7607_v54  ;;  %v7674_v50 = vld [vmem:[%s10159_s1 + $0x370] sm:$0xff]   ;;  %v207_v52 = vld [vmem:[%s10160_s0 + $0x580] sm:$0xff] }
  0x5e   :  { %6595 = vmatprep.subr.bf16.mxu0 %v7609_v55  ;;  %6640 = vmatpush3.bf16.msra.mxu1 %v7613_v59  ;;  %v7677_v54 = vld [vmem:[%s10159_s1 + $0x330] sm:$0xff]   ;;  %v6003_v55 = vcombine.low %v207_v52, %v207_v52 }
  0x5f   :  { %6641 = vmatprep.subr.bf16.mxu1 %v7615_v61  ;;  %v7683_v61 = vld [vmem:[%s10159_s1 + $0x378] sm:$0xff]  }
  0x60   :  { %6596 = vmatpush3.bf16.msra.mxu0 %v7612_v58 }
  0x61   :  { %6597 = vmatprep.subr.bf16.mxu0 %v7614_v60  ;;  %v7682_v60 = vld [vmem:[%s10159_s1 + $0x3f0] sm:$0xff]  }
  0x62   :  { %6642 = vmatpush3.bf16.msra.mxu1 %v7618_v2  ;;  %v7689_v2 = vld [vmem:[%s10160_s0 + $0x34] ss:$172 sps:$4 sm:$0xff]  }
  0x63   :  { %4193 = vmatmul.mubr.bf16.gmra.mrb[32].mxu0 %v7606_v53  ;;  %6643 = vmatprep.subr.bf16.mxu1 %v7622_v6  ;;  %v6004_v53 = vcombine.high %v207_v52, %v207_v52  ;;  %v7694_v6 = vld [vmem:[%s10160_s0 + $0x3c] ss:$172 sps:$4 sm:$0xff]   ;;  %v7744_v52 = vld [vmem:[%s10159_s1 + $0x4b0] sm:$0xff]  }
  0x64   :  { %4265 = vmatmul.mubr.bf16.gmra.mrb[32].mxu1 %v7611_v57  ;;  %4200 = vmatprep.mubr.bf16.mxu0 %v6000_v63  ;;  %v208_v57 = vld [vmem:[%s10160_s0 + $0x588] sm:$0xff]  ;;  %v7685_v63 = vld [vmem:[%s10159_s1 + $0x338] sm:$0xff]  }
  0x65   :  { %6598 = vmatpush3.bf16.msra.mxu0 %v7617_v0  ;;  %4272 = vmatprep.mubr.bf16.mxu1 %v6002_v4  ;;  %v6006_v58 = vcombine.high %v208_v57, %v208_v57  ;;  %v6005_v59 = vcombine.low %v208_v57, %v208_v57  ;;  %v7686_v0 = vld [vmem:[%s10159_s1 + $0x3f8] sm:$0xff]   ;;  %v7691_v4 = vld [vmem:[%s10159_s1 + $0x440] sm:$0xff]  }
  0x66   :  { %6599 = vmatprep.subr.bf16.mxu0 %v7623_v7  ;;  %6644 = vmatpush3.bf16.msra.mxu1 %v7624_v8  ;;  %v7695_v7 = vld [vmem:[%s10159_s1 + $0x400] sm:$0xff]   ;;  %v7696_v8 = vld [vmem:[%s10159_s1 + $0x448] sm:$0xff]   ;;  %v7750_v57 = vld [vmem:[%s10159_s1 + $0x4b8] sm:$0xff]  }
  0x67   :  { %6645 = vmatprep.subr.bf16.mxu1 %v7626_v10  ;;  %v7698_v10 = vld [vmem:[%s10159_s1 + $0x408] sm:$0xff]  }
  0x69   :  { %6600 = vmatpush3.bf16.msra.mxu0 %v7625_v9  ;;  %v7697_v9 = vld [vmem:[%s10159_s1 + $0x4c0] sm:$0xff]  }
  0x6a   :  { %6646 = vmatpush3.bf16.msra.mxu1 %v7630_v13  ;;  %6677 = vmatprep.subr.bf16.mxu0 %v7631_v14  ;;  %v7702_v13 = vld [vmem:[%s10160_s0 + $0x188] ss:$172 sps:$4 sm:$0xff]  }
  0x6b   :  { %4201 = vmatmul.mubr.bf16.gmra.mrb[36].mxu0 %v5999_v1  ;;  %6723 = vmatprep.subr.bf16.mxu1 %v7637_v19  ;;  %v7687_v1 = vld [vmem:[%s10160_s0 + $0x30] ss:$172 sps:$4 sm:$0xff]   ;;  %v7703_v14 = vld [vmem:[%s10160_s0 + $0x194] ss:$172 sps:$4 sm:$0xff]   ;;  %v7709_v19 = vld [vmem:[%s10159_s1 + $0x488] sm:$0xff]  }
  0x6c   :  { %4273 = vmatmul.mubr.bf16.gmra.mrb[36].mxu1 %v6001_v5  ;;  %4312 = vmatprep.mubr.bf16.mxu0 %v7629_v12  ;;  %v7692_v5 = vld [vmem:[%s10160_s0 + $0x38] ss:$172 sps:$4 sm:$0xff]  }
  0x6d   :  { %4384 = vmatprep.mubr.bf16.mxu1 %v7634_v16  ;;  %v7700_v12 = vld [vmem:[%s10160_s0 + $0x18c] ss:$172 sps:$4 sm:$0xff]   ;;  %v7706_v16 = vld [vmem:[%s10159_s1 + $0x450] sm:$0xff]  }
  0x73   :  { %4313 = vmatmul.mubr.bf16.vlgmr.msra.gmra.mrb[40].mxu0 %v7627_v11  ;;  %v7699_v11 = vld [vmem:[%s10159_s1 + $0x480] sm:$0xff]  }
  0x74   :  { %6678 = vmatpush3.bf16.msra.mxu0 %v7635_v17  ;;  %4385 = vmatmul.mubr.bf16.vlgmr.msra.gmra.mrb[40].mxu1 %v7632_v15  ;;  %v7705_v15 = vld [vmem:[%s10160_s0 + $0x190] ss:$172 sps:$4 sm:$0xff]   ;;  %v7707_v17 = vld [vmem:[%s10159_s1 + $0x4c8] sm:$0xff]  }
  0x75   :  { %6679 = vmatprep.subr.bf16.mxu0 %v7636_v18  ;;  %6724 = vmatpush3.bf16.msra.mxu1 %v7639_v21  ;;  %v7708_v18 = vld [vmem:[%s10159_s1 + $0x410] sm:$0xff]   ;;  %v7712_v21 = vld [vmem:[%s10159_s1 + $0x458] sm:$0xff]  }
  0x76   :  { %4320 = vmatprep.mubr.bf16.mxu0 %v7640_v22  ;;  %4392 = vmatprep.mubr.bf16.mxu1 %v7643_v24  ;;  %v7713_v22 = vld [vmem:[%s10159_s1 + $0x4d0] sm:$0xff]   ;;  %v7715_v24 = vld [vmem:[%s10159_s1 + $0x418] sm:$0xff]  }
  0x77   :  { %6725 = vmatprep.subr.bf16.mxu1 %v7647_v27  ;;  %v7719_v27 = vld [vmem:[%s10160_s0 + $0x2e8] ss:$172 sps:$4 sm:$0xff]  }
  0x78   :  { %6680 = vmatpush3.bf16.msra.mxu0 %v7638_v20  ;;  %v7710_v20 = vld [vmem:[%s10160_s0 + $0x2e4] ss:$172 sps:$4 sm:$0xff]  }
  0x79   :  { %6681 = vmatprep.subr.bf16.mxu0 %v7646_v26  ;;  %6726 = vmatpush3.bf16.msra.mxu1 %v7649_v29  ;;  %v7717_v26 = vld [vmem:[%s10160_s0 + $0x2ec] ss:$172 sps:$4 sm:$0xff]  }
  0x7a   :  { %6727 = vmatprep.subr.bf16.mxu1 %v7653_v32  ;;  %v7721_v29 = vld [vmem:[%s10159_s1 + $0x4d8] sm:$0xff]  }
  0x7b   :  { %4321 = vmatmul.mubr.bf16.gmra.mrb[44].mxu0 %v7642_v23  ;;  %v7714_v23 = vld [vmem:[%s10160_s0 + $0x2e0] ss:$172 sps:$4 sm:$0xff]   ;;  %v7724_v32 = vld [vmem:[%s10160_s0 + $0x43c] ss:$172 sps:$4 sm:$0xff]  }
  0x7c   :  { %4393 = vmatmul.mubr.bf16.gmra.mrb[44].mxu1 %v7645_v25  ;;  %6682 = vmatpush3.bf16.msra.mxu0 %v7648_v28  ;;  %v7716_v25 = vld [vmem:[%s10159_s1 + $0x490] sm:$0xff]   ;;  %v7720_v28 = vld [vmem:[%s10159_s1 + $0x460] sm:$0xff]  }
  0x7d   :  { %4328 = vmatprep.mubr.bf16.mxu0 %v7650_v30  ;;  %6683 = vmatprep.subr.bf16.mxu0 %v7652_v31  ;;  %v7722_v30 = vld [vmem:[%s10159_s1 + $0x420] sm:$0xff]   ;;  %v7723_v31 = vld [vmem:[%s10159_s1 + $0x498] sm:$0xff]  }
  0x7e   :  { %6728 = vmatpush3.bf16.msra.mxu1 %v7656_v35  ;;  %4400 = vmatprep.mubr.bf16.mxu1 %v7657_v36  ;;  %v7729_v35 = vld [vmem:[%s10159_s1 + $0x468] sm:$0xff]   ;;  %v7730_v36 = vld [vmem:[%s10159_s1 + $0x4e0] sm:$0xff]  }
  0x7f   :  { %6729 = vmatprep.subr.bf16.mxu1 %v7661_v39  ;;  %v7733_v39 = vld [vmem:[%s10159_s1 + $0x4a0] sm:$0xff]  }
  0x80   :  { %6684 = vmatpush3.bf16.msra.mxu0 %v7655_v34  ;;  %v7727_v34 = vld [vmem:[%s10160_s0 + $0x444] ss:$172 sps:$4 sm:$0xff]  }
  0x81   :  { %6685 = vmatprep.subr.bf16.mxu0 %v7660_v38  ;;  %v7732_v38 = vld [vmem:[%s10159_s1 + $0x428] sm:$0xff]  }
  0x82   :  { %6730 = vmatpush3.bf16.msra.mxu1 %v7663_v41  ;;  %v7735_v41 = vld [vmem:[%s10159_s1 + $0x4e8] sm:$0xff]  }
  0x83   :  { %4329 = vmatmul.mubr.bf16.gmra.mrb[48].mxu0 %v7654_v33  ;;  %6731 = vmatprep.subr.bf16.mxu1 %v7670_v46  ;;  %v7726_v33 = vld [vmem:[%s10160_s0 + $0x438] ss:$172 sps:$4 sm:$0xff]   ;;  %v7738_v46 = vld [vmem:[%s10159_s1 + $0x4a8] sm:$0xff]  }
  0x84   :  { %4401 = vmatmul.mubr.bf16.gmra.mrb[48].mxu1 %v7659_v37  ;;  %6686 = vmatpush3.bf16.msra.mxu0 %v7662_v40  ;;  %v7731_v37 = vld [vmem:[%s10160_s0 + $0x440] ss:$172 sps:$4 sm:$0xff]   ;;  %v7734_v40 = vld [vmem:[%s10159_s1 + $0x470] sm:$0xff]  }
  0x85   :  { %4336 = vmatprep.mubr.bf16.mxu0 %v7664_v42  ;;  %4408 = vmatprep.mubr.bf16.mxu1 %v7667_v44  ;;  %v209_v42 = vld [vmem:[%s10160_s0 + $0x590] sm:$0xff] }
  0x86   :  { %6687 = vmatprep.subr.bf16.mxu0 %v7669_v45  ;;  %6732 = vmatpush3.bf16.msra.mxu1 %v7673_v49  ;;  %v7737_v44 = vld [vmem:[%s10159_s1 + $0x430] sm:$0xff]   ;;  %v6007_v45 = vcombine.low %v209_v42, %v209_v42 }
  0x87   :  { %6733 = vmatprep.subr.bf16.mxu1 %v7675_v51  ;;  %v7743_v51 = vld [vmem:[%s10159_s1 + $0x478] sm:$0xff]  }
  0x88   :  { %6688 = vmatpush3.bf16.msra.mxu0 %v7672_v48 }
  0x89   :  { %6689 = vmatprep.subr.bf16.mxu0 %v7674_v50  ;;  %v7742_v50 = vld [vmem:[%s10159_s1 + $0x4f0] sm:$0xff]  }
  0x8a   :  { %6734 = vmatpush3.bf16.msra.mxu1 %v7678_v56  ;;  %v7749_v56 = vld [vmem:[%s10160_s0 + $0x44] ss:$172 sps:$4 sm:$0xff]  }
  0x8b   :  { %4337 = vmatmul.mubr.bf16.gmra.mrb[52].mxu0 %v7666_v43  ;;  %6735 = vmatprep.subr.bf16.mxu1 %v7682_v60  ;;  %v6008_v43 = vcombine.high %v209_v42, %v209_v42  ;;  %v7754_v60 = vld [vmem:[%s10160_s0 + $0x4c] ss:$172 sps:$4 sm:$0xff]   ;;  %v7804_v42 = vld [vmem:[%s10159_s1 + $0x5b0] sm:$0xff]  }
  0x8c   :  { %4409 = vmatmul.mubr.bf16.gmra.mrb[52].mxu1 %v7671_v47  ;;  %4344 = vmatprep.mubr.bf16.mxu0 %v6004_v53  ;;  %v210_v47 = vld [vmem:[%s10160_s0 + $0x598] sm:$0xff] }
  0x8d   :  { %6690 = vmatpush3.bf16.msra.mxu0 %v7677_v54  ;;  %4416 = vmatprep.mubr.bf16.mxu1 %v6006_v58  ;;  %v6010_v48 = vcombine.high %v210_v47, %v210_v47  ;;  %v6009_v49 = vcombine.low %v210_v47, %v210_v47  ;;  %v7745_v53 = vld [vmem:[%s10159_s1 + $0x438] sm:$0xff]   ;;  %v7751_v58 = vld [vmem:[%s10159_s1 + $0x540] sm:$0xff]  }
  0x8e   :  { %6691 = vmatprep.subr.bf16.mxu0 %v7683_v61  ;;  %6736 = vmatpush3.bf16.msra.mxu1 %v7684_v62  ;;  %v7746_v54 = vld [vmem:[%s10159_s1 + $0x4f8] sm:$0xff]   ;;  %v7755_v61 = vld [vmem:[%s10159_s1 + $0x500] sm:$0xff]   ;;  %v7756_v62 = vld [vmem:[%s10159_s1 + $0x548] sm:$0xff]  }
  0x8f   :  { %6737 = vmatprep.subr.bf16.mxu1 %v7686_v0  ;;  %v7758_v0 = vld [vmem:[%s10159_s1 + $0x508] sm:$0xff]   ;;  %v7809_v47 = vld [vmem:[%s10160_s0 + $0x54] ss:$172 sps:$4 sm:$0xff]  }
  0x91   :  { %6692 = vmatpush3.bf16.msra.mxu0 %v7685_v63  ;;  %v7757_v63 = vld [vmem:[%s10159_s1 + $0x5c0] sm:$0xff]  }
  0x92   :  { %6738 = vmatpush3.bf16.msra.mxu1 %v7690_v3  ;;  %6769 = vmatprep.subr.bf16.mxu0 %v7691_v4  ;;  %v7762_v3 = vld [vmem:[%s10160_s0 + $0x198] ss:$172 sps:$4 sm:$0xff]  }
  0x93   :  { %4345 = vmatmul.mubr.bf16.gmra.mrb[56].mxu0 %v6003_v55  ;;  %6815 = vmatprep.subr.bf16.mxu1 %v7697_v9  ;;  %v7747_v55 = vld [vmem:[%s10160_s0 + $0x40] ss:$172 sps:$4 sm:$0xff]   ;;  %v7763_v4 = vld [vmem:[%s10160_s0 + $0x1a4] ss:$172 sps:$4 sm:$0xff]  }
  0x94   :  { %4417 = vmatmul.mubr.bf16.gmra.mrb[56].mxu1 %v6005_v59  ;;  %4456 = vmatprep.mubr.bf16.mxu0 %v7689_v2  ;;  %v7752_v59 = vld [vmem:[%s10160_s0 + $0x48] ss:$172 sps:$4 sm:$0xff]  }
  0x95   :  { %4528 = vmatprep.mubr.bf16.mxu1 %v7694_v6  ;;  %v7760_v2 = vld [vmem:[%s10160_s0 + $0x19c] ss:$172 sps:$4 sm:$0xff]   ;;  %v7766_v6 = vld [vmem:[%s10159_s1 + $0x550] sm:$0xff]  }
  0x96   :  { %v7769_v9 = vld [vmem:[%s10159_s1 + $0x588] sm:$0xff]  }
  0x9b   :  { %4457 = vmatmul.mubr.bf16.vlgmr.msra.gmra.mrb[60].mxu0 %v7687_v1  ;;  %v7759_v1 = vld [vmem:[%s10159_s1 + $0x580] sm:$0xff]  }
  0x9c   :  { %6770 = vmatpush3.bf16.msra.mxu0 %v7695_v7  ;;  %4529 = vmatmul.mubr.bf16.vlgmr.msra.gmra.mrb[60].mxu1 %v7692_v5  ;;  %v7765_v5 = vld [vmem:[%s10160_s0 + $0x1a0] ss:$172 sps:$4 sm:$0xff]  }
  0x9d   :  { %6771 = vmatprep.subr.bf16.mxu0 %v7696_v8  ;;  %6816 = vmatpush3.bf16.msra.mxu1 %v7699_v11  ;;  %v7767_v7 = vld [vmem:[%s10159_s1 + $0x5c8] sm:$0xff]   ;;  %v7768_v8 = vld [vmem:[%s10159_s1 + $0x510] sm:$0xff]   ;;  %v7772_v11 = vld [vmem:[%s10159_s1 + $0x558] sm:$0xff]  }
  0x9e   :  { %4464 = vmatprep.mubr.bf16.mxu0 %v7700_v12  ;;  %4536 = vmatprep.mubr.bf16.mxu1 %v7703_v14  ;;  %v7773_v12 = vld [vmem:[%s10159_s1 + $0x5d0] sm:$0xff]   ;;  %v7775_v14 = vld [vmem:[%s10159_s1 + $0x518] sm:$0xff]  }
  0x9f   :  { %6817 = vmatprep.subr.bf16.mxu1 %v7707_v17  ;;  %v7779_v17 = vld [vmem:[%s10160_s0 + $0x2f8] ss:$172 sps:$4 sm:$0xff]  }
  0xa0   :  { %6772 = vmatpush3.bf16.msra.mxu0 %v7698_v10  ;;  %v7770_v10 = vld [vmem:[%s10160_s0 + $0x2f4] ss:$172 sps:$4 sm:$0xff]  }
  0xa1   :  { %6773 = vmatprep.subr.bf16.mxu0 %v7706_v16  ;;  %6818 = vmatpush3.bf16.msra.mxu1 %v7709_v19  ;;  %v7777_v16 = vld [vmem:[%s10160_s0 + $0x2fc] ss:$172 sps:$4 sm:$0xff]  }
  0xa2   :  { %6819 = vmatprep.subr.bf16.mxu1 %v7713_v22  ;;  %v7781_v19 = vld [vmem:[%s10159_s1 + $0x5d8] sm:$0xff]  }
  0xa3   :  { %4465 = vmatmul.mubr.bf16.gmra.mrb[64].mxu0 %v7702_v13  ;;  %v7774_v13 = vld [vmem:[%s10160_s0 + $0x2f0] ss:$172 sps:$4 sm:$0xff]   ;;  %v7784_v22 = vld [vmem:[%s10160_s0 + $0x44c] ss:$172 sps:$4 sm:$0xff]  }
  0xa4   :  { %4537 = vmatmul.mubr.bf16.gmra.mrb[64].mxu1 %v7705_v15  ;;  %6774 = vmatpush3.bf16.msra.mxu0 %v7708_v18  ;;  %v7776_v15 = vld [vmem:[%s10159_s1 + $0x590] sm:$0xff]   ;;  %v7780_v18 = vld [vmem:[%s10159_s1 + $0x560] sm:$0xff]  }
  0xa5   :  { %4472 = vmatprep.mubr.bf16.mxu0 %v7710_v20  ;;  %6775 = vmatprep.subr.bf16.mxu0 %v7712_v21  ;;  %v7782_v20 = vld [vmem:[%s10159_s1 + $0x520] sm:$0xff]   ;;  %v7783_v21 = vld [vmem:[%s10159_s1 + $0x598] sm:$0xff]  }
  0xa6   :  { %6820 = vmatpush3.bf16.msra.mxu1 %v7716_v25  ;;  %4544 = vmatprep.mubr.bf16.mxu1 %v7717_v26  ;;  %v7789_v25 = vld [vmem:[%s10159_s1 + $0x568] sm:$0xff]   ;;  %v7790_v26 = vld [vmem:[%s10159_s1 + $0x5e0] sm:$0xff]  }
  0xa7   :  { %6821 = vmatprep.subr.bf16.mxu1 %v7721_v29  ;;  %v7793_v29 = vld [vmem:[%s10159_s1 + $0x5a0] sm:$0xff]  }
  0xa8   :  { %6776 = vmatpush3.bf16.msra.mxu0 %v7715_v24  ;;  %v7787_v24 = vld [vmem:[%s10160_s0 + $0x454] ss:$172 sps:$4 sm:$0xff]  }
  0xa9   :  { %6777 = vmatprep.subr.bf16.mxu0 %v7720_v28  ;;  %v7792_v28 = vld [vmem:[%s10159_s1 + $0x528] sm:$0xff]  }
  0xaa   :  { %6822 = vmatpush3.bf16.msra.mxu1 %v7723_v31  ;;  %v7795_v31 = vld [vmem:[%s10159_s1 + $0x5e8] sm:$0xff]  }
  0xab   :  { %4473 = vmatmul.mubr.bf16.gmra.mrb[68].mxu0 %v7714_v23  ;;  %6823 = vmatprep.subr.bf16.mxu1 %v7730_v36  ;;  %v7786_v23 = vld [vmem:[%s10160_s0 + $0x448] ss:$172 sps:$4 sm:$0xff]  }
  0xac   :  { %4545 = vmatmul.mubr.bf16.gmra.mrb[68].mxu1 %v7719_v27  ;;  %6778 = vmatpush3.bf16.msra.mxu0 %v7722_v30  ;;  %v7791_v27 = vld [vmem:[%s10160_s0 + $0x450] ss:$172 sps:$4 sm:$0xff]   ;;  %v7798_v36 = vld [vmem:[%s10159_s1 + $0x5a8] sm:$0xff]  }
  0xad   :  { %4480 = vmatprep.mubr.bf16.mxu0 %v7724_v32  ;;  %4552 = vmatprep.mubr.bf16.mxu1 %v7727_v34  ;;  %v7794_v30 = vld [vmem:[%s10159_s1 + $0x570] sm:$0xff]   ;;  %v211_v32 = vld [vmem:[%s10160_s0 + $0x5a0] sm:$0xff] }
  0xae   :  { %6779 = vmatprep.subr.bf16.mxu0 %v7729_v35  ;;  %6824 = vmatpush3.bf16.msra.mxu1 %v7733_v39  ;;  %v7797_v34 = vld [vmem:[%s10159_s1 + $0x530] sm:$0xff]   ;;  %v6011_v35 = vcombine.low %v211_v32, %v211_v32 }
  0xaf   :  { %6825 = vmatprep.subr.bf16.mxu1 %v7735_v41  ;;  %v7803_v41 = vld [vmem:[%s10159_s1 + $0x578] sm:$0xff]  }
  0xb0   :  { %6780 = vmatpush3.bf16.msra.mxu0 %v7732_v38 }
  0xb1   :  { %6781 = vmatprep.subr.bf16.mxu0 %v7734_v40  ;;  %v7802_v40 = vld [vmem:[%s10159_s1 + $0x5f0] sm:$0xff]  }
  0xb2   :  { %6826 = vmatpush3.bf16.msra.mxu1 %v7738_v46  ;;  %v7807_v46 = vld [vmem:[%s10160_s0 + $0x50] ss:$172 sps:$4 sm:$0xff]  }
  0xb3   :  { %4481 = vmatmul.mubr.bf16.gmra.mrb[72].mxu0 %v7726_v33  ;;  %6827 = vmatprep.subr.bf16.mxu1 %v7742_v50  ;;  %v6012_v33 = vcombine.high %v211_v32, %v211_v32  ;;  %v7833_v32 = vld [vmem:[%s10159_s1 + $0x6d0] sm:$0xff]  }
  0xb4   :  { %4553 = vmatmul.mubr.bf16.gmra.mrb[72].mxu1 %v7731_v37  ;;  %4488 = vmatprep.mubr.bf16.mxu0 %v6008_v43  ;;  %v212_v37 = vld [vmem:[%s10160_s0 + $0x5a8] sm:$0xff]  ;;  %v7805_v43 = vld [vmem:[%s10159_s1 + $0x538] sm:$0xff]  }
  0xb5   :  { %6782 = vmatpush3.bf16.msra.mxu0 %v7737_v44  ;;  %4560 = vmatprep.mubr.bf16.mxu1 %v6010_v48  ;;  %v6014_v38 = vcombine.high %v212_v37, %v212_v37  ;;  %v6013_v39 = vcombine.low %v212_v37, %v212_v37  ;;  %v7806_v44 = vld [vmem:[%s10159_s1 + $0x5f8] sm:$0xff]  }
  0xb6   :  { %6783 = vmatprep.subr.bf16.mxu0 %v7743_v51  ;;  %6828 = vmatpush3.bf16.msra.mxu1 %v7744_v52  ;;  %v7811_v51 = vld [vmem:[%s10159_s1 + $0x640] sm:$0xff]  }
  0xb7   :  { %6829 = vmatprep.subr.bf16.mxu1 %v7746_v54  ;;  %v7812_v54 = vld [vmem:[%s10160_s0 + $0x58] ss:$172 sps:$4 sm:$0xff]  }
  0xb9   :  { %6784 = vmatpush3.bf16.msra.mxu0 %v7745_v53 }
  0xba   :  { %6830 = vmatpush3.bf16.msra.mxu1 %v7750_v57  ;;  %6861 = vmatprep.subr.bf16.mxu0 %v7751_v58  ;;  %v7814_v58 = vld [vmem:[%s10160_s0 + $0x5c] ss:$172 sps:$4 sm:$0xff]  }
  0xbb   :  { %4489 = vmatmul.mubr.bf16.gmra.mrb[76].mxu0 %v6007_v45  ;;  %6907 = vmatprep.subr.bf16.mxu1 %v7757_v63 }
  0xbc   :  { %4561 = vmatmul.mubr.bf16.gmra.mrb[76].mxu1 %v6009_v49  ;;  %4600 = vmatprep.mubr.bf16.mxu0 %v7749_v56  ;;  %v7810_v49 = vld [vmem:[%s10159_s1 + $0x5b8] sm:$0xff]  }
  0xbd   :  { %4672 = vmatprep.mubr.bf16.mxu1 %v7754_v60 }
  0xc3   :  { %4601 = vmatmul.mubr.bf16.vlgmr.msra.gmra.mrb[80].mxu0 %v7747_v55 }
  0xc4   :  { %6862 = vmatpush3.bf16.msra.mxu0 %v7755_v61  ;;  %4673 = vmatmul.mubr.bf16.vlgmr.msra.gmra.mrb[80].mxu1 %v7752_v59  ;;  %v7815_v59 = vld [vmem:[%s10159_s1 + $0x600] sm:$0xff]  }
  0xc5   :  { %6863 = vmatprep.subr.bf16.mxu0 %v7756_v62  ;;  %6908 = vmatpush3.bf16.msra.mxu1 %v7759_v1  ;;  %v7816_v62 = vld [vmem:[%s10159_s1 + $0x648] sm:$0xff]   ;;  %v7817_v1 = vld [vmem:[%s10159_s1 + $0x6c0] sm:$0xff]  }
  0xc6   :  { %4608 = vmatprep.mubr.bf16.mxu0 %v7760_v2  ;;  %4680 = vmatprep.mubr.bf16.mxu1 %v7763_v4  ;;  %v7818_v4 = vld [vmem:[%s10159_s1 + $0x608] sm:$0xff]  }
  0xc7   :  { %6909 = vmatprep.subr.bf16.mxu1 %v7767_v7 }
  0xc8   :  { %6864 = vmatpush3.bf16.msra.mxu0 %v7758_v0 }
  0xc9   :  { %6865 = vmatprep.subr.bf16.mxu0 %v7766_v6  ;;  %6910 = vmatpush3.bf16.msra.mxu1 %v7769_v9  ;;  %v7819_v6 = vld [vmem:[%s10159_s1 + $0x680] sm:$0xff]  }
  0xca   :  { %6911 = vmatprep.subr.bf16.mxu1 %v7773_v12 }
  0xcb   :  { %4609 = vmatmul.mubr.bf16.gmra.mrb[84].mxu0 %v7762_v3 }
  0xcc   :  { %4681 = vmatmul.mubr.bf16.gmra.mrb[84].mxu1 %v7765_v5  ;;  %6866 = vmatpush3.bf16.msra.mxu0 %v7768_v8 }
  0xcd   :  { %4616 = vmatprep.mubr.bf16.mxu0 %v7770_v10  ;;  %6867 = vmatprep.subr.bf16.mxu0 %v7772_v11  ;;  %v7820_v10 = vld [vmem:[%s10160_s0 + $0x1ac] ss:$172 sps:$4 sm:$0xff]   ;;  %v7822_v11 = vld [vmem:[%s10160_s0 + $0x1a8] ss:$172 sps:$4 sm:$0xff]  }
  0xce   :  { %6912 = vmatpush3.bf16.msra.mxu1 %v7776_v15  ;;  %4688 = vmatprep.mubr.bf16.mxu1 %v7777_v16  ;;  %v7823_v15 = vld [vmem:[%s10160_s0 + $0x1b4] ss:$172 sps:$4 sm:$0xff]   ;;  %v7825_v16 = vld [vmem:[%s10160_s0 + $0x1b0] ss:$172 sps:$4 sm:$0xff]  }
  0xcf   :  { %6913 = vmatprep.subr.bf16.mxu1 %v7781_v19 }
  0xd0   :  { %6868 = vmatpush3.bf16.msra.mxu0 %v7775_v14 }
  0xd1   :  { %6869 = vmatprep.subr.bf16.mxu0 %v7780_v18  ;;  %v7826_v18 = vld [vmem:[%s10159_s1 + $0x650] sm:$0xff]  }
  0xd2   :  { %6914 = vmatpush3.bf16.msra.mxu1 %v7783_v21  ;;  %v7827_v21 = vld [vmem:[%s10159_s1 + $0x6c8] sm:$0xff]  }
  0xd3   :  { %4617 = vmatmul.mubr.bf16.gmra.mrb[88].mxu0 %v7774_v13  ;;  %6915 = vmatprep.subr.bf16.mxu1 %v7790_v26  ;;  %v7829_v26 = vld [vmem:[%s10159_s1 + $0x688] sm:$0xff]  }
  0xd4   :  { %4689 = vmatmul.mubr.bf16.gmra.mrb[88].mxu1 %v7779_v17  ;;  %6870 = vmatpush3.bf16.msra.mxu0 %v7782_v20 }
  0xd5   :  { %4624 = vmatprep.mubr.bf16.mxu0 %v7784_v22  ;;  %4696 = vmatprep.mubr.bf16.mxu1 %v7787_v24  ;;  %v7828_v24 = vld [vmem:[%s10159_s1 + $0x610] sm:$0xff]  }
  0xd6   :  { %6871 = vmatprep.subr.bf16.mxu0 %v7789_v25  ;;  %6916 = vmatpush3.bf16.msra.mxu1 %v7793_v29 }
  0xd7   :  { %6917 = vmatprep.subr.bf16.mxu1 %v7795_v31 }
  0xd8   :  { %6872 = vmatpush3.bf16.msra.mxu0 %v7792_v28 }
  0xd9   :  { %6873 = vmatprep.subr.bf16.mxu0 %v7794_v30  ;;  %v7832_v30 = vld [vmem:[%s10159_s1 + $0x658] sm:$0xff]  }
  0xda   :  { %6918 = vmatpush3.bf16.msra.mxu1 %v7798_v36  ;;  %v7835_v36 = vld [vmem:[%s10159_s1 + $0x618] sm:$0xff]  }
  0xdb   :  { %4625 = vmatmul.mubr.bf16.gmra.mrb[92].mxu0 %v7786_v23  ;;  %6919 = vmatprep.subr.bf16.mxu1 %v7802_v40 }
  0xdc   :  { %4697 = vmatmul.mubr.bf16.gmra.mrb[92].mxu1 %v7791_v27  ;;  %4632 = vmatprep.mubr.bf16.mxu0 %v6012_v33  ;;  %v7830_v27 = vld [vmem:[%s10160_s0 + $0x304] ss:$172 sps:$4 sm:$0xff]  }
  0xdd   :  { %6874 = vmatpush3.bf16.msra.mxu0 %v7797_v34  ;;  %4704 = vmatprep.mubr.bf16.mxu1 %v6014_v38  ;;  %v7834_v34 = vld [vmem:[%s10160_s0 + $0x300] ss:$172 sps:$4 sm:$0xff]   ;;  %v7836_v38 = vld [vmem:[%s10159_s1 + $0x690] sm:$0xff]  }
  0xde   :  { %6875 = vmatprep.subr.bf16.mxu0 %v7803_v41  ;;  %6920 = vmatpush3.bf16.msra.mxu1 %v7804_v42  ;;  %v7837_v42 = vld [vmem:[%s10160_s0 + $0x30c] ss:$172 sps:$4 sm:$0xff]  }
  0xdf   :  { %6921 = vmatprep.subr.bf16.mxu1 %v7806_v44  ;;  %v7840_v44 = vld [vmem:[%s10159_s1 + $0x660] sm:$0xff]  }
  0xe1   :  { %6876 = vmatpush3.bf16.msra.mxu0 %v7805_v43  ;;  %v7839_v43 = vld [vmem:[%s10160_s0 + $0x308] ss:$172 sps:$4 sm:$0xff]  }
  0xe2   :  { %6922 = vmatpush3.bf16.msra.mxu1 %v7810_v49  ;;  %6953 = vmatprep.subr.bf16.mxu0 %v7811_v51 }
  0xe3   :  { %4633 = vmatmul.mubr.bf16.gmra.mrb[96].mxu0 %v6011_v35  ;;  %6999 = vmatprep.subr.bf16.mxu1 %v7817_v1 }
  0xe4   :  { %4705 = vmatmul.mubr.bf16.gmra.mrb[96].mxu1 %v6013_v39  ;;  %4744 = vmatprep.mubr.bf16.mxu0 %v7809_v47  ;;  %v7841_v47 = vld [vmem:[%s10159_s1 + $0x6d8] sm:$0xff]  }
  0xe5   :  { %4816 = vmatprep.mubr.bf16.mxu1 %v7814_v58 }
  0xeb   :  { %4745 = vmatmul.mubr.bf16.vlgmr.msra.gmra.mrb[100].mxu0 %v7807_v46 }
  0xec   :  { %6954 = vmatpush3.bf16.msra.mxu0 %v7815_v59  ;;  %4817 = vmatmul.mubr.bf16.vlgmr.msra.gmra.mrb[100].mxu1 %v7812_v54 }
  0xed   :  { %6955 = vmatprep.subr.bf16.mxu0 %v7816_v62  ;;  %7000 = vmatpush3.bf16.msra.mxu1 %v7819_v6  ;;  %v7847_v62 = vld [vmem:[%s10160_s0 + $0x464] ss:$172 sps:$4 sm:$0xff]  }
  0xee   :  { %4752 = vmatprep.mubr.bf16.mxu0 %v7820_v10  ;;  %4824 = vmatprep.mubr.bf16.mxu1 %v7823_v15 }
  0xef   :  { %7001 = vmatprep.subr.bf16.mxu1 %v7827_v21 }
  0xf0   :  { %6956 = vmatpush3.bf16.msra.mxu0 %v7818_v4  ;;  %v7850_v4 = vld [vmem:[%s10159_s1 + $0x6e0] sm:$0xff]  }
  0xf1   :  { %6957 = vmatprep.subr.bf16.mxu0 %v7826_v18  ;;  %7002 = vmatpush3.bf16.msra.mxu1 %v7829_v26  ;;  %v7858_v26 = vld [vmem:[%s10159_s1 + $0x6a8] sm:$0xff]  }
  0xf2   :  { %7003 = vmatprep.subr.bf16.mxu1 %v7833_v32 }
  0xf3   :  { %4753 = vmatmul.mubr.bf16.gmra.mrb[104].mxu0 %v7822_v11  ;;  %v7852_v11 = vld [vmem:[%s10159_s1 + $0x628] sm:$0xff]  }
  0xf4   :  { %4825 = vmatmul.mubr.bf16.gmra.mrb[104].mxu1 %v7825_v16  ;;  %6958 = vmatpush3.bf16.msra.mxu0 %v7828_v24  ;;  %v7855_v16 = vld [vmem:[%s10159_s1 + $0x6e8] sm:$0xff]  }
  0xf5   :  { %4760 = vmatprep.mubr.bf16.mxu0 %v7830_v27  ;;  %6959 = vmatprep.subr.bf16.mxu0 %v7832_v30  ;;  %v214_v27 = vld [vmem:[%s10160_s0 + $0x5b8] sm:$0xff] }
  0xf6   :  { %v6417_v45 = vpop.f32.mrb[0].mxu0  ;;  %7004 = vmatpush3.bf16.msra.mxu1 %v7836_v38  ;;  %4832 = vmatprep.mubr.bf16.mxu1 %v7837_v42  ;;  %v6018_v32 = vcombine.high %v214_v27, %v214_v27 }
  0xf7   :  { %v6463_v48 = vpop.f32.mrb[0].mxu1  ;;  %v6418_v50 = vpop.f32.mrb[1].mxu0  ;;  %7005 = vmatprep.subr.bf16.mxu1 %v7841_v47 }
  0xf8   :  { %v6419_v52 = vadd.f32 %v6418_v50, %v6417_v45  ;;  %v6464_v53 = vpop.f32.mrb[1].mxu1  ;;  %v6420_v56 = vpop.f32.mrb[2].mxu0  ;;  %6960 = vmatpush3.bf16.msra.mxu0 %v7835_v36  ;;  %v7842_v50 = vld [vmem:[%s10159_s1 + $0x620] sm:$0xff]   ;;  %v7863_v36 = vld [vmem:[%s10159_s1 + $0x678] sm:$0xff]  }
  0xf9   :  { %v6465_v55 = vadd.f32 %v6464_v53, %v6463_v48  ;;  %v6466_v57 = vpop.f32.mrb[2].mxu1  ;;  %v6421_v61 = vpop.f32.mrb[3].mxu0  ;;  %6961 = vmatprep.subr.bf16.mxu0 %v7840_v44  ;;  %v7843_v53 = vld [vmem:[%s10159_s1 + $0x698] sm:$0xff]  }
  0xfa   :  { %v6422_v63 = vadd.f32 %v6421_v61, %v6420_v56  ;;  %v6467_v0 = vpop.f32.mrb[3].mxu1  ;;  %v7844_v56 = vld [vmem:[%s10160_s0 + $0x45c] ss:$172 sps:$4 sm:$0xff]   ;;  %7006 = vmatpush3.bf16.msra.mxu1 %v7843_v53 }
  0xfb   :  { %v9041_v60 = vadd.f32 %v6465_v55, %v6419_v52  ;;  %v6468_v2 = vadd.f32 %v6467_v0, %v6466_v57  ;;  %4761 = vmatmul.mubr.bf16.gmra.mrb[108].mxu0 %v7834_v34  ;;  %v7846_v57 = vld [vmem:[%s10160_s0 + $0x458] ss:$172 sps:$4 sm:$0xff]   ;;  %7007 = vmatprep.subr.bf16.mxu1 %v7850_v4  ;;  %v7862_v34 = vld [vmem:[%s10159_s1 + $0x6f0] sm:$0xff]  }
  0xfc   :  { %4833 = vmatmul.mubr.bf16.gmra.mrb[108].mxu1 %v7839_v43  ;;  %6962 = vmatpush3.bf16.msra.mxu0 %v7842_v50  ;;  %v7867_v43 = vld [vmem:[%s10160_s0 + $0x60] ss:$172 sps:$4 sm:$0xff]  }
  0xfd   :  { %v9055_v7 = vadd.f32 %v6468_v2, %v6422_v63  ;;  %4768 = vmatprep.mubr.bf16.mxu0 %v7844_v56  ;;  %v7849_v2 = vld [vmem:[%s10159_s1 + $0x668] sm:$0xff]   ;;  %4840 = vmatprep.mubr.bf16.mxu1 %v7847_v62  ;;  %v7871_v50 = vld [vmem:[%s10159_s1 + $0x740] sm:$0xff]  }
  0xfe   :  { %v6423_v3 = vpop.f32.mrb[4].mxu0  ;;  %6963 = vmatprep.subr.bf16.mxu0 %v7849_v2  ;;  %v7878_v2 = vld [vmem:[%s10159_s1 + $0x708] sm:$0xff]  }
  0xff   :  { %v6469_v5 = vpop.f32.mrb[4].mxu1  ;;  %v6424_v8 = vpop.f32.mrb[5].mxu0 }
 0x100   :  { %v6470_v9 = vpop.f32.mrb[5].mxu1  ;;  %v6425_v12 = vadd.f32 %v6424_v8, %v6423_v3  ;;  %v6426_v14 = vpop.f32.mrb[6].mxu0  ;;  %6964 = vmatpush3.bf16.msra.mxu0 %v7852_v11 }
 0x101   :  { %v6471_v13 = vadd.f32 %v6470_v9, %v6469_v5  ;;  %v6472_v17 = vpop.f32.mrb[6].mxu1  ;;  %v6427_v20 = vpop.f32.mrb[7].mxu0  ;;  %v7851_v9 = vld [vmem:[%s10160_s0 + $0x460] ss:$172 sps:$4 sm:$0xff]  }
 0x102   :  { %v6428_v22 = vadd.f32 %v6427_v20, %v6426_v14  ;;  %v6473_v23 = vpop.f32.mrb[7].mxu1  ;;  %v7854_v14 = vld [vmem:[%s10159_s1 + $0x670] sm:$0xff]  }
 0x103   :  { %v9072_v19 = vadd.f32 %v6471_v13, %v6425_v12  ;;  %v6474_v25 = vadd.f32 %v6473_v23, %v6472_v17  ;;  %4769 = vmatmul.mubr.bf16.gmra.mrb[112].mxu0 %v7846_v57  ;;  %v7853_v12 = vld [vmem:[%s10159_s1 + $0x6a0] sm:$0xff]   ;;  %v213_v17 = vld [vmem:[%s10160_s0 + $0x5b0] sm:$0xff]  ;;  %6965 = vmatprep.subr.bf16.mxu0 %v7854_v14 }
 0x104   :  { %4841 = vmatmul.mubr.bf16.gmra.mrb[112].mxu1 %v7851_v9  ;;  %v6016_v21 = vcombine.high %v213_v17, %v213_v17  ;;  %v6015_v23 = vcombine.low %v213_v17, %v213_v17  ;;  %v7875_v57 = vld [vmem:[%s10159_s1 + $0x700] sm:$0xff]   ;;  %v7880_v9 = vld [vmem:[%s10160_s0 + $0x1bc] ss:$172 sps:$4 sm:$0xff]  }
 0x105   :  { %v9086_v28 = vadd.f32 %v6474_v25, %v6428_v22  ;;  %7008 = vmatpush3.bf16.msra.mxu1 %v7853_v12  ;;  %v7857_v22 = vld [vmem:[%s10159_s1 + $0x630] sm:$0xff]   ;;  %4848 = vmatprep.mubr.bf16.mxu1 %v6018_v32 }
 0x106   :  { %v6429_v29 = vpop.f32.mrb[8].mxu0  ;;  %7009 = vmatprep.subr.bf16.mxu1 %v7855_v16  ;;  %4776 = vmatprep.mubr.bf16.mxu0 %v6016_v21 }
 0x107   :  { %v6475_v31 = vpop.f32.mrb[8].mxu1  ;;  %v6430_v33 = vpop.f32.mrb[9].mxu0  ;;  %6966 = vmatpush3.bf16.msra.mxu0 %v7857_v22  ;;  %v7886_v22 = vld [vmem:[%s10159_s1 + $0x750] sm:$0xff]  }
 0x108   :  { %v6431_v35 = vadd.f32 %v6430_v33, %v6429_v29  ;;  %v6476_v37 = vpop.f32.mrb[9].mxu1  ;;  %v6432_v40 = vpop.f32.mrb[10].mxu0  ;;  %v6017_v33 = vcombine.low %v214_v27, %v214_v27  ;;  %6967 = vmatprep.subr.bf16.mxu0 %v7863_v36 }
 0x109   :  { %v6477_v39 = vadd.f32 %v6476_v37, %v6475_v31  ;;  %v6478_v41 = vpop.f32.mrb[10].mxu1  ;;  %v6433_v46 = vpop.f32.mrb[11].mxu0  ;;  %7010 = vmatpush3.bf16.msra.mxu1 %v7858_v26 }
 0x10a   :  { %v6434_v48 = vadd.f32 %v6433_v46, %v6432_v40  ;;  %v6479_v49 = vpop.f32.mrb[11].mxu1  ;;  %7011 = vmatprep.subr.bf16.mxu1 %v7862_v34  ;;  %v7865_v40 = vld [vmem:[%s10159_s1 + $0x638] sm:$0xff]   ;;  %v7869_v46 = vld [vmem:[%s10160_s0 + $0x64] ss:$172 sps:$4 sm:$0xff]  }
 0x10b   :  { %v9112_v45 = vadd.f32 %v6477_v39, %v6431_v35  ;;  %v6480_v51 = vadd.f32 %v6479_v49, %v6478_v41  ;;  %4777 = vmatmul.mubr.bf16.gmra.mrb[116].mxu0 %v6015_v23  ;;  %v7864_v39 = vld [vmem:[%s10159_s1 + $0x6b0] sm:$0xff]   ;;  %v7866_v41 = vld [vmem:[%s10159_s1 + $0x6f8] sm:$0xff]  }
 0x10c   :  { %4849 = vmatmul.mubr.bf16.gmra.mrb[116].mxu1 %v6017_v33  ;;  %6968 = vmatpush3.bf16.msra.mxu0 %v7865_v40  ;;  %v7892_v34 = vld [vmem:[%s10159_s1 + $0x758] sm:$0xff]  }
 0x10d   :  { %v9129_v58 = vadd.f32 %v6480_v51, %v6434_v48  ;;  %7012 = vmatpush3.bf16.msra.mxu1 %v7864_v39  ;;  %v7870_v48 = vld [vmem:[%s10159_s1 + $0x6b8] sm:$0xff]   ;;  %4888 = vmatprep.mubr.bf16.mxu0 %v7869_v46 }
 0x10e   :  { %v6435_v52 = vpop.f32.mrb[12].mxu0  ;;  %7013 = vmatprep.subr.bf16.mxu1 %v7866_v41  ;;  %7045 = vmatprep.subr.bf16.mxu0 %v7871_v50  ;;  %v7894_v39 = vld [vmem:[%s10160_s0 + $0x310] ss:$172 sps:$4 sm:$0xff]   ;;  %v7899_v50 = vld [vmem:[%s10160_s0 + $0x318] ss:$172 sps:$4 sm:$0xff]  }
 0x10f   :  { %v6481_v54 = vpop.f32.mrb[12].mxu1  ;;  %v6436_v55 = vpop.f32.mrb[13].mxu0 }
 0x110   :  { %v6437_v59 = vadd.f32 %v6436_v55, %v6435_v52  ;;  %v6482_v61 = vpop.f32.mrb[13].mxu1  ;;  %v6438_v0 = vpop.f32.mrb[14].mxu0  ;;  %v7874_v55 = vld [vmem:[%s10160_s0 + $0x6c] ss:$172 sps:$4 sm:$0xff]  }
 0x111   :  { %v6483_v63 = vadd.f32 %v6482_v61, %v6481_v54  ;;  %v6484_v1 = vpop.f32.mrb[14].mxu1  ;;  %v6439_v3 = vpop.f32.mrb[15].mxu0  ;;  %7014 = vmatpush3.bf16.msra.mxu1 %v7870_v48  ;;  %v7872_v54 = vld [vmem:[%s10160_s0 + $0x68] ss:$172 sps:$4 sm:$0xff]   ;;  %4960 = vmatprep.mubr.bf16.mxu1 %v7874_v55  ;;  %v7901_v55 = vld [vmem:[%s10159_s1 + $0x7d8] sm:$0xff]  }
 0x112   :  { %v6440_v6 = vadd.f32 %v6439_v3, %v6438_v0  ;;  %v6485_v8 = vpop.f32.mrb[15].mxu1  ;;  %v7877_v0 = vld [vmem:[%s10159_s1 + $0x7c0] sm:$0xff]  }
 0x113   :  { %v9140_v5 = vadd.f32 %v6483_v63, %v6437_v59  ;;  %v6486_v10 = vadd.f32 %v6485_v8, %v6484_v1  ;;  %4889 = vmatmul.mubr.bf16.vlgmr.msra.gmra.mrb[120].mxu0 %v7867_v43  ;;  %7091 = vmatprep.subr.bf16.mxu1 %v7877_v0 }
 0x114   :  { %7046 = vmatpush3.bf16.msra.mxu0 %v7875_v57  ;;  %4961 = vmatmul.mubr.bf16.vlgmr.msra.gmra.mrb[120].mxu1 %v7872_v54  ;;  %v7900_v54 = vld [vmem:[%s10159_s1 + $0x760] sm:$0xff]  }
 0x115   :  { %v9151_v13 = vadd.f32 %v6486_v10, %v6440_v6  ;;  %v7882_v10 = vld [vmem:[%s10160_s0 + $0x1b8] ss:$172 sps:$4 sm:$0xff]   ;;  %4896 = vmatprep.mubr.bf16.mxu0 %v7880_v9  ;;  %v7907_v9 = vld [vmem:[%s10160_s0 + $0x474] ss:$172 sps:$4 sm:$0xff]  }
 0x116   :  { %v6441_v15 = vpop.f32.mrb[16].mxu0 }
 0x117   :  { %v6487_v18 = vpop.f32.mrb[16].mxu1  ;;  %v6442_v20 = vpop.f32.mrb[17].mxu0 }
 0x118   :  { %v6443_v24 = vadd.f32 %v6442_v20, %v6441_v15  ;;  %v6488_v25 = vpop.f32.mrb[17].mxu1  ;;  %v6444_v30 = vpop.f32.mrb[18].mxu0  ;;  %v7883_v15 = vld [vmem:[%s10160_s0 + $0x1c4] ss:$172 sps:$4 sm:$0xff]  }
 0x119   :  { %v6489_v29 = vadd.f32 %v6488_v25, %v6487_v18  ;;  %v6490_v31 = vpop.f32.mrb[18].mxu1  ;;  %v6445_v35 = vpop.f32.mrb[19].mxu0  ;;  %v7885_v18 = vld [vmem:[%s10160_s0 + $0x1c0] ss:$172 sps:$4 sm:$0xff]   ;;  %4968 = vmatprep.mubr.bf16.mxu1 %v7883_v15 }
 0x11a   :  { %v6491_v38 = vpop.f32.mrb[19].mxu1  ;;  %v7889_v30 = vld [vmem:[%s10159_s1 + $0x788] sm:$0xff]  }
 0x11b   :  { %v9177_v37 = vadd.f32 %v6489_v29, %v6443_v24  ;;  %4897 = vmatmul.mubr.bf16.gmra.mrb[124].mxu0 %v7882_v10  ;;  %v7887_v24 = vld [vmem:[%s10159_s1 + $0x7c8] sm:$0xff]   ;;  %v7893_v38 = vld [vmem:[%s10159_s1 + $0x7d0] sm:$0xff]  }
 0x11c   :  { %4969 = vmatmul.mubr.bf16.gmra.mrb[124].mxu1 %v7885_v18  ;;  %v7909_v15 = vld [vmem:[%s10159_s1 + $0x768] sm:$0xff]   ;;  %v7911_v18 = vld [vmem:[%s10160_s0 + $0x470] ss:$172 sps:$4 sm:$0xff]  }
 0x11e   :  { %v6509_v42 = vpop.f32.mrb[20].mxu0 }
 0x11f   :  { %v6510_v44 = vpop.f32.mrb[21].mxu0  ;;  %v6555_v52 = vpop.f32.mrb[20].mxu1 }
 0x120   :  { %v6511_v47 = vadd.f32 %v6510_v44, %v6509_v42  ;;  %v6512_v49 = vpop.f32.mrb[22].mxu0  ;;  %v6556_v59 = vpop.f32.mrb[21].mxu1  ;;  %v7895_v42 = vld [vmem:[%s10159_s1 + $0x718] sm:$0xff]   ;;  %v7896_v44 = vld [vmem:[%s10159_s1 + $0x790] sm:$0xff]  }
 0x121   :  { %v6513_v53 = vpop.f32.mrb[23].mxu0  ;;  %v6557_v62 = vadd.f32 %v6556_v59, %v6555_v52  ;;  %v6558_v63 = vpop.f32.mrb[22].mxu1 }
 0x122   :  { %v4171_v51 = vadd.f32 %v6511_v47, %v9041_v60  ;;  %v6514_v56 = vadd.f32 %v6513_v53, %v6512_v49  ;;  %v7876_v60 = vld [vmem:[%s10159_s1 + $0x748] sm:$0xff]   ;;  %v6559_v1 = vpop.f32.mrb[23].mxu1 }
 0x123   :  { %7047 = vmatprep.subr.bf16.mxu0 %v7876_v60  ;;  %v6560_v4 = vadd.f32 %v6559_v1, %v6558_v63  ;;  %v7897_v49 = vld [vmem:[%s10160_s0 + $0x31c] ss:$172 sps:$4 sm:$0xff]   ;;  %v7902_v60 = vld [vmem:[%s10159_s1 + $0x720] sm:$0xff]  }
 0x124   :  { %v4174_v61 = vadd.f32 %v6514_v56, %v9055_v7  ;;  %v9220_v3 = vadd.f32 %v6557_v62, %v4171_v51  ;;  %v7879_v7 = vld [vmem:[%s10159_s1 + $0x780] sm:$0xff]   ;;  %7048 = vmatpush3.bf16.msra.mxu0 %v7878_v2  ;;  %4976 = vmatprep.mubr.bf16.mxu1 %v7897_v49  ;;  %v7903_v62 = vld [vmem:[%s10159_s1 + $0x798] sm:$0xff]  }
 0x125   :  { %7092 = vmatpush3.bf16.msra.mxu1 %v7879_v7  ;;  %7049 = vmatprep.subr.bf16.mxu0 %v7886_v22  ;;  %v7912_v22 = vld [vmem:[%s10159_s1 + $0x728] sm:$0xff]  }
 0x126   :  { %v6515_v6 = vpop.f32.mrb[24].mxu0  ;;  %v9231_v11 = vadd.f32 %v6560_v4, %v4174_v61  ;;  %7093 = vmatprep.subr.bf16.mxu1 %v7887_v24  ;;  %4977 = vmatmul.mubr.bf16.gmra.mrb[128].mxu1 %v7899_v50  ;;  %v7913_v24 = vld [vmem:[%s10159_s1 + $0x7a0] sm:$0xff]  }
 0x127   :  { %v6516_v8 = vpop.f32.mrb[25].mxu0  ;;  %v6561_v16 = vpop.f32.mrb[24].mxu1  ;;  %4984 = vmatprep.mubr.bf16.mxu1 %v7907_v9 }
 0x128   :  { %v6517_v12 = vadd.f32 %v6516_v8, %v6515_v6  ;;  %v6518_v14 = vpop.f32.mrb[26].mxu0  ;;  %v6562_v23 = vpop.f32.mrb[25].mxu1  ;;  %v7906_v6 = vld [vmem:[%s10160_s0 + $0x468] ss:$172 sps:$4 sm:$0xff]  }
 0x129   :  { %v6519_v17 = vpop.f32.mrb[27].mxu0  ;;  %v6563_v26 = vadd.f32 %v6562_v23, %v6561_v16  ;;  %v6564_v27 = vpop.f32.mrb[26].mxu1  ;;  %7094 = vmatpush3.bf16.msra.mxu1 %v7889_v30 }
 0x12a   :  { %v4179_v20 = vadd.f32 %v6517_v12, %v9072_v19  ;;  %v6520_v21 = vadd.f32 %v6519_v17, %v6518_v14  ;;  %v7888_v19 = vld [vmem:[%s10159_s1 + $0x710] sm:$0xff]   ;;  %v6565_v29 = vpop.f32.mrb[27].mxu1  ;;  %7095 = vmatprep.subr.bf16.mxu1 %v7893_v38  ;;  %v7910_v17 = vld [vmem:[%s10159_s1 + $0x7e0] sm:$0xff]  }
 0x12b   :  { %v6566_v32 = vadd.f32 %v6565_v29, %v6564_v27  ;;  %7050 = vmatpush3.bf16.msra.mxu0 %v7888_v19  ;;  %v7915_v27 = vld [vmem:[%s10159_s1 + $0x7e8] sm:$0xff]   ;;  %v215_v19 = vld [vmem:[%s10160_s0 + $0x5c0] sm:$0xff] }
 0x12c   :  { %v4182_v25 = vadd.f32 %v6520_v21, %v9086_v28  ;;  %v9253_v31 = vadd.f32 %v6563_v26, %v4179_v20  ;;  %v7890_v28 = vld [vmem:[%s10160_s0 + $0x314] ss:$172 sps:$4 sm:$0xff]   ;;  %7051 = vmatprep.subr.bf16.mxu0 %v7892_v34  ;;  %v6020_v30 = vcombine.high %v215_v19, %v215_v19 }
 0x12d   :  { %4904 = vmatprep.mubr.bf16.mxu0 %v7890_v28  ;;  %7096 = vmatpush3.bf16.msra.mxu1 %v7896_v44  ;;  %v7922_v44 = vld [vmem:[%s10159_s1 + $0x7f0] sm:$0xff]  }
 0x12e   :  { %v6521_v33 = vpop.f32.mrb[28].mxu0  ;;  %v9261_v35 = vadd.f32 %v6566_v32, %v4182_v25  ;;  %4905 = vmatmul.mubr.bf16.gmra.mrb[128].mxu0 %v7894_v39  ;;  %7097 = vmatprep.subr.bf16.mxu1 %v7901_v55  ;;  %v7917_v32 = vld [vmem:[%s10159_s1 + $0x730] sm:$0xff]   ;;  %v216_v39 = vld [vmem:[%s10160_s0 + $0x5c8] sm:$0xff] }
 0x12f   :  { %v6522_v36 = vpop.f32.mrb[29].mxu0  ;;  %v6567_v43 = vpop.f32.mrb[28].mxu1  ;;  %7052 = vmatpush3.bf16.msra.mxu0 %v7895_v42  ;;  %4985 = vmatmul.mubr.bf16.gmra.mrb[132].mxu1 %v7911_v18  ;;  %v6022_v42 = vcombine.high %v216_v39, %v216_v39  ;;  %v7927_v55 = vld [vmem:[%s10160_s0 + $0x70] ss:$172 sps:$4 sm:$0xff]   ;;  %v7938_v18 = vld [vmem:[%s10159_s1 + $0x808] sm:$0xff]  }
 0x130   :  { %v6523_v40 = vadd.f32 %v6522_v36, %v6521_v33  ;;  %v6524_v41 = vpop.f32.mrb[30].mxu0  ;;  %v6568_v48 = vpop.f32.mrb[29].mxu1  ;;  %7053 = vmatprep.subr.bf16.mxu0 %v7900_v54  ;;  %v6019_v33 = vcombine.low %v215_v19, %v215_v19  ;;  %v7918_v36 = vld [vmem:[%s10159_s1 + $0x7a8] sm:$0xff]   ;;  %v7926_v54 = vld [vmem:[%s10159_s1 + $0x7f8] sm:$0xff]  }
 0x131   :  { %v6525_v47 = vpop.f32.mrb[31].mxu0  ;;  %v6569_v52 = vadd.f32 %v6568_v48, %v6567_v43  ;;  %v6570_v53 = vpop.f32.mrb[30].mxu1  ;;  %7098 = vmatpush3.bf16.msra.mxu1 %v7903_v62  ;;  %v6021_v43 = vcombine.low %v216_v39, %v216_v39  ;;  %4992 = vmatprep.mubr.bf16.mxu1 %v6022_v42  ;;  %v7931_v62 = vld [vmem:[%s10159_s1 + $0x840] sm:$0xff]   ;;  %v7947_v39 = vld [vmem:[%s10159_s1 + $0x8c8] sm:$0xff]  }
 0x132   :  { %v4187_v46 = vadd.f32 %v6523_v40, %v9112_v45  ;;  %v6526_v51 = vadd.f32 %v6525_v47, %v6524_v41  ;;  %v6571_v45 = vpop.f32.mrb[31].mxu1  ;;  %7099 = vmatprep.subr.bf16.mxu1 %v7910_v17  ;;  %v7923_v47 = vld [vmem:[%s10159_s1 + $0x778] sm:$0xff]  }
 0x133   :  { %v6572_v59 = vadd.f32 %v6571_v45, %v6570_v53  ;;  %7054 = vmatpush3.bf16.msra.mxu0 %v7902_v60  ;;  %v7930_v60 = vld [vmem:[%s10159_s1 + $0x7b8] sm:$0xff]  }
 0x134   :  { %v4190_v56 = vadd.f32 %v6526_v51, %v9129_v58  ;;  %v9289_v57 = vadd.f32 %v6569_v52, %v4187_v46  ;;  %v7904_v58 = vld [vmem:[%s10160_s0 + $0x46c] ss:$172 sps:$4 sm:$0xff]   ;;  %7055 = vmatprep.subr.bf16.mxu0 %v7909_v15  ;;  %v7937_v15 = vld [vmem:[%s10159_s1 + $0x8c0] sm:$0xff]  }
 0x135   :  { %4912 = vmatprep.mubr.bf16.mxu0 %v7904_v58  ;;  %7100 = vmatpush3.bf16.msra.mxu1 %v7913_v24  ;;  %v7925_v51 = vld [vmem:[%s10159_s1 + $0x738] sm:$0xff]  }
 0x136   :  { %v6527_v61 = vpop.f32.mrb[32].mxu0  ;;  %v9297_v63 = vadd.f32 %v6572_v59, %v4190_v56  ;;  %4913 = vmatmul.mubr.bf16.gmra.mrb[132].mxu0 %v7906_v6  ;;  %7101 = vmatprep.subr.bf16.mxu1 %v7915_v27  ;;  %v7929_v56 = vld [vmem:[%s10160_s0 + $0x74] ss:$172 sps:$4 sm:$0xff]  }
 0x137   :  { %v6528_v0 = vpop.f32.mrb[33].mxu0  ;;  %v6573_v4 = vpop.f32.mrb[32].mxu1  ;;  %7056 = vmatpush3.bf16.msra.mxu0 %v7912_v22  ;;  %4920 = vmatprep.mubr.bf16.mxu0 %v6020_v30  ;;  %v7942_v27 = vld [vmem:[%s10160_s0 + $0x1c8] ss:$172 sps:$4 sm:$0xff]  }
 0x138   :  { %v6529_v1 = vadd.f32 %v6528_v0, %v6527_v61  ;;  %v6530_v2 = vpop.f32.mrb[34].mxu0  ;;  %v6574_v8 = vpop.f32.mrb[33].mxu1  ;;  %4993 = vmatmul.mubr.bf16.gmra.mrb[136].mxu1 %v6021_v43  ;;  %v7943_v30 = vld [vmem:[%s10160_s0 + $0x1d4] ss:$172 sps:$4 sm:$0xff]  }
 0x139   :  { %v6531_v7 = vpop.f32.mrb[35].mxu0  ;;  %v6575_v14 = vadd.f32 %v6574_v8, %v6573_v4  ;;  %v6576_v16 = vpop.f32.mrb[34].mxu1  ;;  %7102 = vmatpush3.bf16.msra.mxu1 %v7918_v36  ;;  %v7934_v4 = vld [vmem:[%s10160_s0 + $0x7c] ss:$172 sps:$4 sm:$0xff]   ;;  %v7935_v8 = vld [vmem:[%s10159_s1 + $0x800] sm:$0xff]   ;;  %v7946_v36 = vld [vmem:[%s10159_s1 + $0x850] sm:$0xff]  }
 0x13a   :  { %v4195_v10 = vadd.f32 %v6529_v1, %v9140_v5  ;;  %v6532_v12 = vadd.f32 %v6531_v7, %v6530_v2  ;;  %v6577_v21 = vpop.f32.mrb[35].mxu1  ;;  %7103 = vmatprep.subr.bf16.mxu1 %v7922_v44  ;;  %v7932_v2 = vld [vmem:[%s10160_s0 + $0x78] ss:$172 sps:$4 sm:$0xff]   ;;  %5104 = vmatprep.mubr.bf16.mxu1 %v7934_v4  ;;  %v7949_v44 = vld [vmem:[%s10159_s1 + $0x888] sm:$0xff]  }
 0x13b   :  { %v6578_v23 = vadd.f32 %v6577_v21, %v6576_v16 }
 0x13c   :  { %v4198_v20 = vadd.f32 %v6532_v12, %v9151_v13  ;;  %v9319_v5 = vadd.f32 %v6575_v14, %v4195_v10  ;;  %v7914_v13 = vld [vmem:[%s10159_s1 + $0x770] sm:$0xff]   ;;  %v7936_v10 = vld [vmem:[%s10159_s1 + $0x848] sm:$0xff]  }
 0x13d   :  { %7057 = vmatprep.subr.bf16.mxu0 %v7914_v13 }
 0x13e   :  { %v9330_v25 = vadd.f32 %v6578_v23, %v4198_v20  ;;  %v6533_v26 = vpop.f32.mrb[36].mxu0  ;;  %7058 = vmatpush3.bf16.msra.mxu0 %v7917_v32  ;;  %v7940_v23 = vld [vmem:[%s10160_s0 + $0x1cc] ss:$172 sps:$4 sm:$0xff]   ;;  %v7945_v32 = vld [vmem:[%s10160_s0 + $0x1d0] ss:$172 sps:$4 sm:$0xff]  }
 0x13f   :  { %v6534_v29 = vpop.f32.mrb[37].mxu0  ;;  %v6579_v38 = vpop.f32.mrb[36].mxu1  ;;  %4921 = vmatmul.mubr.bf16.gmra.mrb[136].mxu0 %v6019_v33  ;;  %7059 = vmatprep.subr.bf16.mxu0 %v7923_v47 }
 0x140   :  { %v6535_v28 = vadd.f32 %v6534_v29, %v6533_v26  ;;  %v6536_v34 = vpop.f32.mrb[38].mxu0  ;;  %v6580_v46 = vpop.f32.mrb[37].mxu1  ;;  %5032 = vmatprep.mubr.bf16.mxu0 %v7929_v56 }
 0x141   :  { %v6537_v41 = vpop.f32.mrb[39].mxu0  ;;  %v6581_v48 = vadd.f32 %v6580_v46, %v6579_v38  ;;  %v6582_v49 = vpop.f32.mrb[38].mxu1 }
 0x142   :  { %v4203_v40 = vadd.f32 %v6535_v28, %v9177_v37  ;;  %v7924_v37 = vld [vmem:[%s10159_s1 + $0x7b0] sm:$0xff]   ;;  %v6583_v50 = vpop.f32.mrb[39].mxu1  ;;  %7060 = vmatpush3.bf16.msra.mxu0 %v7925_v51  ;;  %v7952_v49 = vld [vmem:[%s10159_s1 + $0x858] sm:$0xff]  }
 0x143   :  { %7104 = vmatpush3.bf16.msra.mxu1 %v7924_v37  ;;  %7137 = vmatprep.subr.bf16.mxu0 %v7931_v62  ;;  %v7953_v51 = vld [vmem:[%s10159_s1 + $0x8d0] sm:$0xff]   ;;  %v7957_v62 = vld [vmem:[%s10160_s0 + $0x32c] ss:$172 sps:$4 sm:$0xff]  }
 0x144   :  { %v9360_v52 = vadd.f32 %v6581_v48, %v4203_v40  ;;  %7105 = vmatprep.subr.bf16.mxu1 %v7926_v54 }
 0x146   :  { %v6601_v53 = vpop.f32.mrb[40].mxu0 }
 0x147   :  { %v6602_v45 = vpop.f32.mrb[41].mxu0  ;;  %v6647_v58 = vpop.f32.mrb[40].mxu1  ;;  %7106 = vmatpush3.bf16.msra.mxu1 %v7930_v60  ;;  %5033 = vmatmul.mubr.bf16.vlgmr.msra.gmra.mrb[140].mxu0 %v7927_v55  ;;  %v7956_v60 = vld [vmem:[%s10159_s1 + $0x890] sm:$0xff]  }
 0x148   :  { %v6603_v59 = vadd.f32 %v6602_v45, %v6601_v53  ;;  %v6604_v61 = vpop.f32.mrb[42].mxu0  ;;  %v6648_v7 = vpop.f32.mrb[41].mxu1  ;;  %7138 = vmatpush3.bf16.msra.mxu0 %v7935_v8  ;;  %7183 = vmatprep.subr.bf16.mxu1 %v7937_v15  ;;  %v7954_v53 = vld [vmem:[%s10160_s0 + $0x320] ss:$172 sps:$4 sm:$0xff]   ;;  %v7955_v45 = vld [vmem:[%s10159_s1 + $0x818] sm:$0xff]  }
 0x149   :  { %v6605_v1 = vpop.f32.mrb[43].mxu0  ;;  %v6650_v9 = vpop.f32.mrb[42].mxu1  ;;  %7139 = vmatprep.subr.bf16.mxu0 %v7936_v10  ;;  %5040 = vmatprep.mubr.bf16.mxu0 %v7940_v23  ;;  %v7963_v10 = vld [vmem:[%s10159_s1 + $0x898] sm:$0xff]  }
 0x14a   :  { %v4315_v0 = vadd.f32 %v6603_v59, %v9220_v3  ;;  %v6606_v6 = vadd.f32 %v6605_v1, %v6604_v61  ;;  %v6649_v3 = vadd.f32 %v6648_v7, %v6647_v58  ;;  %v6651_v14 = vpop.f32.mrb[43].mxu1  ;;  %5105 = vmatmul.mubr.bf16.vlgmr.msra.gmra.mrb[140].mxu1 %v7932_v2  ;;  %v7960_v2 = vld [vmem:[%s10159_s1 + $0x860] sm:$0xff]  }
 0x14b   :  { %v6652_v17 = vadd.f32 %v6651_v14, %v6650_v9  ;;  %5112 = vmatprep.mubr.bf16.mxu1 %v7943_v30  ;;  %v7972_v30 = vld [vmem:[%s10159_s1 + $0x828] sm:$0xff]  }
 0x14c   :  { %v4318_v12 = vadd.f32 %v6606_v6, %v9231_v11  ;;  %v9394_v16 = vadd.f32 %v6649_v3, %v4315_v0  ;;  %v7939_v11 = vld [vmem:[%s10159_s1 + $0x880] sm:$0xff]   ;;  %7140 = vmatpush3.bf16.msra.mxu0 %v7938_v18 }
 0x14d   :  { %7184 = vmatpush3.bf16.msra.mxu1 %v7939_v11  ;;  %7141 = vmatprep.subr.bf16.mxu0 %v7946_v36  ;;  %v7962_v3 = vld [vmem:[%s10159_s1 + $0x820] sm:$0xff]  }
 0x14e   :  { %v6607_v20 = vpop.f32.mrb[44].mxu0  ;;  %v9402_v21 = vadd.f32 %v6652_v17, %v4318_v12  ;;  %7185 = vmatprep.subr.bf16.mxu1 %v7947_v39  ;;  %v7964_v17 = vld [vmem:[%s10160_s0 + $0x47c] ss:$172 sps:$4 sm:$0xff]   ;;  %v7966_v18 = vld [vmem:[%s10160_s0 + $0x478] ss:$172 sps:$4 sm:$0xff]  }
 0x14f   :  { %v6608_v22 = vpop.f32.mrb[45].mxu0  ;;  %v6653_v26 = vpop.f32.mrb[44].mxu1  ;;  %5041 = vmatmul.mubr.bf16.gmra.mrb[144].mxu0 %v7942_v27  ;;  %v7967_v11 = vld [vmem:[%s10160_s0 + $0x484] ss:$172 sps:$4 sm:$0xff]  }
 0x150   :  { %v6609_v24 = vadd.f32 %v6608_v22, %v6607_v20  ;;  %v6610_v13 = vpop.f32.mrb[46].mxu0  ;;  %v6654_v29 = vpop.f32.mrb[45].mxu1  ;;  %v7970_v27 = vld [vmem:[%s10159_s1 + $0x8e0] sm:$0xff]  }
 0x151   :  { %v6611_v19 = vpop.f32.mrb[47].mxu0  ;;  %v6655_v34 = vadd.f32 %v6654_v29, %v6653_v26  ;;  %v6656_v38 = vpop.f32.mrb[46].mxu1  ;;  %7186 = vmatpush3.bf16.msra.mxu1 %v7949_v44 }
 0x152   :  { %v4323_v33 = vadd.f32 %v6609_v24, %v9253_v31  ;;  %v6612_v28 = vadd.f32 %v6611_v19, %v6610_v13  ;;  %v6657_v42 = vpop.f32.mrb[47].mxu1  ;;  %5113 = vmatmul.mubr.bf16.gmra.mrb[144].mxu1 %v7945_v32  ;;  %v7948_v31 = vld [vmem:[%s10159_s1 + $0x810] sm:$0xff]   ;;  %7187 = vmatprep.subr.bf16.mxu1 %v7953_v51  ;;  %v7969_v24 = vld [vmem:[%s10159_s1 + $0x868] sm:$0xff]  }
 0x153   :  { %v6658_v43 = vadd.f32 %v6657_v42, %v6656_v38  ;;  %7142 = vmatpush3.bf16.msra.mxu0 %v7948_v31  ;;  %5120 = vmatprep.mubr.bf16.mxu1 %v7957_v62  ;;  %v7971_v19 = vld [vmem:[%s10160_s0 + $0x480] ss:$172 sps:$4 sm:$0xff]   ;;  %v7974_v38 = vld [vmem:[%s10159_s1 + $0x870] sm:$0xff]  }
 0x154   :  { %v4326_v40 = vadd.f32 %v6612_v28, %v9261_v35  ;;  %v9424_v41 = vadd.f32 %v6655_v34, %v4323_v33  ;;  %v7950_v35 = vld [vmem:[%s10160_s0 + $0x324] ss:$172 sps:$4 sm:$0xff]   ;;  %7143 = vmatprep.subr.bf16.mxu0 %v7952_v49 }
 0x155   :  { %5048 = vmatprep.mubr.bf16.mxu0 %v7950_v35  ;;  %7188 = vmatpush3.bf16.msra.mxu1 %v7956_v60  ;;  %v7973_v28 = vld [vmem:[%s10159_s1 + $0x8a0] sm:$0xff]   ;;  %v217_v31 = vld [vmem:[%s10160_s0 + $0x5d0] sm:$0xff] }
 0x156   :  { %v6613_v46 = vpop.f32.mrb[48].mxu0  ;;  %v9435_v47 = vadd.f32 %v6658_v43, %v4326_v40  ;;  %v7977_v35 = vld [vmem:[%s10159_s1 + $0x830] sm:$0xff]  }
 0x157   :  { %v6614_v48 = vpop.f32.mrb[49].mxu0  ;;  %v6659_v56 = vpop.f32.mrb[48].mxu1  ;;  %5049 = vmatmul.mubr.bf16.gmra.mrb[148].mxu0 %v7954_v53 }
 0x158   :  { %v6615_v37 = vadd.f32 %v6614_v48, %v6613_v46  ;;  %v6616_v50 = vpop.f32.mrb[50].mxu0  ;;  %v6660_v61 = vpop.f32.mrb[49].mxu1  ;;  %7144 = vmatpush3.bf16.msra.mxu0 %v7955_v45  ;;  %5056 = vmatprep.mubr.bf16.mxu0 %v7964_v17  ;;  %v6024_v46 = vcombine.high %v217_v31, %v217_v31  ;;  %v6023_v48 = vcombine.low %v217_v31, %v217_v31  ;;  %v7992_v17 = vld [vmem:[%s10160_s0 + $0x88] ss:$172 sps:$4 sm:$0xff]   ;;  %v8003_v31 = vld [vmem:[%s10160_s0 + $0x1e4] ss:$172 sps:$4 sm:$0xff]  }
 0x159   :  { %v6617_v54 = vpop.f32.mrb[51].mxu0  ;;  %v6661_v58 = vadd.f32 %v6660_v61, %v6659_v56  ;;  %v6662_v1 = vpop.f32.mrb[50].mxu1  ;;  %7145 = vmatprep.subr.bf16.mxu0 %v7960_v2  ;;  %v7982_v56 = vld [vmem:[%s10159_s1 + $0x8f0] sm:$0xff]   ;;  %v7983_v61 = vld [vmem:[%s10159_s1 + $0x878] sm:$0xff]  }
 0x15a   :  { %v4331_v55 = vadd.f32 %v6615_v37, %v9289_v57  ;;  %v6618_v59 = vadd.f32 %v6617_v54, %v6616_v50  ;;  %v7959_v57 = vld [vmem:[%s10160_s0 + $0x328] ss:$172 sps:$4 sm:$0xff]   ;;  %v6663_v6 = vpop.f32.mrb[51].mxu1  ;;  %v218_v50 = vld [vmem:[%s10160_s0 + $0x5d8] sm:$0xff] }
 0x15b   :  { %5121 = vmatmul.mubr.bf16.gmra.mrb[148].mxu1 %v7959_v57  ;;  %v6664_v7 = vadd.f32 %v6663_v6, %v6662_v1  ;;  %v7978_v37 = vld [vmem:[%s10159_s1 + $0x8a8] sm:$0xff]   ;;  %v6026_v45 = vcombine.high %v218_v50, %v218_v50  ;;  %v7986_v57 = vld [vmem:[%s10159_s1 + $0x8f8] sm:$0xff]  }
 0x15c   :  { %v4334_v0 = vadd.f32 %v6618_v59, %v9297_v63  ;;  %v9463_v4 = vadd.f32 %v6661_v58, %v4331_v55  ;;  %v7961_v63 = vld [vmem:[%s10159_s1 + $0x8d8] sm:$0xff]   ;;  %7146 = vmatpush3.bf16.msra.mxu0 %v7962_v3  ;;  %5128 = vmatprep.mubr.bf16.mxu1 %v7967_v11  ;;  %v6025_v55 = vcombine.low %v218_v50, %v218_v50  ;;  %v7987_v6 = vld [vmem:[%s10160_s0 + $0x80] ss:$172 sps:$4 sm:$0xff]  }
 0x15d   :  { %7189 = vmatprep.subr.bf16.mxu1 %v7961_v63  ;;  %7147 = vmatprep.subr.bf16.mxu0 %v7969_v24  ;;  %v7985_v58 = vld [vmem:[%s10159_s1 + $0x838] sm:$0xff]   ;;  %v7989_v63 = vld [vmem:[%s10160_s0 + $0x84] ss:$172 sps:$4 sm:$0xff]   ;;  %v8007_v50 = vld [vmem:[%s10159_s1 + $0x9c8] sm:$0xff]  }
 0x15e   :  { %v6619_v8 = vpop.f32.mrb[52].mxu0  ;;  %v9474_v12 = vadd.f32 %v6664_v7, %v4334_v0  ;;  %7190 = vmatpush3.bf16.msra.mxu1 %v7963_v10  ;;  %v7990_v3 = vld [vmem:[%s10159_s1 + $0x8b8] sm:$0xff]   ;;  %v7991_v10 = vld [vmem:[%s10159_s1 + $0x940] sm:$0xff]  }
 0x15f   :  { %v6620_v9 = vpop.f32.mrb[53].mxu0  ;;  %v6665_v20 = vpop.f32.mrb[52].mxu1  ;;  %5057 = vmatmul.mubr.bf16.gmra.mrb[152].mxu0 %v7966_v18  ;;  %7191 = vmatprep.subr.bf16.mxu1 %v7970_v27  ;;  %v7994_v11 = vld [vmem:[%s10160_s0 + $0x8c] ss:$172 sps:$4 sm:$0xff]  }
 0x160   :  { %v6621_v14 = vadd.f32 %v6620_v9, %v6619_v8  ;;  %v6622_v15 = vpop.f32.mrb[54].mxu0  ;;  %v6666_v26 = vpop.f32.mrb[53].mxu1  ;;  %7148 = vmatpush3.bf16.msra.mxu0 %v7972_v30  ;;  %5064 = vmatprep.mubr.bf16.mxu0 %v6024_v46 }
 0x161   :  { %v6623_v23 = vpop.f32.mrb[55].mxu0  ;;  %v6667_v29 = vadd.f32 %v6666_v26, %v6665_v20  ;;  %7149 = vmatprep.subr.bf16.mxu0 %v7974_v38 }
 0x162   :  { %v4339_v22 = vadd.f32 %v6621_v14, %v9319_v5  ;;  %v6624_v13 = vadd.f32 %v6623_v23, %v6622_v15  ;;  %v6668_v5 = vpop.f32.mrb[54].mxu1  ;;  %7192 = vmatpush3.bf16.msra.mxu1 %v7973_v28  ;;  %v7995_v23 = vld [vmem:[%s10159_s1 + $0x900] sm:$0xff]  }
 0x163   :  { %v6669_v33 = vpop.f32.mrb[55].mxu1  ;;  %5129 = vmatmul.mubr.bf16.gmra.mrb[152].mxu1 %v7971_v19  ;;  %v7997_v19 = vld [vmem:[%s10159_s1 + $0x9c0] sm:$0xff]  }
 0x164   :  { %v4342_v32 = vadd.f32 %v6624_v13, %v9330_v25  ;;  %v9502_v34 = vadd.f32 %v6667_v29, %v4339_v22  ;;  %v6670_v36 = vadd.f32 %v6669_v33, %v6668_v5  ;;  %v7975_v25 = vld [vmem:[%s10159_s1 + $0x8e8] sm:$0xff]   ;;  %7150 = vmatpush3.bf16.msra.mxu0 %v7977_v35  ;;  %5136 = vmatprep.mubr.bf16.mxu1 %v6026_v45 }
 0x165   :  { %7193 = vmatprep.subr.bf16.mxu1 %v7975_v25  ;;  %7151 = vmatprep.subr.bf16.mxu0 %v7983_v61  ;;  %v7996_v13 = vld [vmem:[%s10159_s1 + $0x948] sm:$0xff]   ;;  %v8002_v25 = vld [vmem:[%s10160_s0 + $0x1d8] ss:$172 sps:$4 sm:$0xff]  }
 0x166   :  { %v6625_v39 = vpop.f32.mrb[56].mxu0  ;;  %v9510_v40 = vadd.f32 %v6670_v36, %v4342_v32  ;;  %7194 = vmatpush3.bf16.msra.mxu1 %v7978_v37  ;;  %v7999_v32 = vld [vmem:[%s10159_s1 + $0x980] sm:$0xff]   ;;  %v8012_v61 = vld [vmem:[%s10159_s1 + $0x958] sm:$0xff]  }
 0x167   :  { %v6626_v42 = vpop.f32.mrb[57].mxu0  ;;  %v6671_v49 = vpop.f32.mrb[56].mxu1  ;;  %5065 = vmatmul.mubr.bf16.gmra.mrb[156].mxu0 %v6023_v48  ;;  %7195 = vmatprep.subr.bf16.mxu1 %v7982_v56  ;;  %v8006_v48 = vld [vmem:[%s10159_s1 + $0x950] sm:$0xff]  }
 0x168   :  { %v6627_v43 = vadd.f32 %v6626_v42, %v6625_v39  ;;  %v6628_v44 = vpop.f32.mrb[58].mxu0  ;;  %v6672_v54 = vpop.f32.mrb[57].mxu1  ;;  %7152 = vmatpush3.bf16.msra.mxu0 %v7985_v58  ;;  %5176 = vmatprep.mubr.bf16.mxu0 %v7989_v63  ;;  %v8000_v39 = vld [vmem:[%s10160_s0 + $0x1dc] ss:$172 sps:$4 sm:$0xff]   ;;  %v8013_v58 = vld [vmem:[%s10159_s1 + $0x9d0] sm:$0xff]  }
 0x169   :  { %v6629_v53 = vpop.f32.mrb[59].mxu0  ;;  %v6673_v59 = vadd.f32 %v6672_v54, %v6671_v49  ;;  %v6674_v60 = vpop.f32.mrb[58].mxu1  ;;  %7229 = vmatprep.subr.bf16.mxu0 %v7991_v10  ;;  %v8015_v63 = vld [vmem:[%s10159_s1 + $0x918] sm:$0xff]  }
 0x16a   :  { %v4347_v51 = vadd.f32 %v6627_v43, %v9360_v52  ;;  %v6675_v62 = vpop.f32.mrb[59].mxu1  ;;  %v7984_v52 = vld [vmem:[%s10159_s1 + $0x8b0] sm:$0xff]   ;;  %v8005_v43 = vld [vmem:[%s10160_s0 + $0x1e0] ss:$172 sps:$4 sm:$0xff]   ;;  %v8019_v10 = vld [vmem:[%s10160_s0 + $0x338] ss:$172 sps:$4 sm:$0xff]  }
 0x16b   :  { %5137 = vmatmul.mubr.bf16.gmra.mrb[156].mxu1 %v6025_v55  ;;  %v8009_v55 = vld [vmem:[%s10159_s1 + $0x988] sm:$0xff]  }
 0x16c   :  { %v9534_v0 = vadd.f32 %v6673_v59, %v4347_v51  ;;  %7196 = vmatpush3.bf16.msra.mxu1 %v7984_v52  ;;  %5248 = vmatprep.mubr.bf16.mxu1 %v7994_v11  ;;  %v8022_v11 = vld [vmem:[%s10159_s1 + $0x920] sm:$0xff]  }
 0x16d   :  { %7197 = vmatprep.subr.bf16.mxu1 %v7986_v57  ;;  %v8014_v57 = vld [vmem:[%s10160_s0 + $0x330] ss:$172 sps:$4 sm:$0xff]  }
 0x16e   :  { %v6693_v1 = vpop.f32.mrb[60].mxu0 }
 0x16f   :  { %v6694_v2 = vpop.f32.mrb[61].mxu0  ;;  %v6739_v9 = vpop.f32.mrb[60].mxu1  ;;  %5177 = vmatmul.mubr.bf16.vlgmr.msra.gmra.mrb[160].mxu0 %v7987_v6 }
 0x170   :  { %v6695_v7 = vadd.f32 %v6694_v2, %v6693_v1  ;;  %v6696_v8 = vpop.f32.mrb[62].mxu0  ;;  %v6740_v20 = vpop.f32.mrb[61].mxu1  ;;  %7198 = vmatpush3.bf16.msra.mxu1 %v7990_v3  ;;  %7230 = vmatpush3.bf16.msra.mxu0 %v7995_v23 }
 0x171   :  { %v6697_v15 = vpop.f32.mrb[63].mxu0  ;;  %v6741_v22 = vadd.f32 %v6740_v20, %v6739_v9  ;;  %v6742_v24 = vpop.f32.mrb[62].mxu1  ;;  %7231 = vmatprep.subr.bf16.mxu0 %v7996_v13  ;;  %7275 = vmatprep.subr.bf16.mxu1 %v7997_v19  ;;  %v8024_v13 = vld [vmem:[%s10160_s0 + $0x48c] ss:$172 sps:$4 sm:$0xff]  }
 0x172   :  { %v4459_v14 = vadd.f32 %v6695_v7, %v9394_v16  ;;  %v6698_v18 = vadd.f32 %v6697_v15, %v6696_v8  ;;  %v6743_v27 = vpop.f32.mrb[63].mxu1  ;;  %5184 = vmatprep.mubr.bf16.mxu0 %v8000_v39  ;;  %v8016_v8 = vld [vmem:[%s10159_s1 + $0x990] sm:$0xff]   ;;  %v8020_v15 = vld [vmem:[%s10159_s1 + $0x960] sm:$0xff]  }
 0x173   :  { %5249 = vmatmul.mubr.bf16.vlgmr.msra.gmra.mrb[160].mxu1 %v7992_v17  ;;  %v6744_v29 = vadd.f32 %v6743_v27, %v6742_v24  ;;  %v8026_v27 = vld [vmem:[%s10160_s0 + $0x488] ss:$172 sps:$4 sm:$0xff]  }
 0x174   :  { %v4462_v16 = vadd.f32 %v6698_v18, %v9402_v21  ;;  %v9568_v26 = vadd.f32 %v6741_v22, %v4459_v14  ;;  %v7998_v21 = vld [vmem:[%s10159_s1 + $0x908] sm:$0xff]   ;;  %7276 = vmatpush3.bf16.msra.mxu1 %v7999_v32  ;;  %5256 = vmatprep.mubr.bf16.mxu1 %v8003_v31 }
 0x175   :  { %7232 = vmatpush3.bf16.msra.mxu0 %v7998_v21  ;;  %7277 = vmatprep.subr.bf16.mxu1 %v8007_v50  ;;  %v8027_v21 = vld [vmem:[%s10160_s0 + $0x494] ss:$172 sps:$4 sm:$0xff]  }
 0x176   :  { %v6699_v5 = vpop.f32.mrb[64].mxu0  ;;  %v9579_v33 = vadd.f32 %v6744_v29, %v4462_v16  ;;  %7233 = vmatprep.subr.bf16.mxu0 %v8006_v48  ;;  %v8023_v16 = vld [vmem:[%s10159_s1 + $0x998] sm:$0xff]   ;;  %v8033_v48 = vld [vmem:[%s10159_s1 + $0x9a0] sm:$0xff]  }
 0x177   :  { %v6700_v30 = vpop.f32.mrb[65].mxu0  ;;  %v6745_v38 = vpop.f32.mrb[64].mxu1  ;;  %5185 = vmatmul.mubr.bf16.gmra.mrb[164].mxu0 %v8002_v25  ;;  %v8030_v25 = vld [vmem:[%s10159_s1 + $0x9e0] sm:$0xff]  }
 0x178   :  { %v6701_v28 = vadd.f32 %v6700_v30, %v6699_v5  ;;  %v6702_v36 = vpop.f32.mrb[66].mxu0  ;;  %v6746_v35 = vpop.f32.mrb[65].mxu1  ;;  %7278 = vmatpush3.bf16.msra.mxu1 %v8009_v55 }
 0x179   :  { %v6703_v42 = vpop.f32.mrb[67].mxu0  ;;  %v6747_v49 = vadd.f32 %v6746_v35, %v6745_v38  ;;  %v6748_v37 = vpop.f32.mrb[66].mxu1  ;;  %7279 = vmatprep.subr.bf16.mxu1 %v8013_v58 }
 0x17a   :  { %v4467_v44 = vadd.f32 %v6701_v28, %v9424_v41  ;;  %v6704_v46 = vadd.f32 %v6703_v42, %v6702_v36  ;;  %v6749_v53 = vpop.f32.mrb[67].mxu1  ;;  %v8008_v41 = vld [vmem:[%s10159_s1 + $0x910] sm:$0xff]   ;;  %v8029_v28 = vld [vmem:[%s10159_s1 + $0x968] sm:$0xff]  }
 0x17b   :  { %v6750_v45 = vadd.f32 %v6749_v53, %v6748_v37  ;;  %5257 = vmatmul.mubr.bf16.gmra.mrb[164].mxu1 %v8005_v43  ;;  %7234 = vmatpush3.bf16.msra.mxu0 %v8008_v41  ;;  %v8031_v43 = vld [vmem:[%s10160_s0 + $0x490] ss:$172 sps:$4 sm:$0xff]   ;;  %v219_v53 = vld [vmem:[%s10160_s0 + $0x5e0] sm:$0xff] }
 0x17c   :  { %v4470_v51 = vadd.f32 %v6704_v46, %v9435_v47  ;;  %v9604_v54 = vadd.f32 %v6747_v49, %v4467_v44  ;;  %v8010_v47 = vld [vmem:[%s10160_s0 + $0x334] ss:$172 sps:$4 sm:$0xff]   ;;  %7235 = vmatprep.subr.bf16.mxu0 %v8012_v61  ;;  %7280 = vmatpush3.bf16.msra.mxu1 %v8016_v8 }
 0x17d   :  { %5192 = vmatprep.mubr.bf16.mxu0 %v8010_v47  ;;  %v8037_v47 = vld [vmem:[%s10159_s1 + $0x930] sm:$0xff]  }
 0x17e   :  { %v6705_v56 = vpop.f32.mrb[68].mxu0  ;;  %v9612_v59 = vadd.f32 %v6750_v45, %v4470_v51  ;;  %v8035_v51 = vld [vmem:[%s10159_s1 + $0x9e8] sm:$0xff]  }
 0x17f   :  { %v6706_v60 = vpop.f32.mrb[69].mxu0  ;;  %v6751_v7 = vpop.f32.mrb[68].mxu1  ;;  %5193 = vmatmul.mubr.bf16.gmra.mrb[168].mxu0 %v8014_v57 }
 0x180   :  { %v6707_v62 = vadd.f32 %v6706_v60, %v6705_v56  ;;  %v6708_v52 = vpop.f32.mrb[70].mxu0  ;;  %v6752_v9 = vpop.f32.mrb[69].mxu1  ;;  %7236 = vmatpush3.bf16.msra.mxu0 %v8015_v63  ;;  %5200 = vmatprep.mubr.bf16.mxu0 %v8024_v13  ;;  %v6028_v56 = vcombine.high %v219_v53, %v219_v53  ;;  %v6027_v60 = vcombine.low %v219_v53, %v219_v53  ;;  %v8042_v63 = vld [vmem:[%s10159_s1 + $0x9f0] sm:$0xff]   ;;  %v8051_v13 = vld [vmem:[%s10159_s1 + $0xa40] sm:$0xff]  }
 0x181   :  { %v6709_v1 = vpop.f32.mrb[71].mxu0  ;;  %v6753_v14 = vadd.f32 %v6752_v9, %v6751_v7  ;;  %v6754_v17 = vpop.f32.mrb[70].mxu1  ;;  %7237 = vmatprep.subr.bf16.mxu0 %v8020_v15  ;;  %v8046_v15 = vld [vmem:[%s10159_s1 + $0x9f8] sm:$0xff]  }
 0x182   :  { %v4475_v2 = vadd.f32 %v6707_v62, %v9463_v4  ;;  %v6710_v6 = vadd.f32 %v6709_v1, %v6708_v52  ;;  %v8017_v4 = vld [vmem:[%s10160_s0 + $0x33c] ss:$172 sps:$4 sm:$0xff]   ;;  %v6755_v20 = vpop.f32.mrb[71].mxu1 }
 0x183   :  { %5264 = vmatprep.mubr.bf16.mxu1 %v8017_v4  ;;  %v6756_v22 = vadd.f32 %v6755_v20, %v6754_v17  ;;  %v8038_v62 = vld [vmem:[%s10159_s1 + $0x9a8] sm:$0xff]  }
 0x184   :  { %v4478_v3 = vadd.f32 %v6710_v6, %v9474_v12  ;;  %v8021_v12 = vld [vmem:[%s10159_s1 + $0x9d8] sm:$0xff]   ;;  %v9643_v18 = vadd.f32 %v6753_v14, %v4475_v2  ;;  %5265 = vmatmul.mubr.bf16.gmra.mrb[168].mxu1 %v8019_v10  ;;  %7238 = vmatpush3.bf16.msra.mxu0 %v8022_v11  ;;  %v220_v52 = vld [vmem:[%s10160_s0 + $0x5e8] sm:$0xff] }
 0x185   :  { %7281 = vmatprep.subr.bf16.mxu1 %v8021_v12  ;;  %5272 = vmatprep.mubr.bf16.mxu1 %v8027_v21  ;;  %v6030_v2 = vcombine.high %v220_v52, %v220_v52  ;;  %v6029_v6 = vcombine.low %v220_v52, %v220_v52  ;;  %v8045_v10 = vld [vmem:[%s10159_s1 + $0x938] sm:$0xff]  }
 0x186   :  { %v6711_v23 = vpop.f32.mrb[72].mxu0  ;;  %v9657_v19 = vadd.f32 %v6756_v22, %v4478_v3  ;;  %7282 = vmatpush3.bf16.msra.mxu1 %v8023_v16  ;;  %7239 = vmatprep.subr.bf16.mxu0 %v8029_v28  ;;  %v8043_v3 = vld [vmem:[%s10159_s1 + $0x978] sm:$0xff]   ;;  %v8049_v22 = vld [vmem:[%s10160_s0 + $0x94] ss:$172 sps:$4 sm:$0xff]   ;;  %v8135_v28 = vmov 0.0  }
 0x187   :  { %v6712_v24 = vpop.f32.mrb[73].mxu0  ;;  %v6757_v30 = vpop.f32.mrb[72].mxu1  ;;  %5201 = vmatmul.mubr.bf16.gmra.mrb[172].mxu0 %v8026_v27  ;;  %7283 = vmatprep.subr.bf16.mxu1 %v8030_v25  ;;  %v8047_v12 = vld [vmem:[%s10160_s0 + $0x90] ss:$172 sps:$4 sm:$0xff]  }
 0x188   :  { %v6713_v29 = vadd.f32 %v6712_v24, %v6711_v23  ;;  %v6714_v5 = vpop.f32.mrb[74].mxu0  ;;  %v6758_v39 = vpop.f32.mrb[73].mxu1  ;;  %5208 = vmatprep.mubr.bf16.mxu0 %v6028_v56  ;;  %v8050_v23 = vld [vmem:[%s10159_s1 + $0x9b8] sm:$0xff]  }
 0x189   :  { %v6715_v32 = vpop.f32.mrb[75].mxu0  ;;  %v6759_v42 = vadd.f32 %v6758_v39, %v6757_v30  ;;  %v6760_v31 = vpop.f32.mrb[74].mxu1  ;;  %v8054_v21 = vld [vmem:[%s10160_s0 + $0x9c] ss:$172 sps:$4 sm:$0xff]  }
 0x18a   :  { %v4483_v36 = vadd.f32 %v6713_v29, %v9502_v34  ;;  %v6716_v38 = vadd.f32 %v6715_v32, %v6714_v5  ;;  %v8032_v34 = vld [vmem:[%s10159_s1 + $0x928] sm:$0xff]   ;;  %v6761_v35 = vpop.f32.mrb[75].mxu1  ;;  %7284 = vmatpush3.bf16.msra.mxu1 %v8033_v48  ;;  %v8052_v5 = vld [vmem:[%s10160_s0 + $0x98] ss:$172 sps:$4 sm:$0xff]  }
 0x18b   :  { %v6762_v49 = vadd.f32 %v6761_v35, %v6760_v31  ;;  %7240 = vmatpush3.bf16.msra.mxu0 %v8032_v34  ;;  %7285 = vmatprep.subr.bf16.mxu1 %v8035_v51  ;;  %v8055_v32 = vld [vmem:[%s10159_s1 + $0xa00] sm:$0xff]   ;;  %v8057_v31 = vld [vmem:[%s10159_s1 + $0xa08] sm:$0xff]  }
 0x18c   :  { %v4486_v44 = vadd.f32 %v6716_v38, %v9510_v40  ;;  %v9676_v46 = vadd.f32 %v6759_v42, %v4483_v36  ;;  %5273 = vmatmul.mubr.bf16.gmra.mrb[172].mxu1 %v8031_v43  ;;  %v8034_v40 = vld [vmem:[%s10159_s1 + $0x970] sm:$0xff]   ;;  %v8056_v38 = vld [vmem:[%s10159_s1 + $0xa48] sm:$0xff]   ;;  %v8058_v34 = vld [vmem:[%s10159_s1 + $0xa80] sm:$0xff]  }
 0x18d   :  { %7241 = vmatprep.subr.bf16.mxu0 %v8034_v40  ;;  %5280 = vmatprep.mubr.bf16.mxu1 %v6030_v2  ;;  %v8061_v48 = vld [vmem:[%s10160_s0 + $0x1e8] ss:$172 sps:$4 sm:$0xff]  }
 0x18e   :  { %v6717_v37 = vpop.f32.mrb[76].mxu0  ;;  %v9690_v41 = vadd.f32 %v6762_v49, %v4486_v44  ;;  %7286 = vmatpush3.bf16.msra.mxu1 %v8038_v62 }
 0x18f   :  { %v6718_v50 = vpop.f32.mrb[77].mxu0  ;;  %v6763_v61 = vpop.f32.mrb[76].mxu1  ;;  %7242 = vmatpush3.bf16.msra.mxu0 %v8037_v47  ;;  %7287 = vmatprep.subr.bf16.mxu1 %v8042_v63  ;;  %v8065_v47 = vld [vmem:[%s10159_s1 + $0xa50] sm:$0xff]   ;;  %v8071_v63 = vld [vmem:[%s10160_s0 + $0x340] ss:$172 sps:$4 sm:$0xff]  }
 0x190   :  { %v6719_v45 = vadd.f32 %v6718_v50, %v6717_v37  ;;  %v6720_v55 = vpop.f32.mrb[78].mxu0  ;;  %v6764_v57 = vpop.f32.mrb[77].mxu1  ;;  %5209 = vmatmul.mubr.bf16.gmra.mrb[176].mxu0 %v6027_v60  ;;  %7243 = vmatprep.subr.bf16.mxu0 %v8043_v3  ;;  %v8062_v50 = vld [vmem:[%s10160_s0 + $0x1f4] ss:$172 sps:$4 sm:$0xff]  }
 0x191   :  { %v6721_v1 = vpop.f32.mrb[79].mxu0  ;;  %v6765_v7 = vadd.f32 %v6764_v57, %v6763_v61  ;;  %v6766_v8 = vpop.f32.mrb[78].mxu1  ;;  %5320 = vmatprep.mubr.bf16.mxu0 %v8049_v22  ;;  %v8066_v61 = vld [vmem:[%s10159_s1 + $0xa10] sm:$0xff]  }
 0x192   :  { %v4491_v58 = vadd.f32 %v6719_v45, %v9534_v0  ;;  %v6767_v9 = vpop.f32.mrb[79].mxu1  ;;  %v8044_v0 = vld [vmem:[%s10159_s1 + $0x9b0] sm:$0xff]   ;;  %v8072_v8 = vld [vmem:[%s10159_s1 + $0xa18] sm:$0xff]  }
 0x193   :  { %7288 = vmatpush3.bf16.msra.mxu1 %v8044_v0  ;;  %7244 = vmatpush3.bf16.msra.mxu0 %v8045_v10  ;;  %v8064_v45 = vld [vmem:[%s10160_s0 + $0x1f0] ss:$172 sps:$4 sm:$0xff]  }
 0x194   :  { %v9711_v4 = vadd.f32 %v6765_v7, %v4491_v58  ;;  %5281 = vmatmul.mubr.bf16.gmra.mrb[176].mxu1 %v6029_v6  ;;  %7289 = vmatprep.subr.bf16.mxu1 %v8046_v15  ;;  %v8068_v57 = vld [vmem:[%s10160_s0 + $0x344] ss:$172 sps:$4 sm:$0xff]   ;;  %v8074_v15 = vld [vmem:[%s10160_s0 + $0x34c] ss:$172 sps:$4 sm:$0xff]  }
 0x195   :  { %7321 = vmatprep.subr.bf16.mxu0 %v8051_v13  ;;  %5392 = vmatprep.mubr.bf16.mxu1 %v8054_v21  ;;  %v8073_v0 = vld [vmem:[%s10159_s1 + $0xa90] sm:$0xff]   ;;  %v8079_v13 = vld [vmem:[%s10159_s1 + $0xa98] sm:$0xff]  }
 0x196   :  { %v6785_v14 = vpop.f32.mrb[80].mxu0 }
 0x197   :  { %v6786_v17 = vpop.f32.mrb[81].mxu0  ;;  %v6831_v24 = vpop.f32.mrb[80].mxu1  ;;  %7290 = vmatpush3.bf16.msra.mxu1 %v8050_v23  ;;  %v8078_v23 = vld [vmem:[%s10159_s1 + $0xa20] sm:$0xff]  }
 0x198   :  { %v6787_v20 = vadd.f32 %v6786_v17, %v6785_v14  ;;  %v6788_v11 = vpop.f32.mrb[82].mxu0  ;;  %v6832_v29 = vpop.f32.mrb[81].mxu1  ;;  %5321 = vmatmul.mubr.bf16.vlgmr.msra.gmra.mrb[180].mxu0 %v8047_v12  ;;  %7398 = vmatprep.subr.bf16.mxu1 %v8135_v28  ;;  %v8076_v17 = vld [vmem:[%s10160_s0 + $0x348] ss:$172 sps:$4 sm:$0xff]  }
 0x199   :  { %v6789_v27 = vpop.f32.mrb[83].mxu0  ;;  %v6834_v36 = vpop.f32.mrb[82].mxu1  ;;  %7322 = vmatpush3.bf16.msra.mxu0 %v8055_v32 }
 0x19a   :  { %v4603_v16 = vadd.f32 %v6787_v20, %v9568_v26  ;;  %v6790_v30 = vadd.f32 %v6789_v27, %v6788_v11  ;;  %v6833_v26 = vadd.f32 %v6832_v29, %v6831_v24  ;;  %v6835_v42 = vpop.f32.mrb[83].mxu1  ;;  %7323 = vmatprep.subr.bf16.mxu0 %v8056_v38  ;;  %v8077_v20 = vld [vmem:[%s10159_s1 + $0xa60] sm:$0xff]  }
 0x19b   :  { %v6836_v43 = vadd.f32 %v6835_v42, %v6834_v36  ;;  %v8083_v36 = vld [vmem:[%s10160_s0 + $0x4a4] ss:$172 sps:$4 sm:$0xff]   ;;  %v8086_v38 = vld [vmem:[%s10160_s0 + $0x4a0] ss:$172 sps:$4 sm:$0xff]  }
 0x19c   :  { %v4606_v39 = vadd.f32 %v6790_v30, %v9579_v33  ;;  %v9746_v25 = vadd.f32 %v6833_v26, %v4603_v16  ;;  %5393 = vmatmul.mubr.bf16.vlgmr.msra.gmra.mrb[180].mxu1 %v8052_v5  ;;  %v8059_v33 = vld [vmem:[%s10160_s0 + $0x1ec] ss:$172 sps:$4 sm:$0xff]  }
 0x19d   :  { %7399 = vmatpush3.bf16.msra.mxu1 %v8058_v34  ;;  %7324 = vmatpush3.bf16.msra.mxu0 %v8057_v31  ;;  %v8082_v30 = vld [vmem:[%s10160_s0 + $0x498] ss:$172 sps:$4 sm:$0xff]   ;;  %v8087_v31 = vld [vmem:[%s10159_s1 + $0xa28] sm:$0xff]  }
 0x19e   :  { %v6791_v44 = vpop.f32.mrb[84].mxu0  ;;  %v9760_v49 = vadd.f32 %v6836_v43, %v4606_v39  ;;  %5328 = vmatprep.mubr.bf16.mxu0 %v8059_v33  ;;  %5400 = vmatprep.mubr.bf16.mxu1 %v8062_v50  ;;  %v8089_v33 = vld [vmem:[%s10159_s1 + $0xa70] sm:$0xff]  }
 0x19f   :  { %v6792_v35 = vpop.f32.mrb[85].mxu0  ;;  %v6837_v51 = vpop.f32.mrb[84].mxu1  ;;  %7400 = vmatprep.subr.bf16.mxu1 %v8135_v28  ;;  %7325 = vmatprep.subr.bf16.mxu0 %v8065_v47 }
 0x1a0   :  { %v6793_v37 = vadd.f32 %v6792_v35, %v6791_v44  ;;  %v6794_v40 = vpop.f32.mrb[86].mxu0  ;;  %5329 = vmatmul.mubr.bf16.gmra.mrb[184].mxu0 %v8061_v48  ;;  %v6838_v60 = vpop.f32.mrb[85].mxu1  ;;  %v8088_v44 = vld [vmem:[%s10159_s1 + $0xaa0] sm:$0xff]   ;;  %v221_v48 = vld [vmem:[%s10160_s0 + $0x5f0] sm:$0xff] }
 0x1a1   :  { %v6795_v53 = vpop.f32.mrb[87].mxu0  ;;  %v6839_v52 = vadd.f32 %v6838_v60, %v6837_v51  ;;  %v6840_v58 = vpop.f32.mrb[86].mxu1  ;;  %7326 = vmatpush3.bf16.msra.mxu0 %v8066_v61  ;;  %5336 = vmatprep.mubr.bf16.mxu0 %v8068_v57  ;;  %v6032_v50 = vcombine.high %v221_v48, %v221_v48  ;;  %v8091_v51 = vld [vmem:[%s10159_s1 + $0xa30] sm:$0xff]   ;;  %v6031_v61 = vcombine.low %v221_v48, %v221_v48 }
 0x1a2   :  { %v4611_v55 = vadd.f32 %v6793_v37, %v9604_v54  ;;  %v6796_v56 = vadd.f32 %v6795_v53, %v6794_v40  ;;  %v8067_v54 = vld [vmem:[%s10159_s1 + $0xa88] sm:$0xff]   ;;  %v6841_v1 = vpop.f32.mrb[87].mxu1 }
 0x1a3   :  { %v6842_v6 = vadd.f32 %v6841_v1, %v6840_v58  ;;  %7401 = vmatpush3.bf16.msra.mxu1 %v8067_v54  ;;  %v8096_v54 = vld [vmem:[%s10159_s1 + $0xa78] sm:$0xff]  }
 0x1a4   :  { %v4614_v62 = vadd.f32 %v6796_v56, %v9612_v59  ;;  %5401 = vmatmul.mubr.bf16.gmra.mrb[184].mxu1 %v8064_v45  ;;  %v9783_v2 = vadd.f32 %v6839_v52, %v4611_v55  ;;  %v8070_v59 = vld [vmem:[%s10159_s1 + $0xa58] sm:$0xff]   ;;  %7402 = vmatprep.subr.bf16.mxu1 %v8135_v28  ;;  %v8092_v56 = vld [vmem:[%s10159_s1 + $0xaa8] sm:$0xff]  }
 0x1a5   :  { %7327 = vmatprep.subr.bf16.mxu0 %v8070_v59  ;;  %5408 = vmatprep.mubr.bf16.mxu1 %v8074_v15 }
 0x1a6   :  { %v6797_v7 = vpop.f32.mrb[88].mxu0  ;;  %v9795_v3 = vadd.f32 %v6842_v6, %v4614_v62  ;;  %7328 = vmatpush3.bf16.msra.mxu0 %v8072_v8  ;;  %v222_v62 = vld [vmem:[%s10160_s0 + $0x5f8] sm:$0xff] }
 0x1a7   :  { %v6798_v9 = vpop.f32.mrb[89].mxu0  ;;  %v6843_v12 = vpop.f32.mrb[88].mxu1  ;;  %7403 = vmatpush3.bf16.msra.mxu1 %v8073_v0  ;;  %7329 = vmatprep.subr.bf16.mxu0 %v8077_v20  ;;  %v6034_v58 = vcombine.high %v222_v62, %v222_v62  ;;  %v8097_v6 = vld [vmem:[%s10159_s1 + $0xa38] sm:$0xff]  }
 0x1a8   :  { %v6799_v10 = vadd.f32 %v6798_v9, %v6797_v7  ;;  %v6800_v14 = vpop.f32.mrb[90].mxu0  ;;  %5337 = vmatmul.mubr.bf16.gmra.mrb[188].mxu0 %v8071_v63  ;;  %7404 = vmatprep.subr.bf16.mxu1 %v8135_v28  ;;  %v6844_v24 = vpop.f32.mrb[89].mxu1  ;;  %v6033_v63 = vcombine.low %v222_v62, %v222_v62  ;;  %v8101_v9 = vld [vmem:[%s10160_s0 + $0xa4] ss:$172 sps:$4 sm:$0xff]  }
 0x1a9   :  { %v6801_v22 = vpop.f32.mrb[91].mxu0  ;;  %v6845_v27 = vadd.f32 %v6844_v24, %v6843_v12  ;;  %v6846_v29 = vpop.f32.mrb[90].mxu1  ;;  %v8103_v24 = vld [vmem:[%s10160_s0 + $0xa8] ss:$172 sps:$4 sm:$0xff]  }
 0x1aa   :  { %v4619_v11 = vadd.f32 %v6799_v10, %v9643_v18  ;;  %v6802_v16 = vadd.f32 %v6801_v22, %v6800_v14  ;;  %7330 = vmatpush3.bf16.msra.mxu0 %v8078_v23  ;;  %v8080_v18 = vld [vmem:[%s10160_s0 + $0x49c] ss:$172 sps:$4 sm:$0xff]   ;;  %v6847_v21 = vpop.f32.mrb[91].mxu1 }
 0x1ab   :  { %7405 = vmatpush3.bf16.msra.mxu1 %v8079_v13  ;;  %v6848_v32 = vadd.f32 %v6847_v21, %v6846_v29  ;;  %5344 = vmatprep.mubr.bf16.mxu0 %v8080_v18  ;;  %v8102_v14 = vld [vmem:[%s10159_s1 + $0xab8] sm:$0xff]  }
 0x1ac   :  { %5409 = vmatmul.mubr.bf16.gmra.mrb[188].mxu1 %v8076_v17  ;;  %v4622_v5 = vadd.f32 %v6802_v16, %v9657_v19  ;;  %v9824_v26 = vadd.f32 %v6845_v27, %v4619_v11  ;;  %7406 = vmatprep.subr.bf16.mxu1 %v8135_v28  ;;  %v8085_v19 = vld [vmem:[%s10159_s1 + $0xa68] sm:$0xff]  }
 0x1ad   :  { %5416 = vmatprep.mubr.bf16.mxu1 %v8083_v36  ;;  %7331 = vmatprep.subr.bf16.mxu0 %v8085_v19  ;;  %v8099_v11 = vld [vmem:[%s10160_s0 + $0xa0] ss:$172 sps:$4 sm:$0xff]  }
 0x1ae   :  { %v9836_v39 = vadd.f32 %v6848_v32, %v4622_v5  ;;  %v6803_v42 = vpop.f32.mrb[92].mxu0  ;;  %7332 = vmatpush3.bf16.msra.mxu0 %v8087_v31  ;;  %v8106_v31 = vld [vmem:[%s10160_s0 + $0x1f8] ss:$172 sps:$4 sm:$0xff]  }
 0x1af   :  { %v6804_v43 = vpop.f32.mrb[93].mxu0  ;;  %v6849_v37 = vpop.f32.mrb[92].mxu1  ;;  %7407 = vmatpush3.bf16.msra.mxu1 %v8088_v44  ;;  %7333 = vmatprep.subr.bf16.mxu0 %v8089_v33  ;;  %v8107_v33 = vld [vmem:[%s10160_s0 + $0x200] ss:$172 sps:$4 sm:$0xff]  }
 0x1b0   :  { %5345 = vmatmul.mubr.bf16.gmra.mrb[192].mxu0 %v8082_v30  ;;  %v6805_v34 = vadd.f32 %v6804_v43, %v6803_v42  ;;  %v6806_v35 = vpop.f32.mrb[94].mxu0  ;;  %v6850_v55 = vpop.f32.mrb[93].mxu1  ;;  %7408 = vmatprep.subr.bf16.mxu1 %v8135_v28 }
 0x1b1   :  { %v6807_v40 = vpop.f32.mrb[95].mxu0  ;;  %v6851_v47 = vadd.f32 %v6850_v55, %v6849_v37  ;;  %v6852_v60 = vpop.f32.mrb[94].mxu1  ;;  %5352 = vmatprep.mubr.bf16.mxu0 %v6032_v50 }
 0x1b2   :  { %v4627_v53 = vadd.f32 %v6805_v34, %v9676_v46  ;;  %v6808_v45 = vadd.f32 %v6807_v40, %v6806_v35  ;;  %v6853_v52 = vpop.f32.mrb[95].mxu1  ;;  %7334 = vmatpush3.bf16.msra.mxu0 %v8091_v51 }
 0x1b3   :  { %v6854_v57 = vadd.f32 %v6853_v52, %v6852_v60  ;;  %7409 = vmatpush3.bf16.msra.mxu1 %v8092_v56  ;;  %7335 = vmatprep.subr.bf16.mxu0 %v8096_v54  ;;  %v8111_v54 = vld [vmem:[%s10160_s0 + $0x358] ss:$172 sps:$4 sm:$0xff]  }
 0x1b4   :  { %5417 = vmatmul.mubr.bf16.gmra.mrb[192].mxu1 %v8086_v38  ;;  %v4630_v46 = vadd.f32 %v6808_v45, %v9690_v41  ;;  %v9865_v1 = vadd.f32 %v6851_v47, %v4627_v53  ;;  %v8098_v41 = vld [vmem:[%s10159_s1 + $0xab0] sm:$0xff]   ;;  %7410 = vmatprep.subr.bf16.mxu1 %v8135_v28 }
 0x1b5   :  { %5424 = vmatprep.mubr.bf16.mxu1 %v6034_v58  ;;  %v8112_v58 = vld [vmem:[%s10160_s0 + $0x4ac] ss:$172 sps:$4 sm:$0xff]  }
 0x1b6   :  { %v6809_v59 = vpop.f32.mrb[96].mxu0  ;;  %v9873_v7 = vadd.f32 %v6854_v57, %v4630_v46  ;;  %7336 = vmatpush3.bf16.msra.mxu0 %v8097_v6 }
 0x1b7   :  { %v6810_v8 = vpop.f32.mrb[97].mxu0  ;;  %7411 = vmatpush3.bf16.msra.mxu1 %v8098_v41  ;;  %v6855_v17 = vpop.f32.mrb[96].mxu1  ;;  %7434 = vmatprep.subr.bf16.mxu0 %v8135_v28 }
 0x1b8   :  { %5353 = vmatmul.mubr.bf16.gmra.mrb[196].mxu0 %v6031_v61  ;;  %v6811_v0 = vadd.f32 %v6810_v8, %v6809_v59  ;;  %v6812_v10 = vpop.f32.mrb[98].mxu0  ;;  %7412 = vmatprep.subr.bf16.mxu1 %v8135_v28  ;;  %v6856_v20 = vpop.f32.mrb[97].mxu1  ;;  %v8110_v61 = vld [vmem:[%s10160_s0 + $0x350] ss:$172 sps:$4 sm:$0xff]   ;;  %v223_v8 = vld [vmem:[%s10160_s0 + $0x600] sm:$0xff] }
 0x1b9   :  { %5464 = vmatprep.mubr.bf16.mxu0 %v8101_v9  ;;  %v6813_v12 = vpop.f32.mrb[99].mxu0  ;;  %v6857_v22 = vadd.f32 %v6856_v20, %v6855_v17  ;;  %v6858_v23 = vpop.f32.mrb[98].mxu1 }
 0x1ba   :  { %v4635_v15 = vadd.f32 %v6811_v0, %v9711_v4  ;;  %v8104_v4 = vld [vmem:[%s10160_s0 + $0x1fc] ss:$172 sps:$4 sm:$0xff]   ;;  %v6859_v16 = vpop.f32.mrb[99].mxu1 }
 0x1bb   :  { %7413 = vmatpush3.bf16.msra.mxu1 %v8102_v14  ;;  %v8114_v14 = vld [vmem:[%s10160_s0 + $0x4a8] ss:$172 sps:$4 sm:$0xff]  }
 0x1bc   :  { %5425 = vmatmul.mubr.bf16.gmra.mrb[196].mxu1 %v6033_v63  ;;  %v9896_v13 = vadd.f32 %v6857_v22, %v4635_v15  ;;  %7454 = vmatprep.subr.bf16.mxu1 %v8135_v28 }
 0x1bd   :  { %7414 = vmatprep.mubr.msk.bf16.mxu1 %vm8136_vm0, %v8135_v28 }
 0x1be   :  { %v6877_v27 = vpop.f32.mrb[100].mxu0 }
 0x1bf   :  { %v6878_v29 = vpop.f32.mrb[101].mxu0  ;;  %v6923_v21 = vpop.f32.mrb[100].mxu1 }
 0x1c0   :  { %5465 = vmatmul.mubr.bf16.vlgmr.msra.gmra.mrb[200].mxu0 %v8099_v11  ;;  %v6879_v18 = vadd.f32 %v6878_v29, %v6877_v27  ;;  %v6880_v5 = vpop.f32.mrb[102].mxu0  ;;  %v6924_v19 = vpop.f32.mrb[101].mxu1  ;;  %v6036_v11 = vcombine.high %v223_v8, %v223_v8 }
 0x1c1   :  { %5472 = vmatprep.mubr.bf16.mxu0 %v8104_v4  ;;  %v6881_v30 = vpop.f32.mrb[103].mxu0  ;;  %v6925_v38 = vadd.f32 %v6924_v19, %v6923_v21  ;;  %v6926_v42 = vpop.f32.mrb[102].mxu1  ;;  %v6035_v21 = vcombine.low %v223_v8, %v223_v8 }
 0x1c2   :  { %v4747_v32 = vadd.f32 %v6879_v18, %v9746_v25  ;;  %v6882_v36 = vadd.f32 %v6881_v30, %v6880_v5  ;;  %v6927_v44 = vpop.f32.mrb[103].mxu1  ;;  %v8108_v25 = vld [vmem:[%s10160_s0 + $0x354] ss:$172 sps:$4 sm:$0xff]  }
 0x1c3   :  { %v6928_v35 = vadd.f32 %v6927_v44, %v6926_v42 }
 0x1c4   :  { %7415 = vmatmul.mubr.bf16.vlgmr.msra.gmra.mrb[200].mxu1 %v8103_v24  ;;  %v4750_v43 = vadd.f32 %v6882_v36, %v9760_v49  ;;  %v9906_v34 = vadd.f32 %v6925_v38, %v4747_v32 }
 0x1c5   :  { %7418 = vmatprep.mubr.msk.bf16.mxu1 %vm8136_vm0, %v8135_v28 }
 0x1c6   :  { %v9914_v48 = vadd.f32 %v6928_v35, %v4750_v43  ;;  %v6883_v37 = vpop.f32.mrb[104].mxu0  ;;  %v8118_v43 = vld [vmem:[%s10160_s0 + $0x608] ss:$0 sps:$4 sm:$0xff]  }
 0x1c7   :  { %v6884_v40 = vpop.f32.mrb[105].mxu0  ;;  %v6929_v51 = vpop.f32.mrb[104].mxu1 }
 0x1c8   :  { %5473 = vmatmul.mubr.bf16.gmra.mrb[204].mxu0 %v8106_v31  ;;  %v6885_v50 = vadd.f32 %v6884_v40, %v6883_v37  ;;  %v6886_v49 = vpop.f32.mrb[106].mxu0  ;;  %v6930_v45 = vpop.f32.mrb[105].mxu1 }
 0x1c9   :  { %5480 = vmatprep.mubr.bf16.mxu0 %v8108_v25  ;;  %v6887_v53 = vpop.f32.mrb[107].mxu0  ;;  %v6931_v47 = vadd.f32 %v6930_v45, %v6929_v51  ;;  %v6932_v60 = vpop.f32.mrb[106].mxu1 }
 0x1ca   :  { %v4755_v55 = vadd.f32 %v6885_v50, %v9783_v2  ;;  %v6888_v56 = vadd.f32 %v6887_v53, %v6886_v49  ;;  %v6933_v62 = vpop.f32.mrb[107].mxu1 }
 0x1cb   :  { %v6934_v2 = vadd.f32 %v6933_v62, %v6932_v60 }
 0x1cc   :  { %7419 = vmatmul.mubr.bf16.gmra.mrb[204].mxu1 %v8107_v33  ;;  %v4758_v46 = vadd.f32 %v6888_v56, %v9795_v3  ;;  %v9923_v52 = vadd.f32 %v6931_v47, %v4755_v55 }
 0x1cd   :  { %7422 = vmatprep.mubr.msk.bf16.mxu1 %vm8136_vm0, %v8135_v28 }
 0x1ce   :  { %v9931_v57 = vadd.f32 %v6934_v2, %v4758_v46  ;;  %v6889_v6 = vpop.f32.mrb[108].mxu0 }
 0x1cf   :  { %v6890_v59 = vpop.f32.mrb[109].mxu0  ;;  %v6935_v0 = vpop.f32.mrb[108].mxu1 }
 0x1d0   :  { %5481 = vmatmul.mubr.bf16.gmra.mrb[208].mxu0 %v8110_v61  ;;  %v6891_v63 = vadd.f32 %v6890_v59, %v6889_v6  ;;  %v6892_v41 = vpop.f32.mrb[110].mxu0  ;;  %v6936_v15 = vpop.f32.mrb[109].mxu1 }
 0x1d1   :  { %5488 = vmatprep.mubr.bf16.mxu0 %v8112_v58  ;;  %v6893_v3 = vpop.f32.mrb[111].mxu0  ;;  %v6937_v12 = vadd.f32 %v6936_v15, %v6935_v0  ;;  %v6938_v20 = vpop.f32.mrb[110].mxu1 }
 0x1d2   :  { %v4763_v9 = vadd.f32 %v6891_v63, %v9824_v26  ;;  %v6894_v10 = vadd.f32 %v6893_v3, %v6892_v41  ;;  %v6939_v22 = vpop.f32.mrb[111].mxu1  ;;  %v8115_v26 = vld [vmem:[%s10160_s0 + $0x4b0] ss:$172 sps:$4 sm:$0xff]  }
 0x1d3   :  { %v6940_v4 = vadd.f32 %v6939_v22, %v6938_v20 }
 0x1d4   :  { %7423 = vmatmul.mubr.bf16.gmra.mrb[208].mxu1 %v8111_v54  ;;  %v4766_v17 = vadd.f32 %v6894_v10, %v9836_v39  ;;  %v9946_v23 = vadd.f32 %v6937_v12, %v4763_v9 }
 0x1d5   :  { %7426 = vmatprep.mubr.msk.bf16.mxu1 %vm8136_vm0, %v8135_v28 }
 0x1d6   :  { %v6895_v16 = vpop.f32.mrb[112].mxu0  ;;  %v9948_v24 = vadd.f32 %v6940_v4, %v4766_v17 }
 0x1d7   :  { %v6896_v27 = vpop.f32.mrb[113].mxu0  ;;  %v6941_v39 = vpop.f32.mrb[112].mxu1 }
 0x1d8   :  { %5489 = vmatmul.mubr.bf16.gmra.mrb[212].mxu0 %v8114_v14  ;;  %v6897_v29 = vadd.f32 %v6896_v27, %v6895_v16  ;;  %v6898_v18 = vpop.f32.mrb[114].mxu0  ;;  %v6942_v36 = vpop.f32.mrb[113].mxu1 }
 0x1d9   :  { %5496 = vmatprep.mubr.bf16.mxu0 %v6036_v11  ;;  %v6899_v5 = vpop.f32.mrb[115].mxu0  ;;  %v6943_v19 = vadd.f32 %v6942_v36, %v6941_v39  ;;  %v6944_v38 = vpop.f32.mrb[114].mxu1 }
 0x1da   :  { %v4771_v30 = vadd.f32 %v6897_v29, %v9865_v1  ;;  %v6900_v32 = vadd.f32 %v6899_v5, %v6898_v18  ;;  %v6945_v31 = vpop.f32.mrb[115].mxu1 }
 0x1db   :  { %v6946_v25 = vadd.f32 %v6945_v31, %v6944_v38 }
 0x1dc   :  { %7427 = vmatmul.mubr.bf16.gmra.mrb[212].mxu1 %v8115_v26  ;;  %v4774_v42 = vadd.f32 %v6900_v32, %v9873_v7  ;;  %v9957_v44 = vadd.f32 %v6943_v19, %v4771_v30 }
 0x1dd   :  { %7430 = vmatprep.mubr.msk.bf16.mxu1 %vm8136_vm0, %v8135_v28 }
 0x1de   :  { %v9959_v35 = vadd.f32 %v6946_v25, %v4774_v42  ;;  %v6901_v33 = vpop.f32.mrb[116].mxu0 }
 0x1df   :  { %v6902_v1 = vpop.f32.mrb[117].mxu0  ;;  %v6947_v7 = vpop.f32.mrb[116].mxu1 }
 0x1e0   :  { %5497 = vmatmul.mubr.bf16.gmra.mrb[216].mxu0 %v6035_v21  ;;  %v6903_v37 = vadd.f32 %v6902_v1, %v6901_v33  ;;  %v6904_v40 = vpop.f32.mrb[118].mxu0  ;;  %v6948_v49 = vpop.f32.mrb[117].mxu1 }
 0x1e1   :  { %7450 = vmatprep.mubr.msk.bf16.mxu0 %vm8136_vm0, %v8135_v28  ;;  %v6905_v50 = vpop.f32.mrb[119].mxu0  ;;  %v6949_v53 = vadd.f32 %v6948_v49, %v6947_v7  ;;  %v6950_v45 = vpop.f32.mrb[118].mxu1 }
 0x1e2   :  { %v4779_v51 = vadd.f32 %v6903_v37, %v9896_v13  ;;  %v6951_v55 = vpop.f32.mrb[119].mxu1 }
 0x1e4   :  { %7431 = vmatmul.mubr.bf16.gmra.mrb[216].mxu1 %v8118_v43  ;;  %v9966_v56 = vadd.f32 %v6949_v53, %v4779_v51 }
 0x1e5   :  { %7470 = vmatprep.mubr.msk.bf16.mxu1 %vm8136_vm0, %v8135_v28 }
 0x1e6   :  { %v6969_v47 = vpop.f32.mrb[120].mxu0 }
 0x1e7   :  { %v6970_v60 = vpop.f32.mrb[121].mxu0  ;;  %v7015_v46 = vpop.f32.mrb[120].mxu1 }
 0x1e8   :  { %v6971_v61 = vadd.f32 %v6970_v60, %v6969_v47  ;;  %v6972_v62 = vpop.f32.mrb[122].mxu0  ;;  %v7016_v6 = vpop.f32.mrb[121].mxu1 }
 0x1e9   :  { %v6973_v58 = vpop.f32.mrb[123].mxu0  ;;  %v7017_v59 = vadd.f32 %v7016_v6, %v7015_v46  ;;  %v7018_v63 = vpop.f32.mrb[122].mxu1 }
 0x1ea   :  { %v4891_v2 = vadd.f32 %v6971_v61, %v9906_v34  ;;  %v6974_v54 = vadd.f32 %v6973_v58, %v6972_v62  ;;  %v7019_v13 = vpop.f32.mrb[123].mxu1 }
 0x1eb   :  { %v7020_v8 = vadd.f32 %v7019_v13, %v7018_v63 }
 0x1ec   :  { %v4894_v41 = vadd.f32 %v6974_v54, %v9914_v48  ;;  %v9970_v3 = vadd.f32 %v7017_v59, %v4891_v2 }
 0x1ee   :  { %v9972_v9 = vadd.f32 %v7020_v8, %v4894_v41  ;;  %v6975_v0 = vpop.f32.mrb[124].mxu0 }
 0x1ef   :  { %v6976_v10 = vpop.f32.mrb[125].mxu0  ;;  %v7021_v17 = vpop.f32.mrb[124].mxu1 }
 0x1f0   :  { %v6977_v14 = vadd.f32 %v6976_v10, %v6975_v0  ;;  %v6978_v15 = vpop.f32.mrb[126].mxu0  ;;  %v7022_v20 = vpop.f32.mrb[125].mxu1 }
 0x1f1   :  { %v6979_v12 = vpop.f32.mrb[127].mxu0  ;;  %v7023_v22 = vadd.f32 %v7022_v20, %v7021_v17  ;;  %v7024_v26 = vpop.f32.mrb[126].mxu1 }
 0x1f2   :  { %v4899_v34 = vadd.f32 %v6977_v14, %v9923_v52  ;;  %v6980_v11 = vadd.f32 %v6979_v12, %v6978_v15  ;;  %v7025_v4 = vpop.f32.mrb[127].mxu1 }
 0x1f3   :  { %v7026_v27 = vadd.f32 %v7025_v4, %v7024_v26 }
 0x1f4   :  { %v4902_v48 = vadd.f32 %v6980_v11, %v9931_v57  ;;  %v9976_v16 = vadd.f32 %v7023_v22, %v4899_v34 }
 0x1f6   :  { %v9978_v29 = vadd.f32 %v7026_v27, %v4902_v48 }
 0x1f9   :  { %v7027_v36 = vpop.f32.mrb[128].mxu1 }
 0x1fa   :  { %v7028_v19 = vpop.f32.mrb[129].mxu1 }
 0x1fb   :  { %v7029_v42 = vadd.f32 %v7028_v19, %v7027_v36  ;;  %v7030_v31 = vpop.f32.mrb[130].mxu1 }
 0x1fc   :  { %v7031_v57 = vpop.f32.mrb[131].mxu1 }
 0x1fd   :  { %v7032_v25 = vadd.f32 %v7031_v57, %v7030_v31 }
 0x201   :  { %v6981_v18 = vpop.f32.mrb[128].mxu0 }
 0x202   :  { %v6982_v39 = vpop.f32.mrb[129].mxu0  ;;  %v7033_v50 = vpop.f32.mrb[132].mxu1 }
 0x203   :  { %v6983_v5 = vadd.f32 %v6982_v39, %v6981_v18  ;;  %v6984_v21 = vpop.f32.mrb[130].mxu0  ;;  %v7034_v53 = vpop.f32.mrb[133].mxu1 }
 0x204   :  { %v6985_v30 = vpop.f32.mrb[131].mxu0  ;;  %v7035_v45 = vadd.f32 %v7034_v53, %v7033_v50 }
 0x205   :  { %v4907_v32 = vadd.f32 %v6983_v5, %v9946_v23  ;;  %v6986_v52 = vadd.f32 %v6985_v30, %v6984_v21  ;;  %v8119_v21 = vld [vmem:[%s10161_s3] sm:$0xff]  }
 0x206   :  { %7435 = vmatpush3.bf16.msra.mxu0 %v8119_v21 }
 0x207   :  { %v4910_v38 = vadd.f32 %v6986_v52, %v9948_v24  ;;  %v9982_v43 = vadd.f32 %v7029_v42, %v4907_v32  ;;  %v7036_v24 = vpop.f32.mrb[134].mxu1  ;;  %7436 = vmatprep.subr.bf16.mxu0 %v8135_v28 }
 0x208   :  { %v7037_v47 = vpop.f32.mrb[135].mxu1 }
 0x209   :  { %v6987_v33 = vpop.f32.mrb[132].mxu0  ;;  %v9984_v1 = vadd.f32 %v7032_v25, %v4910_v38  ;;  %v7038_v61 = vadd.f32 %v7037_v47, %v7036_v24 }
 0x20a   :  { %v6988_v37 = vpop.f32.mrb[133].mxu0 }
 0x20b   :  { %v6989_v40 = vadd.f32 %v6988_v37, %v6987_v33  ;;  %v6990_v7 = vpop.f32.mrb[134].mxu0  ;;  %v7039_v6 = vpop.f32.mrb[136].mxu1 }
 0x20c   :  { %v6991_v49 = vpop.f32.mrb[135].mxu0  ;;  %v7040_v63 = vpop.f32.mrb[137].mxu1 }
 0x20d   :  { %v4915_v23 = vadd.f32 %v6989_v40, %v9957_v44  ;;  %v6992_v51 = vadd.f32 %v6991_v49, %v6990_v7  ;;  %v7041_v41 = vadd.f32 %v7040_v63, %v7039_v6  ;;  %v7042_v13 = vpop.f32.mrb[138].mxu1  ;;  %v8120_v7 = vld [vmem:[%s10161_s3 + $0x8] sm:$0xff]  }
 0x20e   :  { %v7043_v8 = vpop.f32.mrb[139].mxu1  ;;  %7437 = vmatpush3.bf16.msra.mxu0 %v8120_v7  ;;  %v8127_v7 = vld [vmem:[%s10162_s5] sm:$0xff]  }
 0x20f   :  { %v4918_v55 = vadd.f32 %v6992_v51, %v9959_v35  ;;  %v9988_v60 = vadd.f32 %v7035_v45, %v4915_v23  ;;  %7438 = vmatprep.subr.bf16.mxu0 %v8135_v28  ;;  %7455 = vmatpush3.bf16.msra.mxu1 %v8127_v7 }
 0x210   :  { %7456 = vmatprep.subr.bf16.mxu1 %v8135_v28 }
 0x211   :  { %v9990_v62 = vadd.f32 %v7038_v61, %v4918_v55  ;;  %v8121_v61 = vld [vmem:[%s10161_s3 + $0x10] sm:$0xff]  }
 0x212   :  { %v6993_v46 = vpop.f32.mrb[136].mxu0  ;;  %7439 = vmatpush3.bf16.msra.mxu0 %v8121_v61 }
 0x213   :  { %v6994_v58 = vpop.f32.mrb[137].mxu0  ;;  %7440 = vmatprep.subr.bf16.mxu0 %v8135_v28 }
 0x214   :  { %v6995_v2 = vadd.f32 %v6994_v58, %v6993_v46  ;;  %v6996_v54 = vpop.f32.mrb[138].mxu0 }
 0x215   :  { %v6997_v59 = vpop.f32.mrb[139].mxu0 }
 0x216   :  { %v4923_v44 = vadd.f32 %v6995_v2, %v9966_v56 }
 0x218   :  { %v9993_v0 = vadd.f32 %v7041_v41, %v4923_v44 }
 0x21a   :  { %v7061_v35 = vpop.f32.mrb[140].mxu0 }
 0x21b   :  { %v7062_v10 = vpop.f32.mrb[141].mxu0 }
 0x21c   :  { %v7063_v14 = vadd.f32 %v7062_v10, %v7061_v35  ;;  %v7064_v15 = vpop.f32.mrb[142].mxu0 }
 0x21d   :  { %v7107_v17 = vpop.f32.mrb[140].mxu1  ;;  %v7065_v12 = vpop.f32.mrb[143].mxu0 }
 0x21e   :  { %v5035_v20 = vadd.f32 %v7063_v14, %v9970_v3  ;;  %v7066_v34 = vadd.f32 %v7065_v12, %v7064_v15  ;;  %v7108_v11 = vpop.f32.mrb[141].mxu1  ;;  %v8123_v15 = vld [vmem:[%s10161_s3 + $0x20] sm:$0xff]  }
 0x21f   :  { %v7109_v22 = vadd.f32 %v7108_v11, %v7107_v17  ;;  %v7110_v26 = vpop.f32.mrb[142].mxu1  ;;  %v8124_v11 = vld [vmem:[%s10161_s3 + $0x28] sm:$0xff]  }
 0x220   :  { %v5038_v56 = vadd.f32 %v7066_v34, %v9972_v9  ;;  %v7111_v4 = vpop.f32.mrb[143].mxu1 }
 0x221   :  { %v9997_v48 = vadd.f32 %v7109_v22, %v5035_v20  ;;  %v7112_v27 = vadd.f32 %v7111_v4, %v7110_v26 }
 0x222   :  { %v7067_v39 = vpop.f32.mrb[144].mxu0 }
 0x223   :  { %v9999_v18 = vadd.f32 %v7112_v27, %v5038_v56  ;;  %v7068_v5 = vpop.f32.mrb[145].mxu0 }
 0x224   :  { %v7069_v30 = vadd.f32 %v7068_v5, %v7067_v39  ;;  %v7070_v3 = vpop.f32.mrb[146].mxu0  ;;  %v8125_v5 = vld [vmem:[%s10161_s3 + $0x30] sm:$0xff]  }
 0x225   :  { %v7113_v32 = vpop.f32.mrb[144].mxu1  ;;  %v7071_v36 = vpop.f32.mrb[147].mxu0 }
 0x226   :  { %v7114_v52 = vpop.f32.mrb[145].mxu1  ;;  %v5043_v9 = vadd.f32 %v7069_v30, %v9976_v16  ;;  %v7072_v19 = vadd.f32 %v7071_v36, %v7070_v3 }
 0x227   :  { %v7115_v38 = vadd.f32 %v7114_v52, %v7113_v32  ;;  %v7116_v42 = vpop.f32.mrb[146].mxu1  ;;  %v8126_v52 = vld [vmem:[%s10161_s3 + $0x38] sm:$0xff]  }
 0x228   :  { %v7117_v31 = vpop.f32.mrb[147].mxu1  ;;  %v5046_v57 = vadd.f32 %v7072_v19, %v9978_v29 }
 0x229   :  { %v10007_v25 = vadd.f32 %v7115_v38, %v5043_v9  ;;  %v7118_v33 = vadd.f32 %v7117_v31, %v7116_v42 }
 0x22a   :  { %v7073_v40 = vpop.f32.mrb[148].mxu0 }
 0x22b   :  { %v10009_v37 = vadd.f32 %v7118_v33, %v5046_v57  ;;  %v7074_v50 = vpop.f32.mrb[149].mxu0 }
 0x22c   :  { %v7075_v16 = vadd.f32 %v7074_v50, %v7073_v40  ;;  %v7076_v49 = vpop.f32.mrb[150].mxu0 }
 0x22d   :  { %v7077_v23 = vpop.f32.mrb[151].mxu0 }
 0x22e   :  { %v5051_v51 = vadd.f32 %v7075_v16, %v9982_v43  ;;  %v7119_v29 = vpop.f32.mrb[148].mxu1  ;;  %v7078_v53 = vadd.f32 %v7077_v23, %v7076_v49  ;;  %v8122_v43 = vld [vmem:[%s10161_s3 + $0x18] sm:$0xff]  }
 0x22f   :  { %v7120_v45 = vpop.f32.mrb[149].mxu1  ;;  %7441 = vmatpush3.bf16.msra.mxu0 %v8122_v43 }
 0x230   :  { %v5054_v24 = vadd.f32 %v7078_v53, %v9984_v1  ;;  %v7121_v55 = vadd.f32 %v7120_v45, %v7119_v29  ;;  %v7122_v47 = vpop.f32.mrb[150].mxu1  ;;  %7442 = vmatprep.subr.bf16.mxu0 %v8135_v28 }
 0x231   :  { %v7123_v46 = vpop.f32.mrb[151].mxu1 }
 0x232   :  { %v10020_v58 = vadd.f32 %v7121_v55, %v5051_v51  ;;  %v7124_v2 = vadd.f32 %v7123_v46, %v7122_v47  ;;  %v7079_v1 = vpop.f32.mrb[152].mxu0  ;;  %v8128_v51 = vld [vmem:[%s10162_s5 + $0x8] sm:$0xff]  }
 0x233   :  { %v7080_v6 = vpop.f32.mrb[153].mxu0  ;;  %7443 = vmatpush3.bf16.msra.mxu0 %v8123_v15  ;;  %7457 = vmatpush3.bf16.msra.mxu1 %v8128_v51 }
 0x234   :  { %v10026_v54 = vadd.f32 %v7124_v2, %v5054_v24  ;;  %v7081_v59 = vadd.f32 %v7080_v6, %v7079_v1  ;;  %v7082_v44 = vpop.f32.mrb[154].mxu0  ;;  %7444 = vmatprep.subr.bf16.mxu0 %v8135_v28  ;;  %7458 = vmatprep.subr.bf16.mxu1 %v8135_v28 }
 0x235   :  { %v7083_v41 = vpop.f32.mrb[155].mxu0 }
 0x236   :  { %v7125_v63 = vpop.f32.mrb[152].mxu1  ;;  %v5059_v8 = vadd.f32 %v7081_v59, %v9988_v60  ;;  %v7084_v35 = vadd.f32 %v7083_v41, %v7082_v44 }
 0x237   :  { %v7126_v13 = vpop.f32.mrb[153].mxu1  ;;  %7445 = vmatpush3.bf16.msra.mxu0 %v8124_v11 }
 0x238   :  { %v7127_v10 = vadd.f32 %v7126_v13, %v7125_v63  ;;  %v7128_v14 = vpop.f32.mrb[154].mxu1  ;;  %v5062_v12 = vadd.f32 %v7084_v35, %v9990_v62  ;;  %7446 = vmatprep.subr.bf16.mxu0 %v8135_v28  ;;  %v8130_v63 = vld [vmem:[%s10162_s5 + $0x18] sm:$0xff]  }
 0x239   :  { %v7129_v17 = vpop.f32.mrb[155].mxu1 }
 0x23a   :  { %v10034_v20 = vadd.f32 %v7127_v10, %v5059_v8  ;;  %v7130_v34 = vadd.f32 %v7129_v17, %v7128_v14  ;;  %v7085_v22 = vpop.f32.mrb[156].mxu0  ;;  %v8131_v14 = vld [vmem:[%s10162_s5 + $0x20] sm:$0xff]  }
 0x23b   :  { %v7086_v26 = vpop.f32.mrb[157].mxu0  ;;  %7447 = vmatpush3.bf16.msra.mxu0 %v8125_v5 }
 0x23c   :  { %v10040_v60 = vadd.f32 %v7130_v34, %v5062_v12  ;;  %v7087_v56 = vadd.f32 %v7086_v26, %v7085_v22  ;;  %v7088_v4 = vpop.f32.mrb[158].mxu0  ;;  %7448 = vmatprep.subr.bf16.mxu0 %v8135_v28  ;;  %v8132_v26 = vld [vmem:[%s10162_s5 + $0x28] sm:$0xff]  }
 0x23d   :  { %v7089_v62 = vpop.f32.mrb[159].mxu0 }
 0x23e   :  { %v7131_v27 = vpop.f32.mrb[156].mxu1  ;;  %v5067_v21 = vadd.f32 %v7087_v56, %v9993_v0 }
 0x23f   :  { %v7132_v39 = vpop.f32.mrb[157].mxu1  ;;  %7449 = vmatpush3.bf16.msra.mxu0 %v8126_v52 }
 0x240   :  { %v7133_v30 = vadd.f32 %v7132_v39, %v7131_v27  ;;  %v7134_v3 = vpop.f32.mrb[158].mxu1 }
 0x241   :  { %v7135_v32 = vpop.f32.mrb[159].mxu1 }
 0x242   :  { %v10047_v36 = vadd.f32 %v7133_v30, %v5067_v21  ;;  %v7153_v9 = vpop.f32.mrb[160].mxu0 }
 0x243   :  { %v7154_v19 = vpop.f32.mrb[161].mxu0 }
 0x244   :  { %v7155_v38 = vadd.f32 %v7154_v19, %v7153_v9  ;;  %v7156_v42 = vpop.f32.mrb[162].mxu0 }
 0x245   :  { %v7157_v57 = vpop.f32.mrb[163].mxu0 }
 0x246   :  { %v7199_v31 = vpop.f32.mrb[160].mxu1  ;;  %v5179_v0 = vadd.f32 %v7155_v38, %v9997_v48  ;;  %v7158_v33 = vadd.f32 %v7157_v57, %v7156_v42 }
 0x247   :  { %v7200_v40 = vpop.f32.mrb[161].mxu1 }
 0x248   :  { %v7201_v50 = vadd.f32 %v7200_v40, %v7199_v31  ;;  %v7202_v16 = vpop.f32.mrb[162].mxu1  ;;  %v5182_v49 = vadd.f32 %v7158_v33, %v9999_v18  ;;  %v8129_v18 = vld [vmem:[%s10162_s5 + $0x10] sm:$0xff]  }
 0x249   :  { %v7203_v23 = vpop.f32.mrb[163].mxu1  ;;  %7459 = vmatpush3.bf16.msra.mxu1 %v8129_v18 }
 0x24a   :  { %v10061_v29 = vadd.f32 %v7201_v50, %v5179_v0  ;;  %v7204_v53 = vadd.f32 %v7203_v23, %v7202_v16  ;;  %v7159_v45 = vpop.f32.mrb[164].mxu0  ;;  %7460 = vmatprep.subr.bf16.mxu1 %v8135_v28 }
 0x24b   :  { %v7160_v24 = vpop.f32.mrb[165].mxu0 }
 0x24c   :  { %v10064_v48 = vadd.f32 %v7204_v53, %v5182_v49  ;;  %v7161_v55 = vadd.f32 %v7160_v24, %v7159_v45  ;;  %v7162_v47 = vpop.f32.mrb[166].mxu0 }
 0x24d   :  { %v7163_v46 = vpop.f32.mrb[167].mxu0  ;;  %7461 = vmatpush3.bf16.msra.mxu1 %v8130_v63 }
 0x24e   :  { %v7205_v61 = vpop.f32.mrb[164].mxu1  ;;  %v5187_v43 = vadd.f32 %v7161_v55, %v10007_v25  ;;  %v7164_v1 = vadd.f32 %v7163_v46, %v7162_v47  ;;  %7462 = vmatprep.subr.bf16.mxu1 %v8135_v28 }
 0x24f   :  { %v7206_v2 = vpop.f32.mrb[165].mxu1 }
 0x250   :  { %v7207_v6 = vadd.f32 %v7206_v2, %v7205_v61  ;;  %v7208_v59 = vpop.f32.mrb[166].mxu1  ;;  %v5190_v41 = vadd.f32 %v7164_v1, %v10009_v37 }
 0x251   :  { %v7209_v44 = vpop.f32.mrb[167].mxu1  ;;  %7463 = vmatpush3.bf16.msra.mxu1 %v8131_v14 }
 0x252   :  { %v10075_v13 = vadd.f32 %v7207_v6, %v5187_v43  ;;  %v7210_v8 = vadd.f32 %v7209_v44, %v7208_v59  ;;  %v7165_v10 = vpop.f32.mrb[168].mxu0  ;;  %7464 = vmatprep.subr.bf16.mxu1 %v8135_v28 }
 0x253   :  { %v7166_v25 = vpop.f32.mrb[169].mxu0 }
 0x254   :  { %v10078_v35 = vadd.f32 %v7210_v8, %v5190_v41  ;;  %v7167_v15 = vadd.f32 %v7166_v25, %v7165_v10  ;;  %v7168_v17 = vpop.f32.mrb[170].mxu0 }
 0x255   :  { %v7169_v12 = vpop.f32.mrb[171].mxu0  ;;  %7465 = vmatpush3.bf16.msra.mxu1 %v8132_v26 }
 0x256   :  { %v5195_v37 = vadd.f32 %v7167_v15, %v10020_v58  ;;  %v7170_v11 = vadd.f32 %v7169_v12, %v7168_v17  ;;  %v8133_v58 = vld [vmem:[%s10162_s5 + $0x30] sm:$0xff]   ;;  %7466 = vmatprep.subr.bf16.mxu1 %v8135_v28 }
 0x257   :  { %v7211_v34 = vpop.f32.mrb[168].mxu1 }
 0x258   :  { %v7212_v22 = vpop.f32.mrb[169].mxu1  ;;  %v5198_v56 = vadd.f32 %v7170_v11, %v10026_v54 }
 0x259   :  { %v7213_v4 = vadd.f32 %v7212_v22, %v7211_v34  ;;  %v7214_v27 = vpop.f32.mrb[170].mxu1  ;;  %7467 = vmatpush3.bf16.msra.mxu1 %v8133_v58 }
 0x25a   :  { %v7215_v62 = vpop.f32.mrb[171].mxu1  ;;  %v7171_v21 = vpop.f32.mrb[172].mxu0  ;;  %7468 = vmatprep.subr.bf16.mxu1 %v8135_v28 }
 0x25b   :  { %v10090_v39 = vadd.f32 %v7213_v4, %v5195_v37  ;;  %v7216_v5 = vadd.f32 %v7215_v62, %v7214_v27  ;;  %v7172_v3 = vpop.f32.mrb[173].mxu0 }
 0x25c   :  { %v7173_v54 = vadd.f32 %v7172_v3, %v7171_v21  ;;  %v7174_v32 = vpop.f32.mrb[174].mxu0 }
 0x25d   :  { %v10095_v30 = vadd.f32 %v7216_v5, %v5198_v56  ;;  %v7175_v9 = vpop.f32.mrb[175].mxu0 }
 0x25e   :  { %v5203_v19 = vadd.f32 %v7173_v54, %v10034_v20  ;;  %v7176_v38 = vadd.f32 %v7175_v9, %v7174_v32 }
 0x25f   :  { %v7217_v52 = vpop.f32.mrb[172].mxu1 }
 0x260   :  { %v7218_v42 = vpop.f32.mrb[173].mxu1  ;;  %v5206_v0 = vadd.f32 %v7176_v38, %v10040_v60 }
 0x261   :  { %v7219_v31 = vadd.f32 %v7218_v42, %v7217_v52  ;;  %v7220_v57 = vpop.f32.mrb[174].mxu1 }
 0x262   :  { %v7221_v33 = vpop.f32.mrb[175].mxu1 }
 0x263   :  { %v10101_v40 = vadd.f32 %v7219_v31, %v5203_v19  ;;  %v7222_v7 = vadd.f32 %v7221_v33, %v7220_v57  ;;  %v7177_v16 = vpop.f32.mrb[176].mxu0 }
 0x264   :  { %v7178_v49 = vpop.f32.mrb[177].mxu0 }
 0x265   :  { %v10103_v50 = vadd.f32 %v7222_v7, %v5206_v0  ;;  %v7179_v23 = vadd.f32 %v7178_v49, %v7177_v16  ;;  %v7180_v51 = vpop.f32.mrb[178].mxu0 }
 0x266   :  { %v7181_v53 = vpop.f32.mrb[179].mxu0 }
 0x267   :  { %v7223_v20 = vpop.f32.mrb[176].mxu1  ;;  %v5211_v24 = vadd.f32 %v7179_v23, %v10047_v36 }
 0x268   :  { %v7224_v45 = vpop.f32.mrb[177].mxu1 }
 0x269   :  { %v7225_v18 = vadd.f32 %v7224_v45, %v7223_v20  ;;  %v7226_v55 = vpop.f32.mrb[178].mxu1 }
 0x26a   :  { %v7227_v28 = vpop.f32.mrb[179].mxu1 }
 0x26b   :  { %v10106_v47 = vadd.f32 %v7225_v18, %v5211_v24  ;;  %v7245_v60 = vpop.f32.mrb[180].mxu0 }
 0x26c   :  { %v7246_v61 = vpop.f32.mrb[181].mxu0 }
 0x26d   :  { %v7247_v46 = vadd.f32 %v7246_v61, %v7245_v60  ;;  %v7248_v2 = vpop.f32.mrb[182].mxu0 }
 0x26e   :  { %v7249_v1 = vpop.f32.mrb[183].mxu0 }
 0x26f   :  { %v7291_v43 = vpop.f32.mrb[180].mxu1  ;;  %v5323_v6 = vadd.f32 %v7247_v46, %v10061_v29  ;;  %v7250_v59 = vadd.f32 %v7249_v1, %v7248_v2 }
 0x270   :  { %v7292_v44 = vpop.f32.mrb[181].mxu1 }
 0x271   :  { %v7293_v63 = vadd.f32 %v7292_v44, %v7291_v43  ;;  %v7294_v41 = vpop.f32.mrb[182].mxu1  ;;  %v5326_v8 = vadd.f32 %v7250_v59, %v10064_v48 }
 0x272   :  { %v7295_v36 = vpop.f32.mrb[183].mxu1 }
 0x273   :  { %v10110_v10 = vadd.f32 %v7293_v63, %v5323_v6  ;;  %v7296_v25 = vadd.f32 %v7295_v36, %v7294_v41  ;;  %v7251_v14 = vpop.f32.mrb[184].mxu0 }
 0x274   :  { %v7252_v17 = vpop.f32.mrb[185].mxu0 }
 0x275   :  { %v10112_v15 = vadd.f32 %v7296_v25, %v5326_v8  ;;  %v7253_v12 = vadd.f32 %v7252_v17, %v7251_v14  ;;  %v7254_v37 = vpop.f32.mrb[186].mxu0 }
 0x276   :  { %v7255_v11 = vpop.f32.mrb[187].mxu0 }
 0x277   :  { %v7297_v34 = vpop.f32.mrb[184].mxu1  ;;  %v5331_v29 = vadd.f32 %v7253_v12, %v10075_v13  ;;  %v7256_v22 = vadd.f32 %v7255_v11, %v7254_v37 }
 0x278   :  { %v7298_v26 = vpop.f32.mrb[185].mxu1 }
 0x279   :  { %v7299_v56 = vadd.f32 %v7298_v26, %v7297_v34  ;;  %v7300_v4 = vpop.f32.mrb[186].mxu1  ;;  %v5334_v48 = vadd.f32 %v7256_v22, %v10078_v35 }
 0x27a   :  { %v7301_v27 = vpop.f32.mrb[187].mxu1 }
 0x27b   :  { %v10116_v62 = vadd.f32 %v7299_v56, %v5331_v29  ;;  %v7302_v5 = vadd.f32 %v7301_v27, %v7300_v4  ;;  %v7257_v21 = vpop.f32.mrb[188].mxu0 }
 0x27c   :  { %v7258_v3 = vpop.f32.mrb[189].mxu0 }
 0x27d   :  { %v10118_v58 = vadd.f32 %v7302_v5, %v5334_v48  ;;  %v7259_v54 = vadd.f32 %v7258_v3, %v7257_v21  ;;  %v7260_v32 = vpop.f32.mrb[190].mxu0 }
 0x27e   :  { %v7261_v9 = vpop.f32.mrb[191].mxu0 }
 0x27f   :  { %v7303_v52 = vpop.f32.mrb[188].mxu1  ;;  %v5339_v13 = vadd.f32 %v7259_v54, %v10090_v39  ;;  %v7262_v19 = vadd.f32 %v7261_v9, %v7260_v32 }
 0x280   :  { %v7304_v38 = vpop.f32.mrb[189].mxu1 }
 0x281   :  { %v7305_v42 = vadd.f32 %v7304_v38, %v7303_v52  ;;  %v7306_v31 = vpop.f32.mrb[190].mxu1  ;;  %v5342_v35 = vadd.f32 %v7262_v19, %v10095_v30 }
 0x282   :  { %v7307_v57 = vpop.f32.mrb[191].mxu1 }
 0x283   :  { %v10122_v0 = vadd.f32 %v7305_v42, %v5339_v13  ;;  %v7308_v33 = vadd.f32 %v7307_v57, %v7306_v31  ;;  %v7263_v7 = vpop.f32.mrb[192].mxu0 }
 0x284   :  { %v7264_v49 = vpop.f32.mrb[193].mxu0 }
 0x285   :  { %v10124_v16 = vadd.f32 %v7308_v33, %v5342_v35  ;;  %v7265_v23 = vadd.f32 %v7264_v49, %v7263_v7  ;;  %v7266_v51 = vpop.f32.mrb[194].mxu0 }
 0x286   :  { %v7267_v53 = vpop.f32.mrb[195].mxu0 }
 0x287   :  { %v7309_v20 = vpop.f32.mrb[192].mxu1  ;;  %v5347_v39 = vadd.f32 %v7265_v23, %v10101_v40  ;;  %v7268_v45 = vadd.f32 %v7267_v53, %v7266_v51 }
 0x288   :  { %v7310_v24 = vpop.f32.mrb[193].mxu1 }
 0x289   :  { %v7311_v18 = vadd.f32 %v7310_v24, %v7309_v20  ;;  %v7312_v55 = vpop.f32.mrb[194].mxu1  ;;  %v5350_v30 = vadd.f32 %v7268_v45, %v10103_v50 }
 0x28a   :  { %v7313_v28 = vpop.f32.mrb[195].mxu1 }
 0x28b   :  { %v10128_v60 = vadd.f32 %v7311_v18, %v5347_v39  ;;  %v7314_v61 = vadd.f32 %v7313_v28, %v7312_v55  ;;  %v7269_v46 = vpop.f32.mrb[196].mxu0 }
 0x28c   :  { %v7270_v43 = vpop.f32.mrb[197].mxu0 }
 0x28d   :  { %v10130_v2 = vadd.f32 %v7314_v61, %v5350_v30  ;;  %v7271_v1 = vadd.f32 %v7270_v43, %v7269_v46  ;;  %v7272_v6 = vpop.f32.mrb[198].mxu0 }
 0x28e   :  { %v7273_v44 = vpop.f32.mrb[199].mxu0 }
 0x28f   :  { %v7315_v59 = vpop.f32.mrb[196].mxu1  ;;  %v5355_v40 = vadd.f32 %v7271_v1, %v10106_v47 }
 0x290   :  { %v7316_v63 = vpop.f32.mrb[197].mxu1 }
 0x291   :  { %v7317_v41 = vadd.f32 %v7316_v63, %v7315_v59  ;;  %v7318_v8 = vpop.f32.mrb[198].mxu1 }
 0x292   :  { %v7319_v36 = vpop.f32.mrb[199].mxu1 }
 0x293   :  { %v10133_v25 = vadd.f32 %v7317_v41, %v5355_v40  ;;  %v7337_v50 = vpop.f32.mrb[200].mxu0 }
 0x294   :  { %v7338_v14 = vpop.f32.mrb[201].mxu0 }
 0x295   :  { %v7339_v17 = vadd.f32 %v7338_v14, %v7337_v50  ;;  %v7340_v12 = vpop.f32.mrb[202].mxu0 }
 0x296   :  { %v7341_v37 = vpop.f32.mrb[203].mxu0 }
 0x297   :  { %v5538_v34 = vpop.f32.mrb[200].mxu1  ;;  %v7342_v11 = vadd.f32 %v7341_v37, %v7340_v12  ;;  %v5467_v29 = vadd.f32 %v7339_v17, %v10110_v10 }
 0x298   :  { %v7416_v22 = vpop.f32.mrb[201].mxu1 }
 0x299   :  { %v5541_v26 = vpop.f32.mrb[202].mxu1  ;;  %v5539_v56 = vadd.f32 %v5538_v34, %v5467_v29  ;;  %v5470_v47 = vadd.f32 %v7342_v11, %v10112_v15 }
 0x29a   :  { %v7417_v4 = vpop.f32.mrb[203].mxu1 }
 0x29b   :  { %v5542_v48 = vadd.f32 %v5541_v26, %v5470_v47  ;;  %v7343_v27 = vpop.f32.mrb[204].mxu0 }
 0x29c   :  { %v7344_v5 = vpop.f32.mrb[205].mxu0 }
 0x29d   :  { %v5576_v21 = vmax.f32 %v5539_v56, %v5542_v48  ;;  %v7345_v3 = vadd.f32 %v7344_v5, %v7343_v27  ;;  %v7346_v54 = vpop.f32.mrb[206].mxu0 }
 0x29e   :  { %v7347_v32 = vpop.f32.mrb[207].mxu0 }
 0x29f   :  { %v5546_v52 = vpop.f32.mrb[204].mxu1  ;;  %v7348_v9 = vadd.f32 %v7347_v32, %v7346_v54  ;;  %v5475_v13 = vadd.f32 %v7345_v3, %v10116_v62 }
 0x2a0   :  { %v7420_v19 = vpop.f32.mrb[205].mxu1 }
 0x2a1   :  { %v5549_v38 = vpop.f32.mrb[206].mxu1  ;;  %v5547_v10 = vadd.f32 %v5546_v52, %v5475_v13  ;;  %v5478_v42 = vadd.f32 %v7348_v9, %v10118_v58 }
 0x2a2   :  { %v7421_v31 = vpop.f32.mrb[207].mxu1 }
 0x2a3   :  { %v5577_v35 = vmax.f32 %v5576_v21, %v5547_v10  ;;  %v5550_v15 = vadd.f32 %v5549_v38, %v5478_v42  ;;  %v7349_v57 = vpop.f32.mrb[208].mxu0  ;;  %v8134_v21 = vld [vmem:[%s10162_s5 + $0x38] sm:$0xff]   ;;  %v6392_v38 = vld [vmem:[%s10165_s6] ss:$0 sm:$0xff] }
 0x2a4   :  { %v7350_v33 = vpop.f32.mrb[209].mxu0  ;;  %7469 = vmatpush3.bf16.msra.mxu1 %v8134_v21 }
 0x2a5   :  { %v5578_v7 = vmax.f32 %v5577_v35, %v5550_v15  ;;  %v7351_v49 = vadd.f32 %v7350_v33, %v7349_v57  ;;  %v7352_v23 = vpop.f32.mrb[210].mxu0 }
 0x2a6   :  { %v7353_v51 = vpop.f32.mrb[211].mxu0 }
 0x2a7   :  { %v5554_v20 = vpop.f32.mrb[208].mxu1  ;;  %v7354_v53 = vadd.f32 %v7353_v51, %v7352_v23  ;;  %v5483_v39 = vadd.f32 %v7351_v49, %v10122_v0 }
 0x2a8   :  { %v7424_v45 = vpop.f32.mrb[209].mxu1 }
 0x2a9   :  { %v5557_v62 = vpop.f32.mrb[210].mxu1  ;;  %v5555_v24 = vadd.f32 %v5554_v20, %v5483_v39  ;;  %v5486_v18 = vadd.f32 %v7354_v53, %v10124_v16 }
 0x2aa   :  { %v7425_v55 = vpop.f32.mrb[211].mxu1 }
 0x2ab   :  { %v5579_v58 = vmax.f32 %v5578_v7, %v5555_v24  ;;  %v5558_v30 = vadd.f32 %v5557_v62, %v5486_v18  ;;  %v7355_v28 = vpop.f32.mrb[212].mxu0 }
 0x2ac   :  { %v7356_v61 = vpop.f32.mrb[213].mxu0 }
 0x2ad   :  { %v5580_v46 = vmax.f32 %v5579_v58, %v5558_v30  ;;  %v7357_v43 = vadd.f32 %v7356_v61, %v7355_v28  ;;  %v7358_v1 = vpop.f32.mrb[214].mxu0 }
 0x2ae   :  { %v7359_v6 = vpop.f32.mrb[215].mxu0 }
 0x2af   :  { %v5562_v59 = vpop.f32.mrb[212].mxu1  ;;  %v7360_v44 = vadd.f32 %v7359_v6, %v7358_v1  ;;  %v5491_v40 = vadd.f32 %v7357_v43, %v10128_v60 }
 0x2b0   :  { %v7428_v63 = vpop.f32.mrb[213].mxu1 }
 0x2b1   :  { %v5565_v0 = vpop.f32.mrb[214].mxu1  ;;  %v5563_v41 = vadd.f32 %v5562_v59, %v5491_v40  ;;  %v5494_v8 = vadd.f32 %v7360_v44, %v10130_v2  ;;  %v6382_v2 = vld [vmem:[%s10163_s2] ss:$0 sm:$0xff] }
 0x2b2   :  { %v7429_v36 = vpop.f32.mrb[215].mxu1 }
 0x2b3   :  { %v5581_v16 = vmax.f32 %v5580_v46, %v5563_v41  ;;  %v5566_v50 = vadd.f32 %v5565_v0, %v5494_v8  ;;  %v7361_v14 = vpop.f32.mrb[216].mxu0 }
 0x2b4   :  { %v7362_v17 = vpop.f32.mrb[217].mxu0 }
 0x2b5   :  { %v5582_v12 = vmax.f32 %v5581_v16, %v5566_v50  ;;  %v7363_v37 = vadd.f32 %v7362_v17, %v7361_v14  ;;  %v7364_v34 = vpop.f32.mrb[218].mxu0 }
 0x2b6   :  { %v7365_v11 = vpop.f32.mrb[219].mxu0 }
 0x2b7   :  { %v5570_v29 = vpop.f32.mrb[216].mxu1  ;;  %v5499_v22 = vadd.f32 %v7363_v37, %v10133_v25  ;;  %v6383_v25 = vld [vmem:[%s10164_s4] ss:$0 sm:$0xff] }
 0x2b8   :  { %v7432_v26 = vpop.f32.mrb[217].mxu1 }
 0x2b9   :  { %v5573_v56 = vpop.f32.mrb[218].mxu1  ;;  %v5571_v60 = vadd.f32 %v5570_v29, %v5499_v22 }
 0x2ba   :  { %v7433_v47 = vpop.f32.mrb[219].mxu1 }
 0x2bb   :  { %v5583_v4 = vmax.f32 %v5582_v12, %v5571_v60 }
 0x2bd   :  { %v5591_v48 = vadd.f32 %v6382_v2, %v5583_v4 }
 0x2bf   :  { %v5592_v27 = vmax.f32 %v5591_v48, 0.0 }
 0x2c1   :  { %v5593_v5 = vpack.c.bf16 %v5592_v27, %v5592_v27 }
 0x2c3   :  { %7451 = vmatmul.mubr.bf16.vlgmr.msra.gmra.mrb[220].mxu0 %v5593_v5 }
 0x396   :  { %v5699_v3 = vpop.f32.mrb[220].mxu0 }
 0x397   :  { %v5700_v54 = vadd.f32 %v6383_v25, %v5699_v3  ;;  %v7452_v32 = vpop.f32.mrb[221].mxu0 }
 0x398   :  { %v5702_v52 = vpop.f32.mrb[222].mxu0 }
 0x399   :  { %v5705_v9 = vmax.f32 %v5700_v54, 0.0  ;;  %v7453_v13 = vpop.f32.mrb[223].mxu0 }
 0x39b   :  { %v5706_v19 = vpack.c.bf16 %v5705_v9, %v5705_v9 }
 0x39d   :  { %7471 = vmatmul.mubr.bf16.vlgmr.msra.gmra.mrb[220].mxu1 %v5706_v19 }
 0x470   :  { %v5812_v10 = vpop.f32.mrb[220].mxu1 }
 0x471   :  { %v5813_v42 = vadd.f32 %v6392_v38, %v5812_v10  ;;  %v7472_v31 = vpop.f32.mrb[221].mxu1 }
 0x472   :  { %v5815_v35 = vpop.f32.mrb[222].mxu1 }
 0x473   :  { %5818 = vst [vmem:[%s10166_s7] sm:$0xff] %v5813_v42  ;;  %v7473_v15 = vpop.f32.mrb[223].mxu1 }

</bundles_post_ra>
